<compile_context>
chip_gen: v5e
topology: v5e:2x2
jax: 0.10.0
libtpu: 0.0.40
codegen_flags: <defaults>
</compile_context>

<pallas_src>
import functools

import jax
import jax.numpy as jnp
from jax import lax
from jax.experimental import pallas as pl
from jax.experimental.pallas import tpu as pltpu

# ----------------------------- configuration --------------------------------
IMG_SIZE = 16
POSE_DIM = 7
NODE_DIM = 256          # 2 position dims + 254 embedding dims (lane-dense)
EMB_DIM = 254           # original Pool output width; stored in columns 2..255
MSG_SZ = 128
UPDATE_SZ = 254         # only the last 254 dims of each node state are updated
EDGE_HID = 128
NODE_HID = 128
MSG_STEPS = 3
GRID_K = 4              # 4x4 node grid
NUM_NODES = GRID_K * GRID_K
NUM_COPIES = 0          # GEN_Composer default num_copies=0

POOL_K = 3 * IMG_SIZE * IMG_SIZE + POSE_DIM        # 775
POOL_K_PAD = 896                                   # next multiple of 128


# ------------------------------ Pallas kernel --------------------------------
def _gen_composer_kernel(pool_ref, sbd_ref, abd_ref,
                         wp_ref, bp_ref, pos_ref, gsrc_ref, gsnk_ref,
                         w1e_ref, b1e_ref, we2n_ref, bnode_ref,
                         w1ns_ref, w2n_ref, b2n_ref,
                         o_ref):
    """TB batch elements per grid step; all MSG_STEPS fused; all dots 2-D."""
    f32 = jnp.float32
    bf16 = jnp.bfloat16

    # ---- Pool embedder: linear + tanh (f32 on the EUP).  The 254-d embedding
    # lives lane-dense in columns 2..255 (w_pool cols 0..1 are zero).
    emb = jnp.tanh(
        jnp.dot(pool_ref[0], wp_ref[...], preferred_element_type=f32)
        + bp_ref[...])                                              # (TB*V, 256)

    # ---- scores^T folded into a block-diagonal matrix host-side: batch folds
    # into the MXU M dimension, no in-kernel transpose / batched dot.
    states = pos_ref[...] + jnp.dot(sbd_ref[0], emb.astype(bf16),
                                    preferred_element_type=f32)     # (TB*N, 256)

    for _ in range(MSG_STEPS):
        states_bf = states.astype(bf16)

        # Merged edge projection: one 256-wide matmul instead of two 128-wide;
        # result sliced at the 128-lane boundary.
        t_cat = jnp.dot(states_bf, w1e_ref[...],
                        preferred_element_type=f32)                 # (TB*N, 2*HE)
        t_src = t_cat[:, :EDGE_HID].astype(bf16)
        t_snk = t_cat[:, EDGE_HID:].astype(bf16)

        # Gather projected node states onto edges via block-diagonal one-hots;
        # bias + ReLU stay in f32 on the VPU.
        h = jnp.maximum(
            jnp.dot(gsrc_ref[...], t_src, preferred_element_type=f32)
            + jnp.dot(gsnk_ref[...], t_snk, preferred_element_type=f32)
            + b1e_ref[...], 0.0)                                    # (TB*E, HE)

        # w2e @ w1n_msg folded offline (W_e2n): edge hidden -> node-hidden
        # contribution directly, one fewer dependent matmul in the MXU chain.
        m2 = jnp.dot(h.astype(bf16), we2n_ref[...],
                     preferred_element_type=f32)                    # (TB*E, HN)
        # index_add over sink nodes == gsnk^T @ m2 (contract edge axis).
        scat = lax.dot_general(gsnk_ref[...], m2.astype(bf16),
                               (((0,), (0,)), ((), ())),
                               preferred_element_type=f32)          # (TB*N, HN)

        h2 = jnp.maximum(
            scat
            + jnp.dot(states_bf, w1ns_ref[...], preferred_element_type=f32)
            + bnode_ref[...], 0.0)                                  # (TB*N, HN)

        # w2n / b2n cols 0..1 are zero -> only the last 254 state dims update
        # (node positions stay fixed), reproducing the -update_sz slice add.
        states = states + jnp.dot(h2.astype(bf16), w2n_ref[...],
                                  preferred_element_type=f32) + b2n_ref[...]

    # ---- graph_out_to_out: block-diagonal attn @ nodes_states ----------------
    o_ref[0] = jnp.dot(abd_ref[0], states.astype(bf16),
                       preferred_element_type=f32)                  # (TB*Q, 256)


def gen_composer_fused(pool_in, s_bd, a_bd, consts):
    (wp, bp, pos_tiled, gsrc_bd, gsnk_bd, w1e_cat, b1e, w_e2n,
     bias_node, w1ns, w2n, b2n) = consts

    G, tbN, tbV = s_bd.shape
    tbQ = a_bd.shape[1]
    tbE = gsrc_bd.shape[0]
    Kp = pool_in.shape[-1]

    def full(arr):
        nd = arr.ndim
        return pl.BlockSpec(arr.shape, lambda g, _n=nd: (0,) * _n)

    def nbytes(x):
        return int(x.size) * x.dtype.itemsize

    # Advisory cost estimate so XLA can overlap the surrounding interpolation /
    # block-diag prep with the custom call.
    per_step = (2 * tbN * NODE_DIM * (2 * EDGE_HID)        # states @ w1e_cat
                + 2 * tbE * tbN * EDGE_HID * 2             # edge gather src+snk
                + 2 * tbE * EDGE_HID * NODE_HID            # h @ W_e2n
                + 2 * tbE * tbN * NODE_HID                 # scatter to nodes
                + 2 * tbN * NODE_DIM * NODE_HID            # states @ w1n_state
                + 2 * tbN * NODE_HID * NODE_DIM)           # h2 @ w2n
    flops_per_block = (2 * tbV * Kp * NODE_DIM
                       + 2 * tbN * tbV * NODE_DIM
                       + MSG_STEPS * per_step
                       + 2 * tbQ * tbN * NODE_DIM)
    cost = pl.CostEstimate(
        flops=G * flops_per_block,
        transcendentals=G * tbV * NODE_DIM,
        bytes_accessed=(nbytes(pool_in) + nbytes(s_bd) + nbytes(a_bd)
                        + G * sum(nbytes(c) for c in consts)
                        + G * tbQ * NODE_DIM * 4))

    return pl.pallas_call(
        _gen_composer_kernel,
        out_shape=jax.ShapeDtypeStruct((G, tbQ, NODE_DIM), jnp.float32),
        grid=(G,),
        in_specs=[
            pl.BlockSpec((1, tbV, Kp), lambda g: (g, 0, 0)),
            pl.BlockSpec((1, tbN, tbV), lambda g: (g, 0, 0)),
            pl.BlockSpec((1, tbQ, tbN), lambda g: (g, 0, 0)),
            full(wp), full(bp), full(pos_tiled), full(gsrc_bd), full(gsnk_bd),
            full(w1e_cat), full(b1e), full(w_e2n), full(bias_node),
            full(w1ns), full(w2n), full(b2n),
        ],
        out_specs=pl.BlockSpec((1, tbQ, NODE_DIM), lambda g: (g, 0, 0)),
        compiler_params=pltpu.CompilerParams(
            dimension_semantics=("parallel",)),
        cost_estimate=cost,
    )(pool_in, s_bd, a_bd, wp, bp, pos_tiled, gsrc_bd, gsnk_bd,
      w1e_cat, b1e, w_e2n, bias_node, w1ns, w2n, b2n)


# ------------------------------ graph structure -------------------------------
def build_structure():
    xs = jnp.linspace(0.0, 1.0, GRID_K)
    gx, gy = jnp.meshgrid(xs, xs, indexing="ij")
    node_positions = jnp.stack([gx.reshape(-1), gy.reshape(-1)], axis=1)  # (N, 2)

    srcs, snks = [], []

    def nid(i, j):
        return i * GRID_K + j

    for i in range(GRID_K):
        for j in range(GRID_K):
            if i + 1 < GRID_K:
                srcs += [nid(i, j), nid(i + 1, j)]
                snks += [nid(i + 1, j), nid(i, j)]
            if j + 1 < GRID_K:
                srcs += [nid(i, j), nid(i, j + 1)]
                snks += [nid(i, j + 1), nid(i, j)]

    srcs = jnp.array(srcs, dtype=jnp.int32)
    snks = jnp.array(snks, dtype=jnp.int32)
    gsrc = jax.nn.one_hot(srcs, NUM_NODES, dtype=jnp.float32)  # (E, N) gather
    gsnk = jax.nn.one_hot(snks, NUM_NODES, dtype=jnp.float32)  # (E, N) gather/scatter
    indeg = jnp.sum(gsnk, axis=0)                              # (N,) in-degrees

    node_positions = node_positions.astype(jnp.float32)
    # Lane-dense node-state seed: positions in cols 0..1, zeros elsewhere.
    node_pos_pad = jnp.zeros((NUM_NODES, NODE_DIM), jnp.float32)
    node_pos_pad = node_pos_pad.at[:, :2].set(node_positions)
    return node_positions, node_pos_pad, gsrc, gsnk, indeg


def interpolation_scores(poses, node_positions, tau=0.05):
    # TODO(synk): GraphStructure.get_interpolation_coordinates is not provided;
    # use a softmax over negative squared distance from pose xy to node grid.
    xy = poses[..., :2]                                              # (B, P, 2)
    diff = xy[:, :, None, :] - node_positions[None, None, :, :]      # (B, P, N, 2)
    d2 = jnp.sum(diff * diff, axis=-1)                               # (B, P, N)
    return jax.nn.softmax(-d2 / tau, axis=-1)


# ------------------------------ parameters -----------------------------------
def init_params(key):
    ks = jax.random.split(key, 8)

    def w(k, shape, scale=0.05):
        return (jax.random.normal(k, shape) * scale).astype(jnp.float32)

    # Pool weight: (POOL_K_PAD, 256); rows >= POOL_K are zero (K padding) and
    # output columns 0..1 are zero so the 254-d embedding is lane-dense in 2..255.
    w_pool = jnp.zeros((POOL_K_PAD, NODE_DIM), jnp.float32)
    w_pool = w_pool.at[:POOL_K, 2:].set(w(ks[0], (POOL_K, EMB_DIM)))
    b_pool = jnp.zeros((1, NODE_DIM), jnp.float32)

    return {
        "w_pool": w_pool,
        "b_pool": b_pool,
        # EdgeModule (split weights): [src || snk] @ w1e == src@w1e_src + snk@w1e_snk
        "w1e_src": w(ks[1], (NODE_DIM, EDGE_HID)),
        "w1e_snk": w(ks[2], (NODE_DIM, EDGE_HID)),
        "b1e": jnp.zeros((1, EDGE_HID), jnp.float32),
        "w2e": w(ks[3], (EDGE_HID, MSG_SZ)),
        "b2e": jnp.zeros((1, MSG_SZ), jnp.float32),
        # NodeModule (split weights): [incoming || states] @ w1n
        "w1n_msg": w(ks[4], (MSG_SZ, NODE_HID)),
        "w1n_state": w(ks[5], (NODE_DIM, NODE_HID)),
        "b1n": jnp.zeros((1, NODE_HID), jnp.float32),
        # output padded with 2 zero columns so only the last UPDATE_SZ state
        # dims are modified (node positions stay fixed).
        "w2n": jnp.concatenate(
            [jnp.zeros((NODE_HID, NODE_DIM - UPDATE_SZ), jnp.float32),
             w(ks[6], (NODE_HID, UPDATE_SZ))], axis=1),
        "b2n": jnp.zeros((1, NODE_DIM), jnp.float32),
    }


def _choose_tb(batch):
    # Fold as many batch elements as possible into the matmul M dimension:
    # largest divisor of batch with tb*NUM_NODES <= 512 (fills MXU rows; the
    # whole working set is a few MiB, far under any generation's VMEM).
    # TODO(synk): on v7x (2 TensorCores) prefer tb = ceil(batch/2) so the
    # "parallel" grid axis has length >= 2; with batch=2 that trade-off is moot.
    best = 1
    for cand in range(1, batch + 1):
        if batch % cand == 0 and cand * NUM_NODES <= 512:
            best = cand
    return best


def prepare_consts(params, structure, tb):
    """Algebraic folds + bf16 casts of everything constant across the batch."""
    _, node_pos_pad, gsrc, gsnk, indeg = structure
    bf16 = jnp.bfloat16
    eye_tb = jnp.eye(tb, dtype=jnp.float32)

    # Block-diagonal gather/scatter one-hots (exact in bf16).
    gsrc_bd = jnp.kron(eye_tb, gsrc).astype(bf16)          # (tb*E, tb*N)
    gsnk_bd = jnp.kron(eye_tb, gsnk).astype(bf16)          # (tb*E, tb*N)
    pos_tiled = jnp.tile(node_pos_pad, (tb, 1))            # (tb*N, 256) f32

    # b2e folded through the index_add scatter (per-node in-degree bias), then
    # through w1n_msg together with b1n -> single per-node node-hidden bias.
    incoming_bias = indeg[:, None] * params["b2e"]                      # (N, MSG)
    bias_node = incoming_bias @ params["w1n_msg"] + params["b1n"]       # (N, HN)
    bias_node = jnp.tile(bias_node, (tb, 1))                            # (tb*N, HN)

    # Merge the two edge projections into one 256-wide weight.
    w1e_cat = jnp.concatenate([params["w1e_src"], params["w1e_snk"]],
                              axis=1).astype(bf16)                      # (256, 256)
    # Fold w2e @ w1n_msg offline: removes one dependent matmul per msg step.
    w_e2n = (params["w2e"] @ params["w1n_msg"]).astype(bf16)            # (HE, HN)

    return (
        params["w_pool"].astype(bf16),        # (896, 256)
        params["b_pool"],                     # (1, 256)  f32
        pos_tiled,                            # (tb*N, 256) f32
        gsrc_bd, gsnk_bd,                     # bf16 one-hots
        w1e_cat,                              # bf16
        params["b1e"],                        # (1, HE)  f32
        w_e2n,                                # bf16
        bias_node,                            # (tb*N, HN) f32
        params["w1n_state"].astype(bf16),     # (256, HN)
        params["w2n"].astype(bf16),           # (HN, 256)
        params["b2n"],                        # (1, 256) f32
    )


# ------------------------------ forward pass ----------------------------------
def gen_composer_forward(params, structure, view_frames, view_poses, query_poses,
                         unsqueeze=True):
    node_positions = structure[0]
    B, V = view_frames.shape[:2]
    Q = query_poses.shape[1]
    N = NUM_NODES

    tb = _choose_tb(B)
    G = B // tb

    # ---- inp_to_graph_inp preprocessing (pure layout, tiny) ------------------
    frames_flat = view_frames.reshape(B * V, 3 * IMG_SIZE * IMG_SIZE)
    poses_flat = view_poses.reshape(B * V, POSE_DIM)
    pool_in = jnp.concatenate(
        [frames_flat, poses_flat,
         jnp.zeros((B * V, POOL_K_PAD - POOL_K), jnp.float32)], axis=-1)
    pool_in = pool_in.reshape(G, tb * V, POOL_K_PAD).astype(jnp.bfloat16)

    scores = interpolation_scores(view_poses, node_positions)    # (B, V, N) f32
    attn = interpolation_scores(query_poses, node_positions)     # (B, Q, N) f32

    # Block-diagonal scores^T / attn so the kernel's dots fold batch into M.
    eye_tb = jnp.eye(tb, dtype=jnp.float32)
    scores_g = jnp.swapaxes(scores, 1, 2).reshape(G, tb, N, V)
    s_bd = jnp.einsum("gtnv,tj->gtnjv", scores_g, eye_tb).reshape(
        G, tb * N, tb * V).astype(jnp.bfloat16)
    attn_g = attn.reshape(G, tb, Q, N)
    a_bd = jnp.einsum("gtqn,tj->gtqjn", attn_g, eye_tb).reshape(
        G, tb * Q, tb * N).astype(jnp.bfloat16)

    consts = prepare_consts(params, structure, tb)

    # ---- single fused kernel: Pool + graph build + msg passing + extraction --
    out = gen_composer_fused(pool_in, s_bd, a_bd, consts)        # (G, tb*Q, 256)
    extraction = out.reshape(B, Q, NODE_DIM)

    # num_copies == 0 -> no query_poses copies concatenated.
    if unsqueeze:
        extraction = extraction[..., None, None]                 # (B, Q, 256, 1, 1)
    more = attn
    return extraction, more


# ---------------------------------- main --------------------------------------
if __name__ == "__main__":
    key = jax.random.PRNGKey(0)
    k_frames, k_vxy, k_vrest, k_qxy, k_qrest, k_params = jax.random.split(key, 6)

    B, V, Q = 2, 3, 5
    view_frames = jax.random.normal(k_frames, (B, V, 3, IMG_SIZE, IMG_SIZE),
                                    dtype=jnp.float32)
    view_poses = jnp.concatenate(
        [jax.random.uniform(k_vxy, (B, V, 2)),
         jax.random.normal(k_vrest, (B, V, POSE_DIM - 2)) * 0.1],
        axis=-1).astype(jnp.float32)
    query_poses = jnp.concatenate(
        [jax.random.uniform(k_qxy, (B, Q, 2)),
         jax.random.normal(k_qrest, (B, Q, POSE_DIM - 2)) * 0.1],
        axis=-1).astype(jnp.float32)

    params = init_params(k_params)
    structure = build_structure()

    fwd = jax.jit(functools.partial(gen_composer_forward, params, structure))
    out, more = fwd(view_frames, view_poses, query_poses)
    jax.block_until_ready(out)

    assert out.shape == (B, Q, NODE_DIM + NUM_COPIES * POSE_DIM, 1, 1), out.shape
    assert more.shape == (B, Q, NUM_NODES), more.shape
    print("KERNEL_OK")
</pallas_src>

<mosaic_0001>
module attributes {stable_mosaic.version = 11 : i64} {
  func.func @_gen_composer_kernel(%arg0: i32, %arg1: memref<1x6x896xbf16, #tpu.memory_space<vmem>>, %arg2: memref<1x32x6xbf16, #tpu.memory_space<vmem>>, %arg3: memref<1x10x32xbf16, #tpu.memory_space<vmem>>, %arg4: memref<896x256xbf16, #tpu.memory_space<vmem>>, %arg5: memref<1x256xf32, #tpu.memory_space<vmem>>, %arg6: memref<32x256xf32, #tpu.memory_space<vmem>>, %arg7: memref<96x32xbf16, #tpu.memory_space<vmem>>, %arg8: memref<96x32xbf16, #tpu.memory_space<vmem>>, %arg9: memref<256x256xbf16, #tpu.memory_space<vmem>>, %arg10: memref<1x128xf32, #tpu.memory_space<vmem>>, %arg11: memref<128x128xbf16, #tpu.memory_space<vmem>>, %arg12: memref<32x128xf32, #tpu.memory_space<vmem>>, %arg13: memref<256x128xbf16, #tpu.memory_space<vmem>>, %arg14: memref<128x256xbf16, #tpu.memory_space<vmem>>, %arg15: memref<1x256xf32, #tpu.memory_space<vmem>>, %arg16: memref<1x10x256xf32, #tpu.memory_space<vmem>>) attributes {dimension_semantics = [#tpu.dimension_semantics<parallel>], iteration_bounds = array<i64: 1>, scalar_prefetch = 0 : i64, scratch_operands = 0 : i64, tpu.core_type = #tpu.core_type<tc>, window_params = [{transform_indices = @transform_0, window_bounds = array<i64: 1, 6, 896>}, {transform_indices = @transform_1, window_bounds = array<i64: 1, 32, 6>}, {transform_indices = @transform_2, window_bounds = array<i64: 1, 10, 32>}, {pipeline_mode = #tpu.pipeline_mode<synchronous>, transform_indices = @transform_3, window_bounds = array<i64: 896, 256>}, {pipeline_mode = #tpu.pipeline_mode<synchronous>, transform_indices = @transform_4, window_bounds = array<i64: 1, 256>}, {pipeline_mode = #tpu.pipeline_mode<synchronous>, transform_indices = @transform_5, window_bounds = array<i64: 32, 256>}, {pipeline_mode = #tpu.pipeline_mode<synchronous>, transform_indices = @transform_6, window_bounds = array<i64: 96, 32>}, {pipeline_mode = #tpu.pipeline_mode<synchronous>, transform_indices = @transform_7, window_bounds = array<i64: 96, 32>}, {pipeline_mode = #tpu.pipeline_mode<synchronous>, transform_indices = @transform_8, window_bounds = array<i64: 256, 256>}, {pipeline_mode = #tpu.pipeline_mode<synchronous>, transform_indices = @transform_9, window_bounds = array<i64: 1, 128>}, {pipeline_mode = #tpu.pipeline_mode<synchronous>, transform_indices = @transform_10, window_bounds = array<i64: 128, 128>}, {pipeline_mode = #tpu.pipeline_mode<synchronous>, transform_indices = @transform_11, window_bounds = array<i64: 32, 128>}, {pipeline_mode = #tpu.pipeline_mode<synchronous>, transform_indices = @transform_12, window_bounds = array<i64: 256, 128>}, {pipeline_mode = #tpu.pipeline_mode<synchronous>, transform_indices = @transform_13, window_bounds = array<i64: 128, 256>}, {pipeline_mode = #tpu.pipeline_mode<synchronous>, transform_indices = @transform_14, window_bounds = array<i64: 1, 256>}, {transform_indices = @transform_15, window_bounds = array<i64: 1, 10, 256>}]} {
    %c0 = arith.constant 0 : index
    %c0_0 = arith.constant 0 : index
    %c0_1 = arith.constant 0 : index
    %0 = vector.load %arg1[%c0, %c0_0, %c0_1] : memref<1x6x896xbf16, #tpu.memory_space<vmem>>, vector<1x6x896xbf16>
    %1 = vector.shape_cast %0 : vector<1x6x896xbf16> to vector<6x896xbf16>
    %c0_2 = arith.constant 0 : index
    %c0_3 = arith.constant 0 : index
    %2 = vector.load %arg4[%c0_2, %c0_3] : memref<896x256xbf16, #tpu.memory_space<vmem>>, vector<896x256xbf16>
    %cst = arith.constant dense<0.000000e+00> : vector<6x256xf32>
    %3 = tpu.matmul %1, %2, %cst {dimension_numbers = #tpu.dot_dimension_numbers<[1], [0], [0], [1], [0, 0, 1, 1], [], []>} : vector<6x896xbf16>, vector<896x256xbf16>, vector<6x256xf32> -> vector<6x256xf32>
    %c0_4 = arith.constant 0 : index
    %c0_5 = arith.constant 0 : index
    %4 = vector.load %arg5[%c0_4, %c0_5] : memref<1x256xf32, #tpu.memory_space<vmem>>, vector<1x256xf32>
    %5 = vector.broadcast %4 : vector<1x256xf32> to vector<6x256xf32>
    %6 = arith.addf %3, %5 : vector<6x256xf32>
    %7 = math.tanh %6 : vector<6x256xf32>
    %c0_6 = arith.constant 0 : index
    %c0_7 = arith.constant 0 : index
    %8 = vector.load %arg6[%c0_6, %c0_7] : memref<32x256xf32, #tpu.memory_space<vmem>>, vector<32x256xf32>
    %c0_8 = arith.constant 0 : index
    %c0_9 = arith.constant 0 : index
    %c0_10 = arith.constant 0 : index
    %9 = vector.load %arg2[%c0_8, %c0_9, %c0_10] : memref<1x32x6xbf16, #tpu.memory_space<vmem>>, vector<1x32x6xbf16>
    %10 = vector.shape_cast %9 : vector<1x32x6xbf16> to vector<32x6xbf16>
    %11 = arith.truncf %7 : vector<6x256xf32> to vector<6x256xbf16>
    %cst_11 = arith.constant dense<0.000000e+00> : vector<32x256xf32>
    %12 = tpu.matmul %10, %11, %cst_11 {dimension_numbers = #tpu.dot_dimension_numbers<[1], [0], [0], [1], [0, 0, 1, 1], [], []>} : vector<32x6xbf16>, vector<6x256xbf16>, vector<32x256xf32> -> vector<32x256xf32>
    %13 = arith.addf %8, %12 : vector<32x256xf32>
    %14 = arith.truncf %13 : vector<32x256xf32> to vector<32x256xbf16>
    %c0_12 = arith.constant 0 : index
    %c0_13 = arith.constant 0 : index
    %15 = vector.load %arg9[%c0_12, %c0_13] : memref<256x256xbf16, #tpu.memory_space<vmem>>, vector<256x256xbf16>
    %cst_14 = arith.constant dense<0.000000e+00> : vector<32x256xf32>
    %16 = tpu.matmul %14, %15, %cst_14 {dimension_numbers = #tpu.dot_dimension_numbers<[1], [0], [0], [1], [0, 0, 1, 1], [], []>} : vector<32x256xbf16>, vector<256x256xbf16>, vector<32x256xf32> -> vector<32x256xf32>
    %17 = vector.extract_strided_slice %16 {offsets = [0, 0], sizes = [32, 128], strides = [1, 1]} : vector<32x256xf32> to vector<32x128xf32>
    %18 = arith.truncf %17 : vector<32x128xf32> to vector<32x128xbf16>
    %19 = vector.extract_strided_slice %16 {offsets = [0, 128], sizes = [32, 128], strides = [1, 1]} : vector<32x256xf32> to vector<32x128xf32>
    %20 = arith.truncf %19 : vector<32x128xf32> to vector<32x128xbf16>
    %c0_15 = arith.constant 0 : index
    %c0_16 = arith.constant 0 : index
    %21 = vector.load %arg7[%c0_15, %c0_16] : memref<96x32xbf16, #tpu.memory_space<vmem>>, vector<96x32xbf16>
    %cst_17 = arith.constant dense<0.000000e+00> : vector<96x128xf32>
    %22 = tpu.matmul %21, %18, %cst_17 {dimension_numbers = #tpu.dot_dimension_numbers<[1], [0], [0], [1], [0, 0, 1, 1], [], []>} : vector<96x32xbf16>, vector<32x128xbf16>, vector<96x128xf32> -> vector<96x128xf32>
    %c0_18 = arith.constant 0 : index
    %c0_19 = arith.constant 0 : index
    %23 = vector.load %arg8[%c0_18, %c0_19] : memref<96x32xbf16, #tpu.memory_space<vmem>>, vector<96x32xbf16>
    %cst_20 = arith.constant dense<0.000000e+00> : vector<96x128xf32>
    %24 = tpu.matmul %23, %20, %cst_20 {dimension_numbers = #tpu.dot_dimension_numbers<[1], [0], [0], [1], [0, 0, 1, 1], [], []>} : vector<96x32xbf16>, vector<32x128xbf16>, vector<96x128xf32> -> vector<96x128xf32>
    %25 = arith.addf %22, %24 : vector<96x128xf32>
    %c0_21 = arith.constant 0 : index
    %c0_22 = arith.constant 0 : index
    %26 = vector.load %arg10[%c0_21, %c0_22] : memref<1x128xf32, #tpu.memory_space<vmem>>, vector<1x128xf32>
    %27 = vector.broadcast %26 : vector<1x128xf32> to vector<96x128xf32>
    %28 = arith.addf %25, %27 : vector<96x128xf32>
    %cst_23 = arith.constant 0.000000e+00 : f32
    %29 = vector.broadcast %cst_23 : f32 to vector<96x128xf32>
    %30 = arith.maximumf %28, %29 : vector<96x128xf32>
    %31 = arith.truncf %30 : vector<96x128xf32> to vector<96x128xbf16>
    %c0_24 = arith.constant 0 : index
    %c0_25 = arith.constant 0 : index
    %32 = vector.load %arg11[%c0_24, %c0_25] : memref<128x128xbf16, #tpu.memory_space<vmem>>, vector<128x128xbf16>
    %cst_26 = arith.constant dense<0.000000e+00> : vector<96x128xf32>
    %33 = tpu.matmul %31, %32, %cst_26 {dimension_numbers = #tpu.dot_dimension_numbers<[1], [0], [0], [1], [0, 0, 1, 1], [], []>} : vector<96x128xbf16>, vector<128x128xbf16>, vector<96x128xf32> -> vector<96x128xf32>
    %c0_27 = arith.constant 0 : index
    %c0_28 = arith.constant 0 : index
    %34 = vector.load %arg8[%c0_27, %c0_28] : memref<96x32xbf16, #tpu.memory_space<vmem>>, vector<96x32xbf16>
    %35 = arith.truncf %33 : vector<96x128xf32> to vector<96x128xbf16>
    %cst_29 = arith.constant dense<0.000000e+00> : vector<32x128xf32>
    %36 = tpu.matmul %34, %35, %cst_29 {dimension_numbers = #tpu.dot_dimension_numbers<[0], [0], [1], [1], [0, 1, 1, 1], [], []>} : vector<96x32xbf16>, vector<96x128xbf16>, vector<32x128xf32> -> vector<32x128xf32>
    %c0_30 = arith.constant 0 : index
    %c0_31 = arith.constant 0 : index
    %37 = vector.load %arg13[%c0_30, %c0_31] : memref<256x128xbf16, #tpu.memory_space<vmem>>, vector<256x128xbf16>
    %cst_32 = arith.constant dense<0.000000e+00> : vector<32x128xf32>
    %38 = tpu.matmul %14, %37, %cst_32 {dimension_numbers = #tpu.dot_dimension_numbers<[1], [0], [0], [1], [0, 0, 1, 1], [], []>} : vector<32x256xbf16>, vector<256x128xbf16>, vector<32x128xf32> -> vector<32x128xf32>
    %39 = arith.addf %36, %38 : vector<32x128xf32>
    %c0_33 = arith.constant 0 : index
    %c0_34 = arith.constant 0 : index
    %40 = vector.load %arg12[%c0_33, %c0_34] : memref<32x128xf32, #tpu.memory_space<vmem>>, vector<32x128xf32>
    %41 = arith.addf %39, %40 : vector<32x128xf32>
    %cst_35 = arith.constant 0.000000e+00 : f32
    %42 = vector.broadcast %cst_35 : f32 to vector<32x128xf32>
    %43 = arith.maximumf %41, %42 : vector<32x128xf32>
    %44 = arith.truncf %43 : vector<32x128xf32> to vector<32x128xbf16>
    %c0_36 = arith.constant 0 : index
    %c0_37 = arith.constant 0 : index
    %45 = vector.load %arg14[%c0_36, %c0_37] : memref<128x256xbf16, #tpu.memory_space<vmem>>, vector<128x256xbf16>
    %cst_38 = arith.constant dense<0.000000e+00> : vector<32x256xf32>
    %46 = tpu.matmul %44, %45, %cst_38 {dimension_numbers = #tpu.dot_dimension_numbers<[1], [0], [0], [1], [0, 0, 1, 1], [], []>} : vector<32x128xbf16>, vector<128x256xbf16>, vector<32x256xf32> -> vector<32x256xf32>
    %47 = arith.addf %13, %46 : vector<32x256xf32>
    %c0_39 = arith.constant 0 : index
    %c0_40 = arith.constant 0 : index
    %48 = vector.load %arg15[%c0_39, %c0_40] : memref<1x256xf32, #tpu.memory_space<vmem>>, vector<1x256xf32>
    %49 = vector.broadcast %48 : vector<1x256xf32> to vector<32x256xf32>
    %50 = arith.addf %47, %49 : vector<32x256xf32>
    %51 = arith.truncf %50 : vector<32x256xf32> to vector<32x256xbf16>
    %c0_41 = arith.constant 0 : index
    %c0_42 = arith.constant 0 : index
    %52 = vector.load %arg9[%c0_41, %c0_42] : memref<256x256xbf16, #tpu.memory_space<vmem>>, vector<256x256xbf16>
    %cst_43 = arith.constant dense<0.000000e+00> : vector<32x256xf32>
    %53 = tpu.matmul %51, %52, %cst_43 {dimension_numbers = #tpu.dot_dimension_numbers<[1], [0], [0], [1], [0, 0, 1, 1], [], []>} : vector<32x256xbf16>, vector<256x256xbf16>, vector<32x256xf32> -> vector<32x256xf32>
    %54 = vector.extract_strided_slice %53 {offsets = [0, 0], sizes = [32, 128], strides = [1, 1]} : vector<32x256xf32> to vector<32x128xf32>
    %55 = arith.truncf %54 : vector<32x128xf32> to vector<32x128xbf16>
    %56 = vector.extract_strided_slice %53 {offsets = [0, 128], sizes = [32, 128], strides = [1, 1]} : vector<32x256xf32> to vector<32x128xf32>
    %57 = arith.truncf %56 : vector<32x128xf32> to vector<32x128xbf16>
    %c0_44 = arith.constant 0 : index
    %c0_45 = arith.constant 0 : index
    %58 = vector.load %arg7[%c0_44, %c0_45] : memref<96x32xbf16, #tpu.memory_space<vmem>>, vector<96x32xbf16>
    %cst_46 = arith.constant dense<0.000000e+00> : vector<96x128xf32>
    %59 = tpu.matmul %58, %55, %cst_46 {dimension_numbers = #tpu.dot_dimension_numbers<[1], [0], [0], [1], [0, 0, 1, 1], [], []>} : vector<96x32xbf16>, vector<32x128xbf16>, vector<96x128xf32> -> vector<96x128xf32>
    %c0_47 = arith.constant 0 : index
    %c0_48 = arith.constant 0 : index
    %60 = vector.load %arg8[%c0_47, %c0_48] : memref<96x32xbf16, #tpu.memory_space<vmem>>, vector<96x32xbf16>
    %cst_49 = arith.constant dense<0.000000e+00> : vector<96x128xf32>
    %61 = tpu.matmul %60, %57, %cst_49 {dimension_numbers = #tpu.dot_dimension_numbers<[1], [0], [0], [1], [0, 0, 1, 1], [], []>} : vector<96x32xbf16>, vector<32x128xbf16>, vector<96x128xf32> -> vector<96x128xf32>
    %62 = arith.addf %59, %61 : vector<96x128xf32>
    %c0_50 = arith.constant 0 : index
    %c0_51 = arith.constant 0 : index
    %63 = vector.load %arg10[%c0_50, %c0_51] : memref<1x128xf32, #tpu.memory_space<vmem>>, vector<1x128xf32>
    %64 = vector.broadcast %63 : vector<1x128xf32> to vector<96x128xf32>
    %65 = arith.addf %62, %64 : vector<96x128xf32>
    %cst_52 = arith.constant 0.000000e+00 : f32
    %66 = vector.broadcast %cst_52 : f32 to vector<96x128xf32>
    %67 = arith.maximumf %65, %66 : vector<96x128xf32>
    %68 = arith.truncf %67 : vector<96x128xf32> to vector<96x128xbf16>
    %c0_53 = arith.constant 0 : index
    %c0_54 = arith.constant 0 : index
    %69 = vector.load %arg11[%c0_53, %c0_54] : memref<128x128xbf16, #tpu.memory_space<vmem>>, vector<128x128xbf16>
    %cst_55 = arith.constant dense<0.000000e+00> : vector<96x128xf32>
    %70 = tpu.matmul %68, %69, %cst_55 {dimension_numbers = #tpu.dot_dimension_numbers<[1], [0], [0], [1], [0, 0, 1, 1], [], []>} : vector<96x128xbf16>, vector<128x128xbf16>, vector<96x128xf32> -> vector<96x128xf32>
    %c0_56 = arith.constant 0 : index
    %c0_57 = arith.constant 0 : index
    %71 = vector.load %arg8[%c0_56, %c0_57] : memref<96x32xbf16, #tpu.memory_space<vmem>>, vector<96x32xbf16>
    %72 = arith.truncf %70 : vector<96x128xf32> to vector<96x128xbf16>
    %cst_58 = arith.constant dense<0.000000e+00> : vector<32x128xf32>
    %73 = tpu.matmul %71, %72, %cst_58 {dimension_numbers = #tpu.dot_dimension_numbers<[0], [0], [1], [1], [0, 1, 1, 1], [], []>} : vector<96x32xbf16>, vector<96x128xbf16>, vector<32x128xf32> -> vector<32x128xf32>
    %c0_59 = arith.constant 0 : index
    %c0_60 = arith.constant 0 : index
    %74 = vector.load %arg13[%c0_59, %c0_60] : memref<256x128xbf16, #tpu.memory_space<vmem>>, vector<256x128xbf16>
    %cst_61 = arith.constant dense<0.000000e+00> : vector<32x128xf32>
    %75 = tpu.matmul %51, %74, %cst_61 {dimension_numbers = #tpu.dot_dimension_numbers<[1], [0], [0], [1], [0, 0, 1, 1], [], []>} : vector<32x256xbf16>, vector<256x128xbf16>, vector<32x128xf32> -> vector<32x128xf32>
    %76 = arith.addf %73, %75 : vector<32x128xf32>
    %c0_62 = arith.constant 0 : index
    %c0_63 = arith.constant 0 : index
    %77 = vector.load %arg12[%c0_62, %c0_63] : memref<32x128xf32, #tpu.memory_space<vmem>>, vector<32x128xf32>
    %78 = arith.addf %76, %77 : vector<32x128xf32>
    %cst_64 = arith.constant 0.000000e+00 : f32
    %79 = vector.broadcast %cst_64 : f32 to vector<32x128xf32>
    %80 = arith.maximumf %78, %79 : vector<32x128xf32>
    %81 = arith.truncf %80 : vector<32x128xf32> to vector<32x128xbf16>
    %c0_65 = arith.constant 0 : index
    %c0_66 = arith.constant 0 : index
    %82 = vector.load %arg14[%c0_65, %c0_66] : memref<128x256xbf16, #tpu.memory_space<vmem>>, vector<128x256xbf16>
    %cst_67 = arith.constant dense<0.000000e+00> : vector<32x256xf32>
    %83 = tpu.matmul %81, %82, %cst_67 {dimension_numbers = #tpu.dot_dimension_numbers<[1], [0], [0], [1], [0, 0, 1, 1], [], []>} : vector<32x128xbf16>, vector<128x256xbf16>, vector<32x256xf32> -> vector<32x256xf32>
    %84 = arith.addf %50, %83 : vector<32x256xf32>
    %c0_68 = arith.constant 0 : index
    %c0_69 = arith.constant 0 : index
    %85 = vector.load %arg15[%c0_68, %c0_69] : memref<1x256xf32, #tpu.memory_space<vmem>>, vector<1x256xf32>
    %86 = vector.broadcast %85 : vector<1x256xf32> to vector<32x256xf32>
    %87 = arith.addf %84, %86 : vector<32x256xf32>
    %88 = arith.truncf %87 : vector<32x256xf32> to vector<32x256xbf16>
    %c0_70 = arith.constant 0 : index
    %c0_71 = arith.constant 0 : index
    %89 = vector.load %arg9[%c0_70, %c0_71] : memref<256x256xbf16, #tpu.memory_space<vmem>>, vector<256x256xbf16>
    %cst_72 = arith.constant dense<0.000000e+00> : vector<32x256xf32>
    %90 = tpu.matmul %88, %89, %cst_72 {dimension_numbers = #tpu.dot_dimension_numbers<[1], [0], [0], [1], [0, 0, 1, 1], [], []>} : vector<32x256xbf16>, vector<256x256xbf16>, vector<32x256xf32> -> vector<32x256xf32>
    %91 = vector.extract_strided_slice %90 {offsets = [0, 0], sizes = [32, 128], strides = [1, 1]} : vector<32x256xf32> to vector<32x128xf32>
    %92 = arith.truncf %91 : vector<32x128xf32> to vector<32x128xbf16>
    %93 = vector.extract_strided_slice %90 {offsets = [0, 128], sizes = [32, 128], strides = [1, 1]} : vector<32x256xf32> to vector<32x128xf32>
    %94 = arith.truncf %93 : vector<32x128xf32> to vector<32x128xbf16>
    %c0_73 = arith.constant 0 : index
    %c0_74 = arith.constant 0 : index
    %95 = vector.load %arg7[%c0_73, %c0_74] : memref<96x32xbf16, #tpu.memory_space<vmem>>, vector<96x32xbf16>
    %cst_75 = arith.constant dense<0.000000e+00> : vector<96x128xf32>
    %96 = tpu.matmul %95, %92, %cst_75 {dimension_numbers = #tpu.dot_dimension_numbers<[1], [0], [0], [1], [0, 0, 1, 1], [], []>} : vector<96x32xbf16>, vector<32x128xbf16>, vector<96x128xf32> -> vector<96x128xf32>
    %c0_76 = arith.constant 0 : index
    %c0_77 = arith.constant 0 : index
    %97 = vector.load %arg8[%c0_76, %c0_77] : memref<96x32xbf16, #tpu.memory_space<vmem>>, vector<96x32xbf16>
    %cst_78 = arith.constant dense<0.000000e+00> : vector<96x128xf32>
    %98 = tpu.matmul %97, %94, %cst_78 {dimension_numbers = #tpu.dot_dimension_numbers<[1], [0], [0], [1], [0, 0, 1, 1], [], []>} : vector<96x32xbf16>, vector<32x128xbf16>, vector<96x128xf32> -> vector<96x128xf32>
    %99 = arith.addf %96, %98 : vector<96x128xf32>
    %c0_79 = arith.constant 0 : index
    %c0_80 = arith.constant 0 : index
    %100 = vector.load %arg10[%c0_79, %c0_80] : memref<1x128xf32, #tpu.memory_space<vmem>>, vector<1x128xf32>
    %101 = vector.broadcast %100 : vector<1x128xf32> to vector<96x128xf32>
    %102 = arith.addf %99, %101 : vector<96x128xf32>
    %cst_81 = arith.constant 0.000000e+00 : f32
    %103 = vector.broadcast %cst_81 : f32 to vector<96x128xf32>
    %104 = arith.maximumf %102, %103 : vector<96x128xf32>
    %105 = arith.truncf %104 : vector<96x128xf32> to vector<96x128xbf16>
    %c0_82 = arith.constant 0 : index
    %c0_83 = arith.constant 0 : index
    %106 = vector.load %arg11[%c0_82, %c0_83] : memref<128x128xbf16, #tpu.memory_space<vmem>>, vector<128x128xbf16>
    %cst_84 = arith.constant dense<0.000000e+00> : vector<96x128xf32>
    %107 = tpu.matmul %105, %106, %cst_84 {dimension_numbers = #tpu.dot_dimension_numbers<[1], [0], [0], [1], [0, 0, 1, 1], [], []>} : vector<96x128xbf16>, vector<128x128xbf16>, vector<96x128xf32> -> vector<96x128xf32>
    %c0_85 = arith.constant 0 : index
    %c0_86 = arith.constant 0 : index
    %108 = vector.load %arg8[%c0_85, %c0_86] : memref<96x32xbf16, #tpu.memory_space<vmem>>, vector<96x32xbf16>
    %109 = arith.truncf %107 : vector<96x128xf32> to vector<96x128xbf16>
    %cst_87 = arith.constant dense<0.000000e+00> : vector<32x128xf32>
    %110 = tpu.matmul %108, %109, %cst_87 {dimension_numbers = #tpu.dot_dimension_numbers<[0], [0], [1], [1], [0, 1, 1, 1], [], []>} : vector<96x32xbf16>, vector<96x128xbf16>, vector<32x128xf32> -> vector<32x128xf32>
    %c0_88 = arith.constant 0 : index
    %c0_89 = arith.constant 0 : index
    %111 = vector.load %arg13[%c0_88, %c0_89] : memref<256x128xbf16, #tpu.memory_space<vmem>>, vector<256x128xbf16>
    %cst_90 = arith.constant dense<0.000000e+00> : vector<32x128xf32>
    %112 = tpu.matmul %88, %111, %cst_90 {dimension_numbers = #tpu.dot_dimension_numbers<[1], [0], [0], [1], [0, 0, 1, 1], [], []>} : vector<32x256xbf16>, vector<256x128xbf16>, vector<32x128xf32> -> vector<32x128xf32>
    %113 = arith.addf %110, %112 : vector<32x128xf32>
    %c0_91 = arith.constant 0 : index
    %c0_92 = arith.constant 0 : index
    %114 = vector.load %arg12[%c0_91, %c0_92] : memref<32x128xf32, #tpu.memory_space<vmem>>, vector<32x128xf32>
    %115 = arith.addf %113, %114 : vector<32x128xf32>
    %cst_93 = arith.constant 0.000000e+00 : f32
    %116 = vector.broadcast %cst_93 : f32 to vector<32x128xf32>
    %117 = arith.maximumf %115, %116 : vector<32x128xf32>
    %118 = arith.truncf %117 : vector<32x128xf32> to vector<32x128xbf16>
    %c0_94 = arith.constant 0 : index
    %c0_95 = arith.constant 0 : index
    %119 = vector.load %arg14[%c0_94, %c0_95] : memref<128x256xbf16, #tpu.memory_space<vmem>>, vector<128x256xbf16>
    %cst_96 = arith.constant dense<0.000000e+00> : vector<32x256xf32>
    %120 = tpu.matmul %118, %119, %cst_96 {dimension_numbers = #tpu.dot_dimension_numbers<[1], [0], [0], [1], [0, 0, 1, 1], [], []>} : vector<32x128xbf16>, vector<128x256xbf16>, vector<32x256xf32> -> vector<32x256xf32>
    %121 = arith.addf %87, %120 : vector<32x256xf32>
    %c0_97 = arith.constant 0 : index
    %c0_98 = arith.constant 0 : index
    %122 = vector.load %arg15[%c0_97, %c0_98] : memref<1x256xf32, #tpu.memory_space<vmem>>, vector<1x256xf32>
    %123 = vector.broadcast %122 : vector<1x256xf32> to vector<32x256xf32>
    %124 = arith.addf %121, %123 : vector<32x256xf32>
    %c0_99 = arith.constant 0 : index
    %c0_100 = arith.constant 0 : index
    %c0_101 = arith.constant 0 : index
    %125 = vector.load %arg3[%c0_99, %c0_100, %c0_101] : memref<1x10x32xbf16, #tpu.memory_space<vmem>>, vector<1x10x32xbf16>
    %126 = vector.shape_cast %125 : vector<1x10x32xbf16> to vector<10x32xbf16>
    %127 = arith.truncf %124 : vector<32x256xf32> to vector<32x256xbf16>
    %cst_102 = arith.constant dense<0.000000e+00> : vector<10x256xf32>
    %128 = tpu.matmul %126, %127, %cst_102 {dimension_numbers = #tpu.dot_dimension_numbers<[1], [0], [0], [1], [0, 0, 1, 1], [], []>} : vector<10x32xbf16>, vector<32x256xbf16>, vector<10x256xf32> -> vector<10x256xf32>
    %c0_103 = arith.constant 0 : index
    %c0_104 = arith.constant 0 : index
    %c0_105 = arith.constant 0 : index
    %129 = vector.load %arg16[%c0_103, %c0_104, %c0_105] : memref<1x10x256xf32, #tpu.memory_space<vmem>>, vector<1x10x256xf32>
    %130 = vector.shape_cast %129 : vector<1x10x256xf32> to vector<10x256xf32>
    %131 = vector.shape_cast %128 : vector<10x256xf32> to vector<1x10x256xf32>
    tpu.vector_store %arg16[%c0_103, %c0_104, %c0_105], %131 {strides = array<i32>} : memref<1x10x256xf32, #tpu.memory_space<vmem>>, vector<1x10x256xf32>,
    return
  }
  func.func @transform_0(%arg0: i32) -> (i32, i32, i32) {
    %c0_i32 = arith.constant 0 : i32
    %c0_i32_0 = arith.constant 0 : i32
    %c0_i32_1 = arith.constant 0 : i32
    return %arg0, %c0_i32, %c0_i32_0 : i32, i32, i32
  }
  func.func @transform_1(%arg0: i32) -> (i32, i32, i32) {
    %c0_i32 = arith.constant 0 : i32
    %c0_i32_0 = arith.constant 0 : i32
    %c0_i32_1 = arith.constant 0 : i32
    return %arg0, %c0_i32, %c0_i32_0 : i32, i32, i32
  }
  func.func @transform_2(%arg0: i32) -> (i32, i32, i32) {
    %c0_i32 = arith.constant 0 : i32
    %c0_i32_0 = arith.constant 0 : i32
    %c0_i32_1 = arith.constant 0 : i32
    return %arg0, %c0_i32, %c0_i32_0 : i32, i32, i32
  }
  func.func @transform_3(%arg0: i32) -> (i32, i32) {
    %c0_i32 = arith.constant 0 : i32
    %c0_i32_0 = arith.constant 0 : i32
    %c0_i32_1 = arith.constant 0 : i32
    return %c0_i32, %c0_i32_0 : i32, i32
  }
  func.func @transform_4(%arg0: i32) -> (i32, i32) {
    %c0_i32 = arith.constant 0 : i32
    %c0_i32_0 = arith.constant 0 : i32
    %c0_i32_1 = arith.constant 0 : i32
    return %c0_i32, %c0_i32_0 : i32, i32
  }
  func.func @transform_5(%arg0: i32) -> (i32, i32) {
    %c0_i32 = arith.constant 0 : i32
    %c0_i32_0 = arith.constant 0 : i32
    %c0_i32_1 = arith.constant 0 : i32
    return %c0_i32, %c0_i32_0 : i32, i32
  }
  func.func @transform_6(%arg0: i32) -> (i32, i32) {
    %c0_i32 = arith.constant 0 : i32
    %c0_i32_0 = arith.constant 0 : i32
    %c0_i32_1 = arith.constant 0 : i32
    return %c0_i32, %c0_i32_0 : i32, i32
  }
  func.func @transform_7(%arg0: i32) -> (i32, i32) {
    %c0_i32 = arith.constant 0 : i32
    %c0_i32_0 = arith.constant 0 : i32
    %c0_i32_1 = arith.constant 0 : i32
    return %c0_i32, %c0_i32_0 : i32, i32
  }
  func.func @transform_8(%arg0: i32) -> (i32, i32) {
    %c0_i32 = arith.constant 0 : i32
    %c0_i32_0 = arith.constant 0 : i32
    %c0_i32_1 = arith.constant 0 : i32
    return %c0_i32, %c0_i32_0 : i32, i32
  }
  func.func @transform_9(%arg0: i32) -> (i32, i32) {
    %c0_i32 = arith.constant 0 : i32
    %c0_i32_0 = arith.constant 0 : i32
    %c0_i32_1 = arith.constant 0 : i32
    return %c0_i32, %c0_i32_0 : i32, i32
  }
  func.func @transform_10(%arg0: i32) -> (i32, i32) {
    %c0_i32 = arith.constant 0 : i32
    %c0_i32_0 = arith.constant 0 : i32
    %c0_i32_1 = arith.constant 0 : i32
    return %c0_i32, %c0_i32_0 : i32, i32
  }
  func.func @transform_11(%arg0: i32) -> (i32, i32) {
    %c0_i32 = arith.constant 0 : i32
    %c0_i32_0 = arith.constant 0 : i32
    %c0_i32_1 = arith.constant 0 : i32
    return %c0_i32, %c0_i32_0 : i32, i32
  }
  func.func @transform_12(%arg0: i32) -> (i32, i32) {
    %c0_i32 = arith.constant 0 : i32
    %c0_i32_0 = arith.constant 0 : i32
    %c0_i32_1 = arith.constant 0 : i32
    return %c0_i32, %c0_i32_0 : i32, i32
  }
  func.func @transform_13(%arg0: i32) -> (i32, i32) {
    %c0_i32 = arith.constant 0 : i32
    %c0_i32_0 = arith.constant 0 : i32
    %c0_i32_1 = arith.constant 0 : i32
    return %c0_i32, %c0_i32_0 : i32, i32
  }
  func.func @transform_14(%arg0: i32) -> (i32, i32) {
    %c0_i32 = arith.constant 0 : i32
    %c0_i32_0 = arith.constant 0 : i32
    %c0_i32_1 = arith.constant 0 : i32
    return %c0_i32, %c0_i32_0 : i32, i32
  }
  func.func @transform_15(%arg0: i32) -> (i32, i32, i32) {
    %c0_i32 = arith.constant 0 : i32
    %c0_i32_0 = arith.constant 0 : i32
    %c0_i32_1 = arith.constant 0 : i32
    return %arg0, %c0_i32, %c0_i32_0 : i32, i32, i32
  }
}

</mosaic_0001>

<bundles_post_ra>
// kernel: gen_composer_forward.1
= control target key start
LH: loop header
LB: loop body
LE: loop exit
PB: predicated region body
PF: predicated region fallthrough
CT: control target
= control target key end

     0   :  { %20 = vsyncpa [#allocation3], 0  ;;  %s3930_s21 = smov [#allocation2]   ;;  %s3931_s23 = smov 64   ;;  %s5917_s0 = inlined_call_operand.vmem [shape: bf16[1,6,896], index: 0, kind: input, shape index: {}]   ;;  %s5918_s1 = inlined_call_operand.vmem [shape: bf16[1,32,6], index: 1, kind: input, shape index: {}]   ;;  %s5919_s2 = inlined_call_operand.vmem [shape: bf16[1,10,32], index: 2, kind: input, shape index: {}]   ;;  %s5920_s3 = inlined_call_operand.vmem [shape: bf16[896,256], index: 3, kind: input, shape index: {}]   ;;  %s5921_s4 = inlined_call_operand.vmem [shape: f32[1,256], index: 4, kind: input, shape index: {}, may-alias: {4,14}]   ;;  %s5922_s5 = inlined_call_operand.vmem [shape: f32[32,256], index: 5, kind: input, shape index: {}]   ;;  %s5923_s6 = inlined_call_operand.vmem [shape: bf16[96,32], index: 6, kind: input, shape index: {}]   ;;  %s5924_s7 = inlined_call_operand.vmem [shape: bf16[96,32], index: 7, kind: input, shape index: {}]   ;;  %s5925_s8 = inlined_call_operand.vmem [shape: bf16[256,256], index: 8, kind: input, shape index: {}]   ;;  %s5926_s9 = inlined_call_operand.vmem [shape: f32[1,128], index: 9, kind: input, shape index: {}]   ;;  %s5927_s10 = inlined_call_operand.hbm [shape: bf16[128,128], index: 10, kind: input, shape index: {}]   ;;  %s5928_s11 = inlined_call_operand.vmem [shape: f32[32,128], index: 11, kind: input, shape index: {}]   ;;  %s5929_s12 = inlined_call_operand.vmem [shape: bf16[256,128], index: 12, kind: input, shape index: {}]   ;;  %s5930_s13 = inlined_call_operand.vmem [shape: bf16[128,256], index: 13, kind: input, shape index: {}]   ;;  %s5931_s14 = inlined_call_operand.vmem [shape: f32[1,256], index: 14, kind: input, shape index: {}, may-alias: {4,14}]   ;;  %s5932_s15 = inlined_call_operand.vmem [shape: f32[1,10,256], index: 15, kind: output, shape index: {}]  }
   0x1   :  { %s45_s20 = sshll.u32 %s5927_s10, 4  ;;  %s47_s22 = sshll.u32 %s3930_s21, 4  ;;  %s46_s20 = int_to_ptr.hbm [resolvable:$true] %s45_s20  ;;  %s48_s22 = int_to_ptr.vmem [resolvable:$true] %s47_s22 }
   0x2   :  { %s3932_s24 = smov 4  }
   0x3   :  { %53 = dma.hbm_to_vmem [thread:$0]  %s46_s20, 1024, %s48_s22, [#allocation3], %s3931_s23, %s3931_s23, %s3932_s24  }
   0x4   :  { %3928 = dma.done.wait [#allocation3], 1024  }
   0x5   :  { %3929 = vsyncadd [#allocation3], 4294966272  ;;  %v2869_v0 = vld [vmem:[%s5920_s3 + $0x70] sm:$0xf]  ;;  %v3670_v1 = vld [vmem:[%s5920_s3 + $0x74] sm:$0xf0] }
   0x6   :  { %v2933_v2 = vld [vmem:[%s5920_s3 + $0xf0] sm:$0xf]  ;;  %v2870_v3 = vor.u32 %v3670_v1, %v2869_v0  ;;  %v3686_v4 = vld [vmem:[%s5920_s3 + $0xf4] sm:$0xf0]  ;;  %v2861_v5 = vld [vmem:[%s5920_s3 + $0x60] sm:$0xf] }
   0x7   :  { %v3668_v6 = vld [vmem:[%s5920_s3 + $0x64] sm:$0xf0]  ;;  %v2934_v7 = vor.u32 %v3686_v4, %v2933_v2  ;;  %v2925_v8 = vld [vmem:[%s5920_s3 + $0xe0] sm:$0xf]  ;;  %v2997_v10 = vld [vmem:[%s5920_s3 + $0x170] sm:$0xf] }
   0x8   :  { %v3684_v9 = vld [vmem:[%s5920_s3 + $0xe4] sm:$0xf0]  ;;  %774 = vmatpush.bf16.msra.mxu0 %v2870_v3  ;;  %v2862_v11 = vor.u32 %v3668_v6, %v2861_v5  ;;  %v3702_v12 = vld [vmem:[%s5920_s3 + $0x174] sm:$0xf0]  ;;  %v2853_v15 = vld [vmem:[%s5920_s3 + $0x50] sm:$0xf] }
   0x9   :  { %787 = vmatpush.bf16.msra.mxu1 %v2934_v7  ;;  %v2926_v13 = vor.u32 %v3684_v9, %v2925_v8  ;;  %v2998_v14 = vor.u32 %v3702_v12, %v2997_v10  ;;  %v3666_v16 = vld [vmem:[%s5920_s3 + $0x54] sm:$0xf0]  ;;  %v2989_v17 = vld [vmem:[%s5920_s3 + $0x160] sm:$0xf]  ;;  %v2917_v18 = vld [vmem:[%s5920_s3 + $0xd0] sm:$0xf] }
   0xa   :  { %v3682_v19 = vld [vmem:[%s5920_s3 + $0xd4] sm:$0xf0]  ;;  %v3700_v20 = vld [vmem:[%s5920_s3 + $0x164] sm:$0xf0]  ;;  %v2981_v22 = vld [vmem:[%s5920_s3 + $0x150] sm:$0xf]  ;;  %v2854_v23 = vor.u32 %v3666_v16, %v2853_v15 }
   0xb   :  { %800 = vmatpush.bf16.msra.mxu2 %v2998_v14  ;;  %v2990_v21 = vor.u32 %v3700_v20, %v2989_v17  ;;  %v3698_v24 = vld [vmem:[%s5920_s3 + $0x154] sm:$0xf0]  ;;  %v3061_v25 = vld [vmem:[%s5920_s3 + $0x1f0] sm:$0xf]  ;;  %v2918_v27 = vor.u32 %v3682_v19, %v2917_v18  ;;  %v2845_v28 = vld [vmem:[%s5920_s3 + $0x40] sm:$0xf] }
   0xc   :  { %775 = vmatpush.bf16.msra.mxu0 %v2862_v11  ;;  %v3718_v26 = vld [vmem:[%s5920_s3 + $0x1f4] sm:$0xf0]  ;;  %v3664_v29 = vld [vmem:[%s5920_s3 + $0x44] sm:$0xf0]  ;;  %v2909_v31 = vld [vmem:[%s5920_s3 + $0xc0] sm:$0xf]  ;;  %v2982_v33 = vor.u32 %v3698_v24, %v2981_v22 }
   0xd   :  { %788 = vmatpush.bf16.msra.mxu1 %v2926_v13  ;;  %v3062_v30 = vor.u32 %v3718_v26, %v3061_v25  ;;  %v3680_v32 = vld [vmem:[%s5920_s3 + $0xc4] sm:$0xf0]  ;;  %v3053_v34 = vld [vmem:[%s5920_s3 + $0x1e0] sm:$0xf]  ;;  %v2846_v36 = vor.u32 %v3664_v29, %v2845_v28  ;;  %v2837_v41 = vld [vmem:[%s5920_s3 + $0x30] sm:$0xf] }
   0xe   :  { %v3716_v35 = vld [vmem:[%s5920_s3 + $0x1e4] sm:$0xf0]  ;;  %v2973_v37 = vld [vmem:[%s5920_s3 + $0x140] sm:$0xf]  ;;  %v2910_v40 = vor.u32 %v3680_v32, %v2909_v31  ;;  %v3662_v42 = vld [vmem:[%s5920_s3 + $0x34] sm:$0xf0] }
   0xf   :  { %801 = vmatpush.bf16.msra.mxu2 %v2990_v21  ;;  %813 = vmatpush.bf16.msra.mxu3 %v3062_v30  ;;  %v3696_v38 = vld [vmem:[%s5920_s3 + $0x144] sm:$0xf0]  ;;  %v3054_v39 = vor.u32 %v3716_v35, %v3053_v34  ;;  %v3045_v43 = vld [vmem:[%s5920_s3 + $0x1d0] sm:$0xf]  ;;  %v3678_v45 = vld [vmem:[%s5920_s3 + $0xb4] sm:$0xf0]  ;;  %v2838_v50 = vor.u32 %v3662_v42, %v2837_v41 }
  0x10   :  { %776 = vmatpush.bf16.msra.mxu0 %v2854_v23  ;;  %v2901_v44 = vld [vmem:[%s5920_s3 + $0xb0] sm:$0xf]  ;;  %v3714_v46 = vld [vmem:[%s5920_s3 + $0x1d4] sm:$0xf0]  ;;  %v2974_v47 = vor.u32 %v3696_v38, %v2973_v37  ;;  %v3037_v52 = vld [vmem:[%s5920_s3 + $0x1c0] sm:$0xf] }
  0x11   :  { %789 = vmatpush.bf16.msra.mxu1 %v2918_v27  ;;  %v2965_v48 = vld [vmem:[%s5920_s3 + $0x130] sm:$0xf]  ;;  %v3046_v49 = vor.u32 %v3714_v46, %v3045_v43  ;;  %v3694_v51 = vld [vmem:[%s5920_s3 + $0x134] sm:$0xf0]  ;;  %v3712_v53 = vld [vmem:[%s5920_s3 + $0x1c4] sm:$0xf0]  ;;  %v2902_v54 = vor.u32 %v3678_v45, %v2901_v44 }
  0x12   :  { %v2829_v55 = vld [vmem:[%s5920_s3 + $0x20] sm:$0xf]  ;;  %v3660_v56 = vld [vmem:[%s5920_s3 + $0x24] sm:$0xf0]  ;;  %v2966_v59 = vor.u32 %v3694_v51, %v2965_v48  ;;  %v3038_v61 = vor.u32 %v3712_v53, %v3037_v52  ;;  %v3029_v0 = vld [vmem:[%s5920_s3 + $0x1b0] sm:$0xf] }
  0x13   :  { %802 = vmatpush.bf16.msra.mxu2 %v2982_v33  ;;  %814 = vmatpush.bf16.msra.mxu3 %v3054_v39  ;;  %v2893_v57 = vld [vmem:[%s5920_s3 + $0xa0] sm:$0xf]  ;;  %v3676_v58 = vld [vmem:[%s5920_s3 + $0xa4] sm:$0xf0]  ;;  %v2830_v62 = vor.u32 %v3660_v56, %v2829_v55  ;;  %v3710_v1 = vld [vmem:[%s5920_s3 + $0x1b4] sm:$0xf0] }
  0x14   :  { %777 = vmatpush.bf16.msra.mxu0 %v2846_v36  ;;  %v2957_v60 = vld [vmem:[%s5920_s3 + $0x120] sm:$0xf]  ;;  %v3692_v63 = vld [vmem:[%s5920_s3 + $0x124] sm:$0xf0]  ;;  %v2894_v2 = vor.u32 %v3676_v58, %v2893_v57  ;;  %v2821_v3 = vld [vmem:[%s5920_s3 + $0x10] sm:$0xf]  ;;  %v3030_v9 = vor.u32 %v3710_v1, %v3029_v0 }
  0x15   :  { %790 = vmatpush.bf16.msra.mxu1 %v2910_v40  ;;  %v3658_v4 = vld [vmem:[%s5920_s3 + $0x14] sm:$0xf0]  ;;  %v2885_v5 = vld [vmem:[%s5920_s3 + $0x90] sm:$0xf]  ;;  %v2958_v7 = vor.u32 %v3692_v63, %v2957_v60  ;;  %v3021_v12 = vld [vmem:[%s5920_s3 + $0x1a0] sm:$0xf] }
  0x16   :  { %v3674_v6 = vld [vmem:[%s5920_s3 + $0x94] sm:$0xf0]  ;;  %v2949_v8 = vld [vmem:[%s5920_s3 + $0x110] sm:$0xf]  ;;  %v2822_v10 = vor.u32 %v3658_v4, %v2821_v3  ;;  %v3708_v13 = vld [vmem:[%s5920_s3 + $0x1a4] sm:$0xf0] }
  0x17   :  { %803 = vmatpush.bf16.msra.mxu2 %v2974_v47  ;;  %815 = vmatpush.bf16.msra.mxu3 %v3046_v49  ;;  %v3690_v11 = vld [vmem:[%s5920_s3 + $0x114] sm:$0xf0]  ;;  %v2886_v14 = vor.u32 %v3674_v6, %v2885_v5  ;;  %v2813_v15 = vld [vmem:[%s5920_s3] sm:$0xf]  ;;  %v3656_v16 = vld [vmem:[%s5920_s3 + $0x4] sm:$0xf0]  ;;  %v3022_v25 = vor.u32 %v3708_v13, %v3021_v12 }
  0x18   :  { %778 = vmatpush.bf16.msra.mxu0 %v2838_v50  ;;  %v2877_v17 = vld [vmem:[%s5920_s3 + $0x80] sm:$0xf]  ;;  %v3672_v18 = vld [vmem:[%s5920_s3 + $0x84] sm:$0xf0]  ;;  %v3125_v19 = vld [vmem:[%s5920_s3 + $0x270] sm:$0xf]  ;;  %v2950_v21 = vor.u32 %v3690_v11, %v2949_v8  ;;  %v2814_v26 = vor.u32 %v3656_v16, %v2813_v15 }
  0x19   :  { %791 = vmatpush.bf16.msra.mxu1 %v2902_v54  ;;  %v3734_v20 = vld [vmem:[%s5920_s3 + $0x274] sm:$0xf0]  ;;  %v3189_v22 = vld [vmem:[%s5920_s3 + $0x2f0] sm:$0xf]  ;;  %v2941_v24 = vld [vmem:[%s5920_s3 + $0x100] sm:$0xf]  ;;  %v2878_v30 = vor.u32 %v3672_v18, %v2877_v17 }
  0x1a   :  { %v3750_v23 = vld [vmem:[%s5920_s3 + $0x2f4] sm:$0xf0]  ;;  %v3688_v27 = vld [vmem:[%s5920_s3 + $0x104] sm:$0xf0]  ;;  %v3013_v28 = vld [vmem:[%s5920_s3 + $0x190] sm:$0xf]  ;;  %v3126_v31 = vor.u32 %v3734_v20, %v3125_v19 }
  0x1b   :  { %804 = vmatpush.bf16.msra.mxu2 %v2966_v59  ;;  %816 = vmatpush.bf16.msra.mxu3 %v3038_v61  ;;  %v3706_v29 = vld [vmem:[%s5920_s3 + $0x194] sm:$0xf0]  ;;  %v3253_v32 = vld [vmem:[%s5920_s3 + $0x370] sm:$0xf]  ;;  %v3190_v34 = vor.u32 %v3750_v23, %v3189_v22  ;;  %v3117_v35 = vld [vmem:[%s5920_s3 + $0x260] sm:$0xf]  ;;  %v2942_v37 = vor.u32 %v3688_v27, %v2941_v24 }
  0x1c   :  { %779 = vmatpush.bf16.msra.mxu0 %v2830_v62  ;;  %v3766_v33 = vld [vmem:[%s5920_s3 + $0x374] sm:$0xf0]  ;;  %v3732_v36 = vld [vmem:[%s5920_s3 + $0x264] sm:$0xf0]  ;;  %v3181_v38 = vld [vmem:[%s5920_s3 + $0x2e0] sm:$0xf]  ;;  %v3014_v40 = vor.u32 %v3706_v29, %v3013_v28 }
  0x1d   :  { %792 = vmatpush.bf16.msra.mxu1 %v2894_v2  ;;  %v3748_v39 = vld [vmem:[%s5920_s3 + $0x2e4] sm:$0xf0]  ;;  %v3245_v41 = vld [vmem:[%s5920_s3 + $0x360] sm:$0xf]  ;;  %v3254_v42 = vor.u32 %v3766_v33, %v3253_v32  ;;  %v3118_v46 = vor.u32 %v3732_v36, %v3117_v35  ;;  %v3669_v47 = vld [vmem:[%s5920_s3 + $0x74] sm:$0xf] }
  0x1e   :  { %v3764_v43 = vld [vmem:[%s5920_s3 + $0x364] sm:$0xf0]  ;;  %v3005_v44 = vld [vmem:[%s5920_s3 + $0x180] sm:$0xf]  ;;  %v2871_v48 = vld [vmem:[%s5920_s3 + $0x78] sm:$0xf0]  ;;  %v3182_v50 = vor.u32 %v3748_v39, %v3181_v38 }
  0x1f   :  { %805 = vmatpush.bf16.msra.mxu2 %v2958_v7  ;;  %817 = vmatpush.bf16.msra.mxu3 %v3030_v9  ;;  %v3704_v45 = vld [vmem:[%s5920_s3 + $0x184] sm:$0xf0]  ;;  %v3109_v51 = vld [vmem:[%s5920_s3 + $0x250] sm:$0xf]  ;;  %v3730_v52 = vld [vmem:[%s5920_s3 + $0x254] sm:$0xf0]  ;;  %v3246_v56 = vor.u32 %v3764_v43, %v3245_v41  ;;  %v2874_v61 = vor.u32 %v3669_v47, %v2871_v48 }
  0x20   :  { %780 = vmatpush.bf16.msra.mxu0 %v2822_v10  ;;  %v68_v49 = vld [vmem:[%s5917_s0 + $0x8] sm:$0x77]  ;;  %v3173_v54 = vld [vmem:[%s5920_s3 + $0x2d0] sm:$0xf]  ;;  %v3746_v55 = vld [vmem:[%s5920_s3 + $0x2d4] sm:$0xf0]  ;;  %v3006_v57 = vor.u32 %v3704_v45, %v3005_v44  ;;  %v3110_v1 = vor.u32 %v3730_v52, %v3109_v51 }
  0x21   :  { %793 = vmatpush.bf16.msra.mxu1 %v2886_v14  ;;  %v195_v53 = vunpack.c.l.b16 %v68_v49  ;;  %v67_v58 = vld [vmem:[%s5917_s0] sm:$0x77]  ;;  %v196_v59 = vunpack.c.h.b16 %v68_v49  ;;  %v3237_v60 = vld [vmem:[%s5920_s3 + $0x350] sm:$0xf]  ;;  %v3762_v2 = vld [vmem:[%s5920_s3 + $0x354] sm:$0xf0]  ;;  %v3174_v5 = vor.u32 %v3746_v55, %v3173_v54 }
  0x22   :  { %v193_v63 = vunpack.c.l.b16 %v67_v58  ;;  %v194_v0 = vunpack.c.h.b16 %v67_v58  ;;  %v3667_v3 = vld [vmem:[%s5920_s3 + $0x64] sm:$0xf]  ;;  %v2863_v4 = vld [vmem:[%s5920_s3 + $0x68] sm:$0xf0]  ;;  %v3101_v6 = vld [vmem:[%s5920_s3 + $0x240] sm:$0xf]  ;;  %v3238_v13 = vor.u32 %v3762_v2, %v3237_v60 }
  0x23   :  { %806 = vmatpush.bf16.msra.mxu2 %v2950_v21  ;;  %818 = vmatpush.bf16.msra.mxu3 %v3022_v25  ;;  %v4271_v62 = vpack.c.b16 %v195_v53, %v195_v53  ;;  %v3728_v7 = vld [vmem:[%s5920_s3 + $0x244] sm:$0xf0]  ;;  %v3165_v10 = vld [vmem:[%s5920_s3 + $0x2c0] sm:$0xf]  ;;  %v4299_v12 = vpack.c.b16 %v196_v59, %v196_v59  ;;  %v2866_v15 = vor.u32 %v3667_v3, %v2863_v4  ;;  %v3665_v18 = vld [vmem:[%s5920_s3 + $0x54] sm:$0xf] }
  0x24   :  { %781 = vmatpush.bf16.msra.mxu0 %v2814_v26  ;;  %v4289_v8 = vpack.c.b16 %v193_v63, %v193_v63  ;;  %v4291_v9 = vpack.c.b16 %v194_v0, %v194_v0  ;;  %v3744_v11 = vld [vmem:[%s5920_s3 + $0x2c4] sm:$0xf0]  ;;  %v3229_v14 = vld [vmem:[%s5920_s3 + $0x340] sm:$0xf]  ;;  %v3102_v16 = vor.u32 %v3728_v7, %v3101_v6  ;;  %v2855_v19 = vld [vmem:[%s5920_s3 + $0x58] sm:$0xf0] }
  0x25   :  { %794 = vmatpush.bf16.msra.mxu1 %v2878_v30  ;;  %v3760_v17 = vld [vmem:[%s5920_s3 + $0x344] sm:$0xf0]  ;;  %v3166_v20 = vor.u32 %v3744_v11, %v3165_v10  ;;  %v3093_v21 = vld [vmem:[%s5920_s3 + $0x230] sm:$0xf]  ;;  %v3726_v22 = vld [vmem:[%s5920_s3 + $0x234] sm:$0xf0]  ;;  %v2858_v27 = vor.u32 %v3665_v18, %v2855_v19 }
  0x26   :  { %v3157_v23 = vld [vmem:[%s5920_s3 + $0x2b0] sm:$0xf]  ;;  %v3742_v24 = vld [vmem:[%s5920_s3 + $0x2b4] sm:$0xf0]  ;;  %v3230_v25 = vor.u32 %v3760_v17, %v3229_v14  ;;  %v3094_v28 = vor.u32 %v3726_v22, %v3093_v21  ;;  %v3663_v30 = vld [vmem:[%s5920_s3 + $0x44] sm:$0xf] }
  0x27   :  { %807 = vmatpush.bf16.msra.mxu2 %v2942_v37  ;;  %819 = vmatpush.bf16.msra.mxu3 %v3014_v40  ;;  %v3221_v26 = vld [vmem:[%s5920_s3 + $0x330] sm:$0xf]  ;;  %v3758_v29 = vld [vmem:[%s5920_s3 + $0x334] sm:$0xf0]  ;;  %v3158_v32 = vor.u32 %v3742_v24, %v3157_v23  ;;  %v3085_v33 = vld [vmem:[%s5920_s3 + $0x220] sm:$0xf] }
  0x28   :  { %826 = vmatpush.bf16.msrb.mxu0 %v3126_v31  ;;  %795 = vmatmul.bf16.vlgmr.msra.gmra.mxu1 %v4291_v9  ;;  %v2847_v31 = vld [vmem:[%s5920_s3 + $0x48] sm:$0xf0]  ;;  %v3149_v35 = vld [vmem:[%s5920_s3 + $0x2a0] sm:$0xf]  ;;  %v3740_v36 = vld [vmem:[%s5920_s3 + $0x2a4] sm:$0xf0]  ;;  %v3222_v37 = vor.u32 %v3758_v29, %v3221_v26 }
  0x29   :  { %839 = vmatpush.bf16.msrb.mxu1 %v3190_v34  ;;  %782 = vmatmul.bf16.vlgmr.msra.gmra.mxu0 %v4289_v8  ;;  %v3724_v34 = vld [vmem:[%s5920_s3 + $0x224] sm:$0xf0]  ;;  %v3213_v38 = vld [vmem:[%s5920_s3 + $0x320] sm:$0xf]  ;;  %v2850_v39 = vor.u32 %v3663_v30, %v2847_v31  ;;  %v2839_v43 = vld [vmem:[%s5920_s3 + $0x38] sm:$0xf0]  ;;  %v3150_v44 = vor.u32 %v3740_v36, %v3149_v35 }
  0x2a   :  { %808 = vmatmul.bf16.vlgmr.msra.gmra.mxu2 %v4271_v62  ;;  %v3086_v40 = vor.u32 %v3724_v34, %v3085_v33  ;;  %v3756_v41 = vld [vmem:[%s5920_s3 + $0x324] sm:$0xf0]  ;;  %v3077_v45 = vld [vmem:[%s5920_s3 + $0x210] sm:$0xf]  ;;  %v3738_v48 = vld [vmem:[%s5920_s3 + $0x294] sm:$0xf0] }
  0x2b   :  { %852 = vmatpush.bf16.msrb.mxu2 %v3254_v42  ;;  %820 = vmatpush.bf16.msra.mxu3 %v3006_v57  ;;  %v3661_v42 = vld [vmem:[%s5920_s3 + $0x34] sm:$0xf]  ;;  %v3141_v47 = vld [vmem:[%s5920_s3 + $0x290] sm:$0xf]  ;;  %v3214_v49 = vor.u32 %v3756_v41, %v3213_v38  ;;  %v3754_v51 = vld [vmem:[%s5920_s3 + $0x314] sm:$0xf0] }
  0x2c   :  { %827 = vmatpush.bf16.msrb.mxu0 %v3118_v46  ;;  %v3722_v46 = vld [vmem:[%s5920_s3 + $0x214] sm:$0xf0]  ;;  %v2842_v52 = vor.u32 %v3661_v42, %v2839_v43  ;;  %v3659_v54 = vld [vmem:[%s5920_s3 + $0x24] sm:$0xf]  ;;  %v2831_v55 = vld [vmem:[%s5920_s3 + $0x28] sm:$0xf0]  ;;  %v3142_v57 = vor.u32 %v3738_v48, %v3141_v47 }
  0x2d   :  { %840 = vmatpush.bf16.msrb.mxu1 %v3182_v50  ;;  %v3205_v50 = vld [vmem:[%s5920_s3 + $0x310] sm:$0xf]  ;;  %v3078_v53 = vor.u32 %v3722_v46, %v3077_v45  ;;  %v3069_v58 = vld [vmem:[%s5920_s3 + $0x200] sm:$0xf]  ;;  %v3720_v59 = vld [vmem:[%s5920_s3 + $0x204] sm:$0xf0]  ;;  %v2834_v4 = vor.u32 %v3659_v54, %v2831_v55 }
  0x2e   :  { %821 = vmatmul.bf16.vlgmr.msra.gmra.mxu3 %v4299_v12  ;;  %v3133_v60 = vld [vmem:[%s5920_s3 + $0x280] sm:$0xf]  ;;  %v3685_v63 = vld [vmem:[%s5920_s3 + $0xf4] sm:$0xf]  ;;  %v2935_v0 = vld [vmem:[%s5920_s3 + $0xf8] sm:$0xf0]  ;;  %v3070_v7 = vor.u32 %v3720_v59, %v3069_v58 }
  0x2f   :  { %853 = vmatpush.bf16.msrb.mxu2 %v3246_v56  ;;  %865 = vmatpush.bf16.msrb.mxu3 %v2874_v61  ;;  %v69_v56 = vld [vmem:[%s5917_s0 + $0x10] sm:$0x77]  ;;  %v3736_v61 = vld [vmem:[%s5920_s3 + $0x284] sm:$0xf0]  ;;  %v2999_v3 = vld [vmem:[%s5920_s3 + $0x178] sm:$0xf0] }
  0x30   :  { %828 = vmatpush.bf16.msrb.mxu0 %v3110_v1  ;;  %v3206_v1 = vor.u32 %v3754_v51, %v3205_v50  ;;  %v3701_v2 = vld [vmem:[%s5920_s3 + $0x174] sm:$0xf]  ;;  %v197_v6 = vunpack.c.l.b16 %v69_v56  ;;  %v3197_v10 = vld [vmem:[%s5920_s3 + $0x300] sm:$0xf]  ;;  %v3752_v11 = vld [vmem:[%s5920_s3 + $0x304] sm:$0xf0]  ;;  %v3134_v14 = vor.u32 %v3736_v61, %v3133_v60 }
  0x31   :  { %841 = vmatpush.bf16.msrb.mxu1 %v3174_v5  ;;  %v70_v5 = vld [vmem:[%s5917_s0 + $0x18] sm:$0x7]  ;;  %v3657_v17 = vld [vmem:[%s5920_s3 + $0x14] sm:$0xf]  ;;  %v2823_v18 = vld [vmem:[%s5920_s3 + $0x18] sm:$0xf0]  ;;  %v3002_v19 = vor.u32 %v3701_v2, %v2999_v3  ;;  %v3198_v24 = vor.u32 %v3752_v11, %v3197_v10 }
  0x32   :  { %v199_v21 = vunpack.c.l.b16 %v70_v5  ;;  %v3717_v22 = vld [vmem:[%s5920_s3 + $0x1f4] sm:$0xf]  ;;  %v3063_v23 = vld [vmem:[%s5920_s3 + $0x1f8] sm:$0xf0]  ;;  %v2991_v26 = vld [vmem:[%s5920_s3 + $0x168] sm:$0xf0] }
  0x33   :  { %854 = vmatpush.bf16.msrb.mxu2 %v3238_v13  ;;  %866 = vmatpush.bf16.msrb.mxu3 %v2866_v15  ;;  %v198_v13 = vunpack.c.h.b16 %v69_v56  ;;  %v2938_v15 = vor.u32 %v3685_v63, %v2935_v0  ;;  %v3681_v29 = vld [vmem:[%s5920_s3 + $0xd4] sm:$0xf]  ;;  %v3066_v33 = vor.u32 %v3717_v22, %v3063_v23  ;;  %v3655_v34 = vld [vmem:[%s5920_s3 + $0x4] sm:$0xf]  ;;  %v2815_v35 = vld [vmem:[%s5920_s3 + $0x8] sm:$0xf0] }
  0x34   :  { %829 = vmatpush.bf16.msrb.mxu0 %v3102_v16  ;;  %v3683_v16 = vld [vmem:[%s5920_s3 + $0xe4] sm:$0xf]  ;;  %v3697_v38 = vld [vmem:[%s5920_s3 + $0x154] sm:$0xf]  ;;  %v2983_v41 = vld [vmem:[%s5920_s3 + $0x158] sm:$0xf0] }
  0x35   :  { %842 = vmatpush.bf16.msrb.mxu1 %v3166_v20  ;;  %v2927_v20 = vld [vmem:[%s5920_s3 + $0xe8] sm:$0xf0]  ;;  %v4453_v30 = vpack.c.b16 %v198_v13, %v198_v13  ;;  %v3715_v42 = vld [vmem:[%s5920_s3 + $0x1e4] sm:$0xf]  ;;  %v3713_v55 = vld [vmem:[%s5920_s3 + $0x1d4] sm:$0xf] }
  0x36   :  { %v2930_v31 = vor.u32 %v3683_v16, %v2927_v20  ;;  %v3055_v43 = vld [vmem:[%s5920_s3 + $0x1e8] sm:$0xf0]  ;;  %v3679_v46 = vld [vmem:[%s5920_s3 + $0xc4] sm:$0xf]  ;;  %v3047_v56 = vld [vmem:[%s5920_s3 + $0x1d8] sm:$0xf0] }
  0x37   :  { %855 = vmatpush.bf16.msrb.mxu2 %v3230_v25  ;;  %867 = vmatpush.bf16.msrb.mxu3 %v2858_v27  ;;  %v3699_v25 = vld [vmem:[%s5920_s3 + $0x164] sm:$0xf]  ;;  %v4448_v27 = vpack.c.b16 %v197_v6, %v197_v6  ;;  %v2911_v47 = vld [vmem:[%s5920_s3 + $0xc8] sm:$0xf0]  ;;  %v3058_v51 = vor.u32 %v3715_v42, %v3055_v43  ;;  %v3677_v58 = vld [vmem:[%s5920_s3 + $0xb4] sm:$0xf]  ;;  %v3050_v0 = vor.u32 %v3713_v55, %v3047_v56 }
  0x38   :  { %830 = vmatpush.bf16.msrb.mxu0 %v3094_v28  ;;  %v2826_v28 = vor.u32 %v3657_v17, %v2823_v18  ;;  %v2994_v36 = vor.u32 %v3699_v25, %v2991_v26  ;;  %v3695_v50 = vld [vmem:[%s5920_s3 + $0x144] sm:$0xf]  ;;  %v2975_v54 = vld [vmem:[%s5920_s3 + $0x148] sm:$0xf0]  ;;  %v2903_v59 = vld [vmem:[%s5920_s3 + $0xb8] sm:$0xf0] }
  0x39   :  { %843 = vmatpush.bf16.msrb.mxu1 %v3158_v32  ;;  %v2919_v32 = vld [vmem:[%s5920_s3 + $0xd8] sm:$0xf0]  ;;  %v3693_v60 = vld [vmem:[%s5920_s3 + $0x134] sm:$0xf]  ;;  %v2978_v63 = vor.u32 %v3695_v50, %v2975_v54  ;;  %v3039_v5 = vld [vmem:[%s5920_s3 + $0x1c8] sm:$0xf0]  ;;  %v2906_v6 = vor.u32 %v3677_v58, %v2903_v59 }
  0x3a   :  { %v2922_v45 = vor.u32 %v3681_v29, %v2919_v32  ;;  %v3111_v2 = vld [vmem:[%s5920_s3 + $0x258] sm:$0xf0]  ;;  %v2895_v10 = vld [vmem:[%s5920_s3 + $0xa8] sm:$0xf0]  ;;  %v3709_v18 = vld [vmem:[%s5920_s3 + $0x1b4] sm:$0xf] }
  0x3b   :  { %856 = vmatpush.bf16.msrb.mxu2 %v3222_v37  ;;  %868 = vmatpush.bf16.msrb.mxu3 %v2850_v39  ;;  %v4464_v37 = vpack.c.b16 %v199_v21, %v199_v21  ;;  %v3733_v39 = vld [vmem:[%s5920_s3 + $0x274] sm:$0xf]  ;;  %v2967_v3 = vld [vmem:[%s5920_s3 + $0x138] sm:$0xf0]  ;;  %v3103_v16 = vld [vmem:[%s5920_s3 + $0x248] sm:$0xf0] }
  0x3c   :  { %831 = vmatpush.bf16.msrb.mxu0 %v3086_v40  ;;  %v3127_v40 = vld [vmem:[%s5920_s3 + $0x278] sm:$0xf0]  ;;  %v2970_v13 = vor.u32 %v3693_v60, %v2967_v3  ;;  %v2959_v17 = vld [vmem:[%s5920_s3 + $0x128] sm:$0xf0]  ;;  %v3673_v21 = vld [vmem:[%s5920_s3 + $0x94] sm:$0xf] }
  0x3d   :  { %844 = vmatpush.bf16.msrb.mxu1 %v3150_v44  ;;  %v2818_v44 = vor.u32 %v3655_v34, %v2815_v35  ;;  %v3130_v48 = vor.u32 %v3733_v39, %v3127_v40  ;;  %v2887_v22 = vld [vmem:[%s5920_s3 + $0x98] sm:$0xf0]  ;;  %v3689_v25 = vld [vmem:[%s5920_s3 + $0x114] sm:$0xf]  ;;  %v3707_v32 = vld [vmem:[%s5920_s3 + $0x1a4] sm:$0xf] }
  0x3e   :  { %v3095_v29 = vld [vmem:[%s5920_s3 + $0x238] sm:$0xf0]  ;;  %v2890_v34 = vor.u32 %v3673_v21, %v2887_v22  ;;  %v3671_v35 = vld [vmem:[%s5920_s3 + $0x84] sm:$0xf]  ;;  %v3721_v55 = vld [vmem:[%s5920_s3 + $0x214] sm:$0xf] }
  0x3f   :  { %857 = vmatpush.bf16.msrb.mxu2 %v3214_v49  ;;  %869 = vmatpush.bf16.msrb.mxu3 %v2842_v52  ;;  %v2986_v49 = vor.u32 %v3697_v38, %v2983_v41  ;;  %v3731_v52 = vld [vmem:[%s5920_s3 + $0x264] sm:$0xf]  ;;  %v2943_v41 = vld [vmem:[%s5920_s3 + $0x108] sm:$0xf0]  ;;  %v3015_v50 = vld [vmem:[%s5920_s3 + $0x198] sm:$0xf0] }
  0x40   :  { %832 = vmatpush.bf16.msrb.mxu0 %v3078_v53  ;;  %v3119_v53 = vld [vmem:[%s5920_s3 + $0x268] sm:$0xf0]  ;;  %v3687_v38 = vld [vmem:[%s5920_s3 + $0x104] sm:$0xf]  ;;  %v3079_v56 = vld [vmem:[%s5920_s3 + $0x218] sm:$0xf0] }
  0x41   :  { %845 = vmatpush.bf16.msrb.mxu1 %v3142_v57  ;;  %v2914_v57 = vor.u32 %v3679_v46, %v2911_v47  ;;  %v3122_v61 = vor.u32 %v3731_v52, %v3119_v53  ;;  %v3723_v43 = vld [vmem:[%s5920_s3 + $0x224] sm:$0xf]  ;;  %v3191_v46 = vld [vmem:[%s5920_s3 + $0x2f8] sm:$0xf0]  ;;  %v3765_v47 = vld [vmem:[%s5920_s3 + $0x374] sm:$0xf]  ;;  %v2946_v53 = vor.u32 %v3687_v38, %v2943_v41 }
  0x42   :  { %v3747_v58 = vld [vmem:[%s5920_s3 + $0x2e4] sm:$0xf]  ;;  %v3183_v59 = vld [vmem:[%s5920_s3 + $0x2e8] sm:$0xf0]  ;;  %v3741_v21 = vld [vmem:[%s5920_s3 + $0x2b4] sm:$0xf] }
  0x43   :  { %858 = vmatpush.bf16.msrb.mxu2 %v3206_v1  ;;  %870 = vmatpush.bf16.msrb.mxu3 %v2834_v4  ;;  %v3729_v1 = vld [vmem:[%s5920_s3 + $0x254] sm:$0xf]  ;;  %v3711_v4 = vld [vmem:[%s5920_s3 + $0x1c4] sm:$0xf]  ;;  %v3186_v3 = vor.u32 %v3747_v58, %v3183_v59  ;;  %v3159_v22 = vld [vmem:[%s5920_s3 + $0x2b8] sm:$0xf0] }
  0x44   :  { %833 = vmatpush.bf16.msrb.mxu0 %v3070_v7  ;;  %v3675_v7 = vld [vmem:[%s5920_s3 + $0xa4] sm:$0xf]  ;;  %v3114_v11 = vor.u32 %v3729_v1, %v3111_v2  ;;  %v3007_v1 = vld [vmem:[%s5920_s3 + $0x188] sm:$0xf0]  ;;  %v3082_v2 = vor.u32 %v3721_v55, %v3079_v56  ;;  %vm989_vm0 = vcmask 1042432   ;;  %vm982_vm1 = vcmask 48128  }
  0x45   :  { %846 = vmatpush.bf16.msrb.mxu1 %v3134_v14  ;;  %v3691_v14 = vld [vmem:[%s5920_s3 + $0x124] sm:$0xf]  ;;  %v2898_v20 = vor.u32 %v3675_v7, %v2895_v10  ;;  %v3745_v7 = vld [vmem:[%s5920_s3 + $0x2d4] sm:$0xf]  ;;  %v3175_v10 = vld [vmem:[%s5920_s3 + $0x2d8] sm:$0xf0] }
  0x46   :  { %v3763_v60 = vld [vmem:[%s5920_s3 + $0x364] sm:$0xf]  ;;  %v3135_v41 = vld [vmem:[%s5920_s3 + $0x288] sm:$0xf0]  ;;  %vm1372_vm2 = vcmask 261120   ;;  %vm1848_vm3 = vcmask 785408  }
  0x47   :  { %859 = vmatpush.bf16.msrb.mxu2 %v3198_v24  ;;  %834 = vmatmul.bf16.vlgmr.msrb.gmra.mxu0 %v4448_v27  ;;  %v2962_v24 = vor.u32 %v3691_v14, %v2959_v17  ;;  %v3239_v14 = vld [vmem:[%s5920_s3 + $0x358] sm:$0xf0]  ;;  %v3167_v17 = vld [vmem:[%s5920_s3 + $0x2c8] sm:$0xf0] }
  0x48   :  { %878 = vmatpush.bf16.msra.mxu0 %v2938_v15  ;;  %871 = vmatpush.bf16.msrb.mxu3 %v2826_v28  ;;  %v3727_v15 = vld [vmem:[%s5920_s3 + $0x244] sm:$0xf]  ;;  %v3725_v28 = vld [vmem:[%s5920_s3 + $0x234] sm:$0xf] }
  0x49   :  { %891 = vmatpush.bf16.msra.mxu1 %v3002_v19  ;;  %v3031_v19 = vld [vmem:[%s5920_s3 + $0x1b8] sm:$0xf0]  ;;  %v3106_v23 = vor.u32 %v3727_v15, %v3103_v16  ;;  %v3098_v39 = vor.u32 %v3725_v28, %v3095_v29  ;;  %v3178_v15 = vor.u32 %v3745_v7, %v3175_v10  ;;  %v3755_v28 = vld [vmem:[%s5920_s3 + $0x324] sm:$0xf]  ;;  %v3215_v29 = vld [vmem:[%s5920_s3 + $0x328] sm:$0xf0] }
  0x4a   :  { %847 = vmatmul.bf16.vlgmr.msrb.gmra.mxu1 %v4453_v30  ;;  %860 = vmatmul.bf16.vlgmr.msrb.gmra.mxu2 %v4464_v37  ;;  %v3034_v26 = vor.u32 %v3709_v18, %v3031_v19  ;;  %v3759_v18 = vld [vmem:[%s5920_s3 + $0x344] sm:$0xf] }
  0x4b   :  { %904 = vmatpush.bf16.msra.mxu2 %v3066_v33  ;;  %v3023_v33 = vld [vmem:[%s5920_s3 + $0x1a8] sm:$0xf0] }
  0x4c   :  { %879 = vmatpush.bf16.msra.mxu0 %v2930_v31  ;;  %872 = vmatpush.bf16.msrb.mxu3 %v2818_v44  ;;  %v2951_v31 = vld [vmem:[%s5920_s3 + $0x118] sm:$0xf0]  ;;  %v3026_v42 = vor.u32 %v3707_v32, %v3023_v33  ;;  %v3087_v44 = vld [vmem:[%s5920_s3 + $0x228] sm:$0xf0]  ;;  %v3218_v32 = vor.u32 %v3755_v28, %v3215_v29  ;;  %v3737_v33 = vld [vmem:[%s5920_s3 + $0x294] sm:$0xf] }
  0x4d   :  { %892 = vmatpush.bf16.msra.mxu1 %v2994_v36  ;;  %v2879_v36 = vld [vmem:[%s5920_s3 + $0x88] sm:$0xf0]  ;;  %v2954_v40 = vor.u32 %v3689_v25, %v2951_v31  ;;  %v3090_v52 = vor.u32 %v3723_v43, %v3087_v44  ;;  %v3784_v28 = vld [vmem:[%s5925_s8 + $0x74] sm:$0xf0]  ;;  %v3783_v29 = vld [vmem:[%s5925_s8 + $0x74] sm:$0xf] }
  0x4e   :  { %v3199_v43 = vld [vmem:[%s5920_s3 + $0x308] sm:$0xf0] }
  0x4f   :  { %905 = vmatpush.bf16.msra.mxu2 %v3058_v51  ;;  %873 = vmatmul.bf16.vlgmr.msrb.gmra.mxu3 %v4289_v8  ;;  %v3042_v8 = vor.u32 %v3711_v4, %v3039_v5  ;;  %v2882_v51 = vor.u32 %v3671_v35, %v2879_v36  ;;  %v3719_v4 = vld [vmem:[%s5920_s3 + $0x204] sm:$0xf]  ;;  %v3071_v5 = vld [vmem:[%s5920_s3 + $0x208] sm:$0xf0]  ;;  %v3753_v35 = vld [vmem:[%s5920_s3 + $0x314] sm:$0xf] }
  0x50   :  { %880 = vmatpush.bf16.msra.mxu0 %v2922_v45  ;;  %917 = vmatpush.bf16.msra.mxu3 %v3130_v48  ;;  %v3749_v45 = vld [vmem:[%s5920_s3 + $0x2f4] sm:$0xf]  ;;  %v3255_v48 = vld [vmem:[%s5920_s3 + $0x378] sm:$0xf0] }
  0x51   :  { %893 = vmatpush.bf16.msra.mxu1 %v2986_v49  ;;  %v3705_v49 = vld [vmem:[%s5920_s3 + $0x194] sm:$0xf]  ;;  %v3194_v54 = vor.u32 %v3749_v45, %v3191_v46  ;;  %v3207_v36 = vld [vmem:[%s5920_s3 + $0x318] sm:$0xf0] }
  0x53   :  { %906 = vmatpush.bf16.msra.mxu2 %v3050_v0  ;;  %v3703_v0 = vld [vmem:[%s5920_s3 + $0x184] sm:$0xf] }
  0x54   :  { %881 = vmatpush.bf16.msra.mxu0 %v2914_v57  ;;  %918 = vmatpush.bf16.msra.mxu3 %v3122_v61  ;;  %v3258_v57 = vor.u32 %v3765_v47, %v3255_v48  ;;  %v3018_v61 = vor.u32 %v3705_v49, %v3015_v50  ;;  %v183_v48 = vld [vmem:[%s5921_s4] sm:$0x3] }
  0x55   :  { %894 = vmatpush.bf16.msra.mxu1 %v2978_v63  ;;  %v3247_v63 = vld [vmem:[%s5920_s3 + $0x368] sm:$0xf0]  ;;  %v185_v50 = vperm.slane %v183_v48, 0 }
  0x57   :  { %907 = vmatpush.bf16.msra.mxu2 %v3042_v8  ;;  %v3074_v8 = vor.u32 %v3719_v4, %v3071_v5 }
  0x58   :  { %882 = vmatpush.bf16.msra.mxu0 %v2906_v6  ;;  %919 = vmatpush.bf16.msra.mxu3 %v3114_v11  ;;  %v3250_v6 = vor.u32 %v3763_v60, %v3247_v63  ;;  %v3010_v11 = vor.u32 %v3703_v0, %v3007_v1 }
  0x59   :  { %895 = vmatpush.bf16.msra.mxu1 %v2970_v13  ;;  %v3761_v13 = vld [vmem:[%s5920_s3 + $0x354] sm:$0xf] }
  0x5a   :  { %v3242_v16 = vor.u32 %v3761_v13, %v3239_v14 }
  0x5b   :  { %908 = vmatpush.bf16.msra.mxu2 %v3034_v26  ;;  %v3739_v26 = vld [vmem:[%s5920_s3 + $0x2a4] sm:$0xf] }
  0x5c   :  { %883 = vmatpush.bf16.msra.mxu0 %v2898_v20  ;;  %920 = vmatpush.bf16.msra.mxu3 %v3106_v23  ;;  %v3757_v23 = vld [vmem:[%s5920_s3 + $0x334] sm:$0xf] }
  0x5d   :  { %896 = vmatpush.bf16.msra.mxu1 %v2962_v24  ;;  %v3162_v24 = vor.u32 %v3741_v21, %v3159_v22 }
  0x5f   :  { %909 = vmatpush.bf16.msra.mxu2 %v3026_v42  ;;  %v3751_v42 = vld [vmem:[%s5920_s3 + $0x304] sm:$0xf] }
  0x60   :  { %884 = vmatpush.bf16.msra.mxu0 %v2890_v34  ;;  %921 = vmatpush.bf16.msra.mxu3 %v3098_v39  ;;  %v3143_v34 = vld [vmem:[%s5920_s3 + $0x298] sm:$0xf0]  ;;  %v3210_v39 = vor.u32 %v3753_v35, %v3207_v36  ;;  %v3202_v45 = vor.u32 %v3751_v42, %v3199_v43  ;;  %v3782_v35 = vld [vmem:[%s5925_s8 + $0x64] sm:$0xf0]  ;;  %v3313_v42 = vld [vmem:[%s5925_s8 + $0x50] sm:$0xf] }
  0x61   :  { %897 = vmatpush.bf16.msra.mxu1 %v2954_v40  ;;  %v3146_v38 = vor.u32 %v3737_v33, %v3143_v34  ;;  %v3735_v40 = vld [vmem:[%s5920_s3 + $0x284] sm:$0xf]  ;;  %v3331_v33 = vld [vmem:[%s5925_s8 + $0x78] sm:$0xf0]  ;;  %v3321_v34 = vld [vmem:[%s5925_s8 + $0x60] sm:$0xf] }
  0x62   :  { %v3138_v44 = vor.u32 %v3735_v40, %v3135_v41  ;;  %v4766_v36 = vor.u32 %v3783_v29, %v3331_v33  ;;  %v4775_v40 = vor.u32 %v3782_v35, %v3321_v34  ;;  %v3780_v43 = vld [vmem:[%s5925_s8 + $0x54] sm:$0xf0]  ;;  %v3273_v29 = vld [vmem:[%s5925_s8] sm:$0xf]  ;;  %v3794_v35 = vld [vmem:[%s5925_s8 + $0xc4] sm:$0xf0] }
  0x63   :  { %910 = vmatpush.bf16.msra.mxu2 %v3018_v61  ;;  %v3369_v33 = vld [vmem:[%s5925_s8 + $0xc0] sm:$0xf] }
  0x64   :  { %885 = vmatpush.bf16.msra.mxu0 %v2882_v51  ;;  %922 = vmatpush.bf16.msra.mxu3 %v3090_v52 }
  0x65   :  { %898 = vmatpush.bf16.msra.mxu1 %v2946_v53 }
  0x67   :  { %886 = vmatmul.bf16.vlgmr.msra.gmra.mxu0 %v4291_v9  ;;  %911 = vmatpush.bf16.msra.mxu2 %v3010_v11  ;;  %v3743_v9 = vld [vmem:[%s5920_s3 + $0x2c4] sm:$0xf] }
  0x68   :  { %930 = vmatpush.bf16.msrb.mxu0 %v3194_v54  ;;  %923 = vmatpush.bf16.msra.mxu3 %v3082_v2  ;;  %v3170_v19 = vor.u32 %v3743_v9, %v3167_v17  ;;  %v4735_v11 = vld [vmem:[%s5918_s1] sm:$0xff] }
  0x69   :  { %943 = vmatpush.bf16.msrb.mxu1 %v3258_v57 }
  0x6a   :  { %899 = vmatmul.bf16.vlgmr.msra.gmra.mxu1 %v4271_v62  ;;  %v3231_v62 = vld [vmem:[%s5920_s3 + $0x348] sm:$0xf0]  ;;  %912 = vmatmul.bf16.vlgmr.msra.gmra.mxu2 %v4299_v12  ;;  %v3223_v12 = vld [vmem:[%s5920_s3 + $0x338] sm:$0xf0] }
  0x6b   :  { %v3234_v20 = vor.u32 %v3759_v18, %v3231_v62  ;;  %v3226_v25 = vor.u32 %v3757_v23, %v3223_v12  ;;  %v4742_v18 = vld [vmem:[%s5918_s1 + $0x8] sm:$0xff] }
  0x6c   :  { %931 = vmatpush.bf16.msrb.mxu0 %v3186_v3  ;;  %924 = vmatpush.bf16.msra.mxu3 %v3074_v8  ;;  %v186_v8 = vperm.slane %v183_v48, 1 }
  0x6d   :  { %944 = vmatpush.bf16.msrb.mxu1 %v3250_v6 }
  0x6f   :  { %925 = vmatmul.bf16.vlgmr.msra.gmra.mxu3 %v4448_v27  ;;  %v3151_v27 = vld [vmem:[%s5920_s3 + $0x2a8] sm:$0xf0] }
  0x70   :  { %932 = vmatpush.bf16.msrb.mxu0 %v3178_v15  ;;  %v3154_v31 = vor.u32 %v3739_v26, %v3151_v27  ;;  %v3329_v27 = vld [vmem:[%s5925_s8 + $0x70] sm:$0xf] }
  0x71   :  { %945 = vmatpush.bf16.msrb.mxu1 %v3242_v16 }
  0x74   :  { %933 = vmatpush.bf16.msrb.mxu0 %v3170_v19 }
  0x75   :  { %946 = vmatpush.bf16.msrb.mxu1 %v3234_v20 }
  0x78   :  { %934 = vmatpush.bf16.msrb.mxu0 %v3162_v24 }
  0x79   :  { %947 = vmatpush.bf16.msrb.mxu1 %v3226_v25 }
  0x7c   :  { %935 = vmatpush.bf16.msrb.mxu0 %v3154_v31 }
  0x7d   :  { %948 = vmatpush.bf16.msrb.mxu1 %v3218_v32  ;;  %v4755_v32 = vor.u32 %v3784_v28, %v3329_v27  ;;  %v3379_v27 = vld [vmem:[%s5925_s8 + $0xd8] sm:$0xf0] }
  0x80   :  { %936 = vmatpush.bf16.msrb.mxu0 %v3146_v38  ;;  %v3781_v38 = vld [vmem:[%s5925_s8 + $0x64] sm:$0xf] }
  0x81   :  { %949 = vmatpush.bf16.msrb.mxu1 %v3210_v39  ;;  %v3323_v39 = vld [vmem:[%s5925_s8 + $0x68] sm:$0xf0] }
  0x82   :  { %v4778_v41 = vor.u32 %v3781_v38, %v3323_v39  ;;  %v3769_v38 = vld [vmem:[%s5925_s8 + $0x4] sm:$0xf]  ;;  %v3275_v39 = vld [vmem:[%s5925_s8 + $0x8] sm:$0xf0] }
  0x84   :  { %937 = vmatpush.bf16.msrb.mxu0 %v3138_v44  ;;  %v3779_v44 = vld [vmem:[%s5925_s8 + $0x54] sm:$0xf] }
  0x85   :  { %950 = vmatpush.bf16.msrb.mxu1 %v3202_v45  ;;  %v3315_v45 = vld [vmem:[%s5925_s8 + $0x58] sm:$0xf0] }
  0x87   :  { %938 = vmatmul.bf16.vlgmr.msrb.gmra.mxu0 %v4453_v30 }
  0x88   :  { %951 = vmatmul.bf16.vlgmr.msrb.gmra.mxu1 %v4464_v37  ;;  %1276 = vmatpush.bf16.msra.mxu0 %v4766_v36 }
  0x8c   :  { %1277 = vmatpush.bf16.msra.mxu0 %v4778_v41 }
  0xa5   :  { %v796_v46 = vpop.f32.mrf.mxu1 }
  0xa6   :  { %v783_v47 = vpop.f32.mrf.mxu0 }
  0xa7   :  { %v784_v53 = vadd.f32 %v783_v47, %v185_v50  ;;  %v3393_v47 = vld [vmem:[%s5925_s8 + $0xf0] sm:$0xf]  ;;  %v3800_v50 = vld [vmem:[%s5925_s8 + $0xf4] sm:$0xf0] }
  0xa9   :  { %v797_v56 = vadd.f32 %v796_v46, %v784_v53  ;;  %v4808_v53 = vor.u32 %v3779_v44, %v3315_v45  ;;  %v3793_v44 = vld [vmem:[%s5925_s8 + $0xc4] sm:$0xf]  ;;  %v3371_v45 = vld [vmem:[%s5925_s8 + $0xc8] sm:$0xf0] }
  0xab   :  { %1278 = vmatpush.bf16.msra.mxu0 %v4808_v53 }
  0xad   :  { %v809_v49 = vpop.f32.mrf.mxu2  ;;  %v798_v51 = vpop.f32.mrf.mxu1 }
  0xae   :  { %v785_v54 = vpop.f32.mrf.mxu0  ;;  %v810_v58 = vadd.f32 %v809_v49, %v797_v56  ;;  %v4796_v49 = vor.u32 %v3780_v43, %v3313_v42  ;;  %v3799_v51 = vld [vmem:[%s5925_s8 + $0xf4] sm:$0xf]  ;;  %v4951_v42 = vor.u32 %v3794_v35, %v3369_v33  ;;  %v4953_v43 = vor.u32 %v3769_v38, %v3275_v39  ;;  %v3339_v33 = vld [vmem:[%s5925_s8 + $0x88] sm:$0xf0] }
  0xaf   :  { %v3305_v54 = vld [vmem:[%s5925_s8 + $0x40] sm:$0xf] }
  0xb0   :  { %5999 = vst [vmem:[#allocation11_spill] sm:$0xff] %v4951_v42 }
  0xb1   :  { %v822_v52 = vpop.f32.mrf.mxu3 }
  0xb2   :  { %v823_v59 = vadd.f32 %v822_v52, %v810_v58  ;;  %v3395_v52 = vld [vmem:[%s5925_s8 + $0xf8] sm:$0xf0]  ;;  %v3777_v58 = vld [vmem:[%s5925_s8 + $0x44] sm:$0xf] }
  0xb3   :  { %v4816_v56 = vor.u32 %v3799_v51, %v3395_v52  ;;  %v3363_v51 = vld [vmem:[%s5925_s8 + $0xb8] sm:$0xf0] }
  0xb5   :  { %v811_v55 = vpop.f32.mrf.mxu2  ;;  %1295 = vmatpush.bf16.msra.mxu1 %v4816_v56 }
  0xb6   :  { %v3778_v55 = vld [vmem:[%s5925_s8 + $0x44] sm:$0xf0] }
  0xb9   :  { %v824_v57 = vpop.f32.mrf.mxu3 }
  0xc4   :  { %v835_v30 = vpop.f32.mrf.mxu0 }
  0xc5   :  { %v836_v37 = vadd.f32 %v835_v30, %v823_v59  ;;  %v3307_v59 = vld [vmem:[%s5925_s8 + $0x48] sm:$0xf0] }
  0xc7   :  { %v848_v60 = vpop.f32.mrf.mxu1 }
  0xc8   :  { %v849_v61 = vadd.f32 %v848_v60, %v836_v37  ;;  %v4824_v60 = vor.u32 %v3800_v50, %v3393_v47  ;;  %v4828_v37 = vor.u32 %v3778_v55, %v3305_v54  ;;  %v4965_v47 = vor.u32 %v3793_v44, %v3371_v45  ;;  %v3791_v50 = vld [vmem:[%s5925_s8 + $0xb4] sm:$0xf]  ;;  %v5070_v44 = vld [vmem:[%s5929_s12 + $0x38] sm:$0xff] }
  0xc9   :  { %v4981_v54 = vor.u32 %v3791_v50, %v3363_v51  ;;  %v5076_v45 = vld [vmem:[%s5929_s12 + $0x30] sm:$0xff]  ;;  %v5094_v50 = vld [vmem:[%s5929_s12 + $0x18] sm:$0xff] }
  0xca   :  { %5993 = vst [vmem:[#allocation5_spill] sm:$0xff] %v4824_v60  ;;  %v5100_v51 = vld [vmem:[%s5929_s12 + $0x10] sm:$0xff] }
  0xcb   :  { %6009 = vst [vmem:[#allocation21_spill] sm:$0xff] %v5094_v50 }
  0xcc   :  { %v837_v63 = vpop.f32.mrf.mxu0  ;;  %6010 = vst [vmem:[#allocation22_spill] sm:$0xff] %v5100_v51 }
  0xcd   :  { %v861_v0 = vpop.f32.mrf.mxu2  ;;  %v4832_v63 = vor.u32 %v3777_v58, %v3307_v59  ;;  %v960_v58 = vld [vmem:[%s5922_s5 + $0x10] sm:$0xff] }
  0xce   :  { %v862_v2 = vadd.f32 %v861_v0, %v849_v61  ;;  %v3297_v0 = vld [vmem:[%s5925_s8 + $0x30] sm:$0xf] }
  0xcf   :  { %v850_v1 = vpop.f32.mrf.mxu1  ;;  %5994 = vst [vmem:[#allocation6_spill] sm:$0xff] %v4832_v63  ;;  %1279 = vmatpush.bf16.msra.mxu0 %v4832_v63 }
  0xd0   :  { %3859 = vtanh.f32 %v862_v2  ;;  %v3776_v1 = vld [vmem:[%s5925_s8 + $0x34] sm:$0xf0]  ;;  %v3775_v2 = vld [vmem:[%s5925_s8 + $0x34] sm:$0xf] }
  0xd2   :  { %v874_v3 = vpop.f32.mrf.mxu3 }
  0xd3   :  { %v875_v9 = vadd.f32 %v874_v3, %v186_v8  ;;  %v3299_v3 = vld [vmem:[%s5925_s8 + $0x38] sm:$0xf0]  ;;  %v3291_v8 = vld [vmem:[%s5925_s8 + $0x28] sm:$0xf0] }
  0xd5   :  { %v863_v4 = vpop.f32.mrf.mxu2 }
  0xd6   :  { %v3860_v5 = vpop.eup %3859  ;;  %v4848_v4 = vor.u32 %v3776_v1, %v3297_v0  ;;  %v3353_v1 = vld [vmem:[%s5925_s8 + $0xa0] sm:$0xf] }
  0xd7   :  { %v970_v6 = vpack.c.bf16 %v3860_v5, %v3860_v5  ;;  %v4853_v5 = vor.u32 %v3775_v2, %v3299_v3  ;;  %v3790_v2 = vld [vmem:[%s5925_s8 + $0xa4] sm:$0xf0]  ;;  %v3789_v3 = vld [vmem:[%s5925_s8 + $0xa4] sm:$0xf] }
  0xd9   :  { %v991_v7 = vsel %vm989_vm0, %v970_v6, 0  ;;  %1280 = vmatpush.bf16.msra.mxu0 %v4853_v5  ;;  %v3289_v6 = vld [vmem:[%s5925_s8 + $0x20] sm:$0xf] }
  0xda   :  { %1003 = vmatpush.bf16.msrb.mxu2 %v991_v7  ;;  %v876_v10 = vpop.f32.mrf.mxu3  ;;  %v3774_v7 = vld [vmem:[%s5925_s8 + $0x24] sm:$0xf0] }
  0xdb   :  { %v3385_v10 = vld [vmem:[%s5925_s8 + $0xe0] sm:$0xf] }
  0xdd   :  { %3267 = vmatmul.msk.bf16.vlgmr.msrb.gmra.mxu2 %vm982_vm1, %v4735_v11 }
  0xde   :  { %1238 = vmatpush.bf16.msra.mxu2 %v4755_v32 }
  0xe2   :  { %1239 = vmatpush.bf16.msra.mxu2 %v4775_v40 }
  0xe4   :  { %v887_v13 = vpop.f32.mrf.mxu0 }
  0xe5   :  { %v888_v19 = vadd.f32 %v887_v13, %v875_v9  ;;  %v3798_v13 = vld [vmem:[%s5925_s8 + $0xe4] sm:$0xf0]  ;;  %v3797_v9 = vld [vmem:[%s5925_s8 + $0xe4] sm:$0xf] }
  0xe6   :  { %1240 = vmatpush.bf16.msra.mxu2 %v4796_v49 }
  0xe7   :  { %v900_v14 = vpop.f32.mrf.mxu1 }
  0xe8   :  { %v901_v20 = vadd.f32 %v900_v14, %v888_v19  ;;  %v3773_v14 = vld [vmem:[%s5925_s8 + $0x24] sm:$0xf]  ;;  %v3772_v19 = vld [vmem:[%s5925_s8 + $0x14] sm:$0xf0] }
  0xea   :  { %1241 = vmatpush.bf16.msra.mxu2 %v4828_v37 }
  0xec   :  { %v889_v15 = vpop.f32.mrf.mxu0 }
  0xed   :  { %v913_v17 = vpop.f32.mrf.mxu2  ;;  %3268 = vmatmul.msk.bf16.gmra.mxu2 %vm982_vm1, %v4742_v18  ;;  %v4879_v15 = vor.u32 %v3798_v13, %v3385_v10  ;;  %v3355_v10 = vld [vmem:[%s5925_s8 + $0xa8] sm:$0xf0]  ;;  %v3345_v13 = vld [vmem:[%s5925_s8 + $0x90] sm:$0xf] }
  0xee   :  { %v914_v23 = vadd.f32 %v913_v17, %v901_v20  ;;  %1242 = vmatpush.bf16.msra.mxu2 %v4848_v4  ;;  %v3387_v17 = vld [vmem:[%s5925_s8 + $0xe8] sm:$0xf0]  ;;  %v3377_v20 = vld [vmem:[%s5925_s8 + $0xd0] sm:$0xf] }
  0xef   :  { %v902_v16 = vpop.f32.mrf.mxu1  ;;  %5995 = vst [vmem:[#allocation7_spill] sm:$0xff] %v4879_v15 }
  0xf0   :  { %v4881_v16 = vor.u32 %v3773_v14, %v3291_v8  ;;  %v3788_v14 = vld [vmem:[%s5925_s8 + $0x94] sm:$0xf0]  ;;  %v5021_v8 = vor.u32 %v3789_v3, %v3355_v10 }
  0xf2   :  { %v926_v62 = vpop.f32.mrf.mxu3  ;;  %5996 = vst [vmem:[#allocation8_spill] sm:$0xff] %v4881_v16  ;;  %1281 = vmatpush.bf16.msra.mxu0 %v4881_v16 }
  0xf3   :  { %v927_v12 = vadd.f32 %v926_v62, %v914_v23  ;;  %v4893_v62 = vor.u32 %v3797_v9, %v3387_v17  ;;  %v3787_v9 = vld [vmem:[%s5925_s8 + $0x94] sm:$0xf]  ;;  %v3347_v17 = vld [vmem:[%s5925_s8 + $0x98] sm:$0xf0] }
  0xf5   :  { %v915_v21 = vpop.f32.mrf.mxu2  ;;  %1296 = vmatpush.bf16.msra.mxu1 %v4893_v62 }
  0xf6   :  { %v3796_v21 = vld [vmem:[%s5925_s8 + $0xd4] sm:$0xf0] }
  0xf7   :  { %v4908_v23 = vor.u32 %v3796_v21, %v3377_v20  ;;  %v962_v20 = vld [vmem:[%s5922_s5 + $0x20] sm:$0xff]  ;;  %v964_v21 = vld [vmem:[%s5922_s5 + $0x30] sm:$0xff] }
  0xf9   :  { %5997 = vst [vmem:[#allocation9_spill] sm:$0xff] %v4908_v23 }
  0xfa   :  { %v928_v22 = vpop.f32.mrf.mxu3 }
 0x104   :  { %v939_v24 = vpop.f32.mrf.mxu0 }
 0x105   :  { %v940_v25 = vadd.f32 %v939_v24, %v927_v12  ;;  %v952_v26 = vpop.f32.mrf.mxu1  ;;  %v3771_v12 = vld [vmem:[%s5925_s8 + $0x14] sm:$0xf]  ;;  %v3283_v24 = vld [vmem:[%s5925_s8 + $0x18] sm:$0xf0] }
 0x107   :  { %v953_v31 = vadd.f32 %v952_v26, %v940_v25  ;;  %v3795_v25 = vld [vmem:[%s5925_s8 + $0xd4] sm:$0xf]  ;;  %v4920_v26 = vor.u32 %v3771_v12, %v3283_v24  ;;  %v3337_v24 = vld [vmem:[%s5925_s8 + $0x80] sm:$0xf] }
 0x108   :  { %v4925_v28 = vor.u32 %v3795_v25, %v3379_v27  ;;  %v3786_v25 = vld [vmem:[%s5925_s8 + $0x84] sm:$0xf0]  ;;  %v3785_v27 = vld [vmem:[%s5925_s8 + $0x84] sm:$0xf] }
 0x109   :  { %3861 = vtanh.f32 %v953_v31  ;;  %1282 = vmatpush.bf16.msra.mxu0 %v4920_v26  ;;  %v3770_v31 = vld [vmem:[%s5925_s8 + $0x4] sm:$0xf0]  ;;  %v5061_v38 = vor.u32 %v3785_v27, %v3339_v33 }
 0x10a   :  { %1297 = vmatpush.bf16.msra.mxu1 %v4925_v28  ;;  %v4940_v34 = vor.u32 %v3770_v31, %v3273_v29  ;;  %v5054_v31 = vor.u32 %v3786_v25, %v3337_v24  ;;  %v5154_v24 = vld [vmem:[%s5929_s12 + $0x60] sm:$0xff] }
 0x10b   :  { %6018 = vst [vmem:[#allocation30_spill] sm:$0xff] %v5154_v24 }
 0x10c   :  { %v941_v46 = vpop.f32.mrf.mxu0  ;;  %5998 = vst [vmem:[#allocation10_spill] sm:$0xff] %v4940_v34 }
 0x10d   :  { %v954_v48 = vpop.f32.mrf.mxu1  ;;  %v3361_v46 = vld [vmem:[%s5925_s8 + $0xb0] sm:$0xf]  ;;  %1283 = vmatpush.bf16.msra.mxu0 %v4953_v43  ;;  %6006 = vst [vmem:[#allocation18_spill] sm:$0xff] %v5054_v31 }
 0x10e   :  { %v3792_v48 = vld [vmem:[%s5925_s8 + $0xb4] sm:$0xf0]  ;;  %1298 = vmatpush.bf16.msra.mxu1 %v4965_v47 }
 0x10f   :  { %v3862_v57 = vpop.eup %3861  ;;  %v4978_v52 = vor.u32 %v3792_v48, %v3361_v46  ;;  %v5082_v46 = vld [vmem:[%s5929_s12 + $0x28] sm:$0xff]  ;;  %v5088_v48 = vld [vmem:[%s5929_s12 + $0x20] sm:$0xff] }
 0x110   :  { %v971_v30 = vpack.c.bf16 %v3862_v57, %v3862_v57  ;;  %v958_v57 = vld [vmem:[%s5922_s5] sm:$0xff]  ;;  %6008 = vst [vmem:[#allocation20_spill] sm:$0xff] %v5088_v48 }
 0x111   :  { %6000 = vst [vmem:[#allocation12_spill] sm:$0xff] %v4978_v52 }
 0x112   :  { %v994_v61 = vsel %vm989_vm0, %v971_v30, 0  ;;  %1299 = vmatpush.bf16.msra.mxu1 %v4981_v54 }
 0x113   :  { %1022 = vmatpush.bf16.msrb.mxu3 %v994_v61 }
 0x116   :  { %3269 = vmatmul.msk.bf16.vlgmr.msrb.gmra.mxu3 %vm982_vm1, %v4735_v11  ;;  %v4868_v11 = vor.u32 %v3774_v7, %v3289_v6  ;;  %v5010_v7 = vor.u32 %v3790_v2, %v3353_v1  ;;  %1300 = vmatpush.bf16.msra.mxu1 %v5021_v8  ;;  %v5118_v1 = vld [vmem:[%s5929_s12] sm:$0xff] }
 0x117   :  { %1257 = vmatpush.bf16.msra.mxu3 %v4824_v60  ;;  %6012 = vst [vmem:[#allocation24_spill] sm:$0xff] %v5118_v1 }
 0x118   :  { %1243 = vmatpush.bf16.msra.mxu2 %v4868_v11  ;;  %6003 = vst [vmem:[#allocation15_spill] sm:$0xff] %v5010_v7 }
 0x11b   :  { %1258 = vmatpush.bf16.msra.mxu3 %v4879_v15 }
 0x11f   :  { %1259 = vmatpush.bf16.msra.mxu3 %v4908_v23 }
 0x123   :  { %1260 = vmatpush.bf16.msra.mxu3 %v4951_v42 }
 0x126   :  { %3270 = vmatmul.msk.bf16.gmra.mxu3 %vm982_vm1, %v4742_v18  ;;  %v3281_v18 = vld [vmem:[%s5925_s8 + $0x10] sm:$0xf] }
 0x127   :  { %v4906_v22 = vor.u32 %v3772_v19, %v3281_v18  ;;  %1261 = vmatpush.bf16.msra.mxu3 %v4978_v52  ;;  %v5030_v18 = vor.u32 %v3788_v14, %v3345_v13  ;;  %v5033_v19 = vor.u32 %v3787_v9, %v3347_v17  ;;  %v5130_v13 = vld [vmem:[%s5929_s12 + $0x78] sm:$0xff]  ;;  %v5136_v14 = vld [vmem:[%s5929_s12 + $0x70] sm:$0xff]  ;;  %v5142_v17 = vld [vmem:[%s5929_s12 + $0x68] sm:$0xff] }
 0x128   :  { %6015 = vst [vmem:[#allocation27_spill] sm:$0xff] %v5130_v13 }
 0x129   :  { %1244 = vmatpush.bf16.msra.mxu2 %v4906_v22  ;;  %6004 = vst [vmem:[#allocation16_spill] sm:$0xff] %v5030_v18  ;;  %1301 = vmatpush.bf16.msra.mxu1 %v5033_v19 }
 0x12a   :  { %6016 = vst [vmem:[#allocation28_spill] sm:$0xff] %v5136_v14 }
 0x12b   :  { %1262 = vmatpush.bf16.msra.mxu3 %v5010_v7  ;;  %6017 = vst [vmem:[#allocation29_spill] sm:$0xff] %v5142_v17 }
 0x12d   :  { %1245 = vmatpush.bf16.msra.mxu2 %v4940_v34  ;;  %1302 = vmatpush.bf16.msra.mxu1 %v5061_v38 }
 0x12f   :  { %1263 = vmatpush.bf16.msra.mxu3 %v5030_v18 }
 0x131   :  { %1788 = vmatpush.bf16.msrb.mxu1 %v5070_v44 }
 0x133   :  { %1264 = vmatpush.bf16.msra.mxu3 %v5054_v31 }
 0x135   :  { %1789 = vmatpush.bf16.msrb.mxu1 %v5076_v45 }
 0x139   :  { %1790 = vmatpush.bf16.msrb.mxu1 %v5082_v46 }
 0x13d   :  { %1791 = vmatpush.bf16.msrb.mxu1 %v5088_v48 }
 0x141   :  { %1792 = vmatpush.bf16.msrb.mxu1 %v5094_v50 }
 0x145   :  { %1793 = vmatpush.bf16.msrb.mxu1 %v5100_v51 }
 0x160   :  { %v1005_v55 = vpop.f32.mrf.mxu2 }
 0x161   :  { %v4991_v59 = vadd.f32 %v1005_v55, %v958_v57  ;;  %v5106_v57 = vld [vmem:[%s5929_s12 + $0x8] sm:$0xff] }
 0x162   :  { %6011 = vst [vmem:[#allocation23_spill] sm:$0xff] %v5106_v57  ;;  %1794 = vmatpush.bf16.msrb.mxu1 %v5106_v57 }
 0x163   :  { %6001 = vst [vmem:[#allocation13_spill] sm:$0xff] %v4991_v59 }
 0x166   :  { %1795 = vmatpush.bf16.msrb.mxu1 %v5118_v1 }
 0x168   :  { %v1007_v30 = vpop.f32.mrf.mxu2 }
 0x169   :  { %v4993_v61 = vadd.f32 %v1007_v30, %v960_v58  ;;  %v959_v58 = vld [vmem:[%s5922_s5 + $0x8] sm:$0xff]  ;;  %v961_v30 = vld [vmem:[%s5922_s5 + $0x18] sm:$0xff] }
 0x16b   :  { %6002 = vst [vmem:[#allocation14_spill] sm:$0xff] %v4993_v61  ;;  %v4997_v0 = vpack.c.bf16 %v4993_v61, %v4991_v59 }
 0x16d   :  { %1246 = vmatmul.bf16.vlgmr.msra.gmra.mxu2 %v4997_v0  ;;  %1284 = vmatmul.bf16.vlgmr.msra.gmra.mxu0 %v4997_v0 }
 0x170   :  { %v1010_v6 = vpop.f32.mrf.mxu2 }
 0x171   :  { %v5042_v12 = vadd.f32 %v1010_v6, %v962_v20  ;;  %v963_v20 = vld [vmem:[%s5922_s5 + $0x28] sm:$0xff] }
 0x173   :  { %6005 = vst [vmem:[#allocation17_spill] sm:$0xff] %v5042_v12 }
 0x178   :  { %v1012_v29 = vpop.f32.mrf.mxu2 }
 0x179   :  { %v5059_v35 = vadd.f32 %v1012_v29, %v964_v21  ;;  %v965_v21 = vld [vmem:[%s5922_s5 + $0x38] sm:$0xff] }
 0x17b   :  { %6007 = vst [vmem:[#allocation19_spill] sm:$0xff] %v5059_v35  ;;  %v1044_v39 = vpack.c.bf16 %v5059_v35, %v5042_v12 }
 0x17d   :  { %1251 = vmatmul.bf16.gmra.mxu2 %v1044_v39  ;;  %1289 = vmatmul.bf16.gmra.mxu0 %v1044_v39 }
 0x199   :  { %v1024_v55 = vpop.f32.mrf.mxu3 }
 0x19a   :  { %v5120_v3 = vadd.f32 %v1024_v55, %v959_v58  ;;  %v5166_v55 = vld [vmem:[%s5929_s12 + $0x58] sm:$0xff]  ;;  %v5172_v58 = vld [vmem:[%s5929_s12 + $0x50] sm:$0xff] }
 0x19b   :  { %6021 = vst [vmem:[#allocation33_spill] sm:$0xff] %v5166_v55 }
 0x19c   :  { %6013 = vst [vmem:[#allocation25_spill] sm:$0xff] %v5120_v3 }
 0x19d   :  { %6022 = vst [vmem:[#allocation34_spill] sm:$0xff] %v5172_v58 }
 0x1a1   :  { %v1026_v2 = vpop.f32.mrf.mxu3 }
 0x1a2   :  { %v5122_v6 = vadd.f32 %v1026_v2, %v961_v30  ;;  %v5178_v30 = vld [vmem:[%s5929_s12 + $0x48] sm:$0xff]  ;;  %v5184_v2 = vld [vmem:[%s5929_s12 + $0x40] sm:$0xff] }
 0x1a3   :  { %6023 = vst [vmem:[#allocation35_spill] sm:$0xff] %v5178_v30 }
 0x1a4   :  { %6014 = vst [vmem:[#allocation26_spill] sm:$0xff] %v5122_v6  ;;  %v1043_v10 = vpack.c.bf16 %v5122_v6, %v5120_v3 }
 0x1a5   :  { %6024 = vst [vmem:[#allocation36_spill] sm:$0xff] %v5184_v2 }
 0x1a6   :  { %1265 = vmatmul.bf16.vlgmr.msra.gmra.mxu3 %v1043_v10  ;;  %1303 = vmatmul.bf16.vlgmr.msra.gmra.mxu1 %v1043_v10 }
 0x1a7   :  { %1807 = vmatpush.bf16.msra.mxu1 %v5130_v13 }
 0x1a9   :  { %v1029_v9 = vpop.f32.mrf.mxu3 }
 0x1aa   :  { %v5156_v27 = vadd.f32 %v1029_v9, %v963_v20 }
 0x1ab   :  { %1808 = vmatpush.bf16.msra.mxu1 %v5136_v14 }
 0x1ac   :  { %6019 = vst [vmem:[#allocation31_spill] sm:$0xff] %v5156_v27 }
 0x1af   :  { %1809 = vmatpush.bf16.msra.mxu1 %v5142_v17 }
 0x1b1   :  { %v1031_v25 = vpop.f32.mrf.mxu3 }
 0x1b2   :  { %v5158_v29 = vadd.f32 %v1031_v25, %v965_v21  ;;  %v5191_v25 = vld [vmem:[%s5924_s7] sm:$0xff] }
 0x1b3   :  { %1810 = vmatpush.bf16.msra.mxu1 %v5154_v24  ;;  %6025 = vst [vmem:[#allocation37_spill] sm:$0xff] %v5191_v25  ;;  %1832 = vxpose.xlu0.c.b16.start [1/6] (short) (narrow) %v5191_v25, 32 }
 0x1b4   :  { %6020 = vst [vmem:[#allocation32_spill] sm:$0xff] %v5158_v29  ;;  %v1045_v33 = vpack.c.bf16 %v5158_v29, %v5156_v27 }
 0x1b6   :  { %1270 = vmatmul.bf16.gmra.mxu3 %v1045_v33  ;;  %1308 = vmatmul.bf16.gmra.mxu1 %v1045_v33 }
 0x1b7   :  { %1811 = vmatpush.bf16.msra.mxu1 %v5166_v55 }
 0x1bb   :  { %1812 = vmatpush.bf16.msra.mxu1 %v5172_v58 }
 0x1bf   :  { %1813 = vmatpush.bf16.msra.mxu1 %v5178_v30 }
 0x1c3   :  { %1814 = vmatpush.bf16.msra.mxu1 %v5184_v2 }
 0x1c6   :  { %1796 = vmatmul.bf16.vlgmr.msrb.gmra.mxu1 %v4997_v0 }
 0x1d6   :  { %1801 = vmatmul.bf16.gmra.mxu1 %v1044_v39  ;;  %v5197_v39 = vld [vmem:[%s5924_s7 + $0x8] sm:$0xff] }
 0x1d7   :  { %6026 = vst [vmem:[#allocation38_spill] sm:$0xff] %v5197_v39  ;;  %1833 = vxpose.xlu0.c.b16.cont [2/6] (short) (narrow) %v5197_v39, 32 }
 0x1e6   :  { %1815 = vmatmul.bf16.vlgmr.msra.gmra.mxu1 %v1043_v10 }
 0x1ea   :  { %v1285_v9 = vpop.f32.mrf.mxu0 }
 0x1f0   :  { %v1247_v20 = vpop.f32.mrf.mxu2 }
 0x1f2   :  { %v1287_v30 = vpop.f32.mrf.mxu0 }
 0x1f6   :  { %1820 = vmatmul.bf16.gmra.mxu1 %v1045_v33 }
 0x1f8   :  { %v1249_v24 = vpop.f32.mrf.mxu2 }
 0x1fa   :  { %v1290_v2 = vpop.f32.mrf.mxu0 }
 0x200   :  { %v1252_v10 = vpop.f32.mrf.mxu2 }
 0x202   :  { %v1292_v29 = vpop.f32.mrf.mxu0 }
 0x208   :  { %v1254_v61 = vpop.f32.mrf.mxu2 }
 0x223   :  { %v1304_v21 = vpop.f32.mrf.mxu1 }
 0x224   :  { %v1305_v6 = vadd.f32 %v1304_v21, %v1285_v9  ;;  %v5311_v21 = vld [vmem:[%s5926_s9] ss:$0 sm:$0xff] }
 0x225   :  { %6037 = vst [vmem:[#allocation49_spill] sm:$0xff] %v5311_v21 }
 0x229   :  { %v1266_v58 = vpop.f32.mrf.mxu3 }
 0x22a   :  { %v1267_v48 = vadd.f32 %v1266_v58, %v1247_v20 }
 0x22b   :  { %v1306_v55 = vpop.f32.mrf.mxu1 }
 0x22c   :  { %v1307_v14 = vadd.f32 %v1306_v55, %v1287_v30  ;;  %v5299_v55 = vld [vmem:[#allocation2] sm:$0xff] }
 0x22e   :  { %v1316_v59 = vpack.c.bf16 %v1307_v14, %v1305_v6  ;;  %v5271_v6 = vld [vmem:[%s5923_s6 + $0x20] sm:$0xff]  ;;  %v5284_v14 = vld [vmem:[#allocation2 + $0x28] sm:$0xff] }
 0x22f   :  { %6035 = vst [vmem:[#allocation47_spill] sm:$0xff] %v5271_v6 }
 0x231   :  { %v1268_v17 = vpop.f32.mrf.mxu3 }
 0x232   :  { %v1269_v51 = vadd.f32 %v1268_v17, %v1249_v24  ;;  %v5287_v17 = vld [vmem:[#allocation2 + $0x20] sm:$0xff]  ;;  %v5290_v24 = vld [vmem:[#allocation2 + $0x18] sm:$0xff] }
 0x233   :  { %v1309_v0 = vpop.f32.mrf.mxu1 }
 0x234   :  { %v1310_v27 = vadd.f32 %v1309_v0, %v1290_v2  ;;  %v5203_v2 = vld [vmem:[%s5924_s7 + $0x10] sm:$0xff] }
 0x235   :  { %6027 = vst [vmem:[#allocation39_spill] sm:$0xff] %v5203_v2  ;;  %1834 = vxpose.xlu0.c.b16.cont [3/6] (short) (narrow) %v5203_v2, 32 }
 0x239   :  { %v1271_v33 = vpop.f32.mrf.mxu3 }
 0x23a   :  { %v1272_v1 = vadd.f32 %v1271_v33, %v1252_v10 }
 0x23b   :  { %v1311_v35 = vpop.f32.mrf.mxu1 }
 0x23c   :  { %v1312_v12 = vadd.f32 %v1311_v35, %v1292_v29  ;;  %v5226_v35 = vld [vmem:[%s5923_s6 + $0x8] sm:$0xff] }
 0x23d   :  { %6030 = vst [vmem:[#allocation42_spill] sm:$0xff] %v5226_v35  ;;  %v5296_v29 = vld [vmem:[#allocation2 + $0x8] sm:$0xff] }
 0x23e   :  { %v1317_v13 = vpack.c.bf16 %v1312_v12, %v1310_v27  ;;  %v1314_v12 = vpack.c.bf16 %v1269_v51, %v1267_v48  ;;  %v5233_v48 = vld [vmem:[%s5924_s7 + $0x20] sm:$0xff]  ;;  %v5248_v51 = vld [vmem:[%s5924_s7 + $0x28] sm:$0xff]  ;;  %v5293_v27 = vld [vmem:[#allocation2 + $0x10] sm:$0xff] }
 0x23f   :  { %6031 = vst [vmem:[#allocation43_spill] sm:$0xff] %v5233_v48 }
 0x240   :  { %1397 = vmatpush.bf16.msrb.mxu2 %v1317_v13  ;;  %6033 = vst [vmem:[#allocation45_spill] sm:$0xff] %v5248_v51  ;;  %v5280_v13 = vld [vmem:[%s5923_s6 + $0x28] sm:$0xff] }
 0x241   :  { %v1273_v3 = vpop.f32.mrf.mxu3  ;;  %6036 = vst [vmem:[#allocation48_spill] sm:$0xff] %v5280_v13 }
 0x242   :  { %v1274_v57 = vadd.f32 %v1273_v3, %v1254_v61  ;;  %v5211_v61 = vld [vmem:[%s5923_s6] sm:$0xff]  ;;  %v5263_v3 = vld [vmem:[#allocation2 + $0x30] sm:$0xff] }
 0x243   :  { %6028 = vst [vmem:[#allocation40_spill] sm:$0xff] %v5211_v61 }
 0x244   :  { %v1315_v50 = vpack.c.bf16 %v1274_v57, %v1272_v1  ;;  %1398 = vmatpush.bf16.msrb.mxu2 %v1316_v59  ;;  %v5218_v59 = vld [vmem:[%s5924_s7 + $0x18] sm:$0xff] }
 0x245   :  { %6029 = vst [vmem:[#allocation41_spill] sm:$0xff] %v5218_v59  ;;  %1835 = vxpose.xlu0.c.b16.cont [4/6] (short) (narrow) %v5218_v59, 32  ;;  %v5256_v57 = vld [vmem:[%s5923_s6 + $0x18] sm:$0xff] }
 0x246   :  { %1484 = vmatpush.bf16.msrb.mxu3 %v1315_v50  ;;  %v5241_v50 = vld [vmem:[%s5923_s6 + $0x10] sm:$0xff]  ;;  %6034 = vst [vmem:[#allocation46_spill] sm:$0xff] %v5256_v57  ;;  %v5260_v1 = vld [vmem:[#allocation2 + $0x38] sm:$0xff] }
 0x247   :  { %3423 = vmatmul.msk.bf16.vlgmr.msrb.gmra.mxu2 %vm1372_vm2, %v5191_v25  ;;  %6032 = vst [vmem:[#allocation44_spill] sm:$0xff] %v5241_v50  ;;  %1615 = vmatpush.bf16.msrb.mxu0 %v5260_v1 }
 0x24a   :  { %1485 = vmatpush.bf16.msrb.mxu3 %v1314_v12 }
 0x24b   :  { %1616 = vmatpush.bf16.msrb.mxu0 %v5263_v3 }
 0x24d   :  { %3453 = vmatmul.msk.bf16.vlgmr.msrb.gmra.mxu3 %vm1372_vm2, %v5211_v61 }
 0x24f   :  { %1617 = vmatpush.bf16.msrb.mxu0 %v5284_v14 }
 0x253   :  { %1618 = vmatpush.bf16.msrb.mxu0 %v5287_v17 }
 0x255   :  { %1836 = vxpose.xlu0.c.b16.cont [5/6] (short) (narrow) %v5233_v48, 32 }
 0x257   :  { %3424 = vmatmul.msk.bf16.gmra.mxu2 %vm1372_vm2, %v5197_v39  ;;  %1619 = vmatpush.bf16.msrb.mxu0 %v5290_v24 }
 0x25b   :  { %1620 = vmatpush.bf16.msrb.mxu0 %v5293_v27 }
 0x25d   :  { %3454 = vmatmul.msk.bf16.gmra.mxu3 %vm1372_vm2, %v5226_v35 }
 0x25f   :  { %1621 = vmatpush.bf16.msrb.mxu0 %v5296_v29 }
 0x263   :  { %1622 = vmatpush.bf16.msrb.mxu0 %v5299_v55 }
 0x265   :  { %1837 = vxpose.xlu0.c.b16.end [6/6] (short) (narrow) %v5248_v51, 32 }
 0x267   :  { %3425 = vmatmul.msk.bf16.gmra.mxu2 %vm1372_vm2, %v5203_v2  ;;  %2048 = vmatpush.bf16.msra.mxu0 %v4755_v32 }
 0x26b   :  { %2049 = vmatpush.bf16.msra.mxu0 %v4775_v40 }
 0x26d   :  { %3455 = vmatmul.msk.bf16.gmra.mxu3 %vm1372_vm2, %v5241_v50 }
 0x26f   :  { %2050 = vmatpush.bf16.msra.mxu0 %v4796_v49 }
 0x273   :  { %2051 = vmatpush.bf16.msra.mxu0 %v4828_v37 }
 0x277   :  { %3426 = vmatmul.msk.bf16.gmra.mxu2 %vm1372_vm2, %v5218_v59  ;;  %2052 = vmatpush.bf16.msra.mxu0 %v4848_v4 }
 0x27b   :  { %2053 = vmatpush.bf16.msra.mxu0 %v4868_v11 }
 0x27d   :  { %3456 = vmatmul.msk.bf16.gmra.mxu3 %vm1372_vm2, %v5256_v57 }
 0x27f   :  { %2054 = vmatpush.bf16.msra.mxu0 %v4906_v22 }
 0x283   :  { %2055 = vmatpush.bf16.msra.mxu0 %v4940_v34 }
 0x287   :  { %3427 = vmatmul.msk.bf16.gmra.mxu2 %vm1372_vm2, %v5233_v48 }
 0x28d   :  { %3457 = vmatmul.msk.bf16.gmra.mxu3 %vm1372_vm2, %v5271_v6 }
 0x297   :  { %3428 = vmatmul.msk.bf16.gmra.mxu2 %vm1372_vm2, %v5248_v51 }
 0x29d   :  { %3458 = vmatmul.msk.bf16.gmra.mxu3 %vm1372_vm2, %v5280_v13 }
 0x2ca   :  { %v1400_v58 = vpop.f32.mrf.mxu2 }
 0x2d0   :  { %v1487_v30 = vpop.f32.mrf.mxu3 }
 0x2d1   :  { %v1488_v20 = vadd.f32 %v1487_v30, %v1400_v58 }
 0x2d2   :  { %v1402_v9 = vpop.f32.mrf.mxu2 }
 0x2d3   :  { %v1521_v10 = vadd.f32 %v5311_v21, %v1488_v20 }
 0x2d5   :  { %v1533_v13 = vmax.f32 %v1521_v10, 0.0 }
 0x2d8   :  { %v1489_v0 = vpop.f32.mrf.mxu3 }
 0x2d9   :  { %v1490_v33 = vadd.f32 %v1489_v0, %v1402_v9 }
 0x2da   :  { %v1405_v12 = vpop.f32.mrf.mxu2 }
 0x2db   :  { %v1522_v51 = vadd.f32 %v5311_v21, %v1490_v33 }
 0x2dd   :  { %v1534_v48 = vmax.f32 %v1522_v51, 0.0 }
 0x2df   :  { %v1545_v6 = vpack.c.bf16 %v1534_v48, %v1533_v13 }
 0x2e0   :  { %v1492_v58 = vpop.f32.mrf.mxu3 }
 0x2e1   :  { %1623 = vmatmul.bf16.vlgmr.msrb.gmra.mxu0 %v1545_v6  ;;  %v1493_v59 = vadd.f32 %v1492_v58, %v1405_v12 }
 0x2e2   :  { %v1407_v30 = vpop.f32.mrf.mxu2 }
 0x2e3   :  { %v1523_v2 = vadd.f32 %v5311_v21, %v1493_v59 }
 0x2e5   :  { %v1535_v9 = vmax.f32 %v1523_v2, 0.0 }
 0x2e8   :  { %v1494_v57 = vpop.f32.mrf.mxu3 }
 0x2e9   :  { %v1495_v50 = vadd.f32 %v1494_v57, %v1407_v30 }
 0x2ea   :  { %v1410_v39 = vpop.f32.mrf.mxu2 }
 0x2eb   :  { %v1524_v20 = vadd.f32 %v5311_v21, %v1495_v50 }
 0x2ed   :  { %v1536_v0 = vmax.f32 %v1524_v20, 0.0 }
 0x2ef   :  { %v1546_v35 = vpack.c.bf16 %v1536_v0, %v1535_v9 }
 0x2f0   :  { %v1497_v33 = vpop.f32.mrf.mxu3 }
 0x2f1   :  { %1628 = vmatmul.bf16.gmra.mxu0 %v1546_v35  ;;  %v1498_v10 = vadd.f32 %v1497_v33, %v1410_v39 }
 0x2f2   :  { %v1412_v25 = vpop.f32.mrf.mxu2 }
 0x2f3   :  { %v1525_v48 = vadd.f32 %v5311_v21, %v1498_v10 }
 0x2f5   :  { %v1537_v58 = vmax.f32 %v1525_v48, 0.0 }
 0x2f8   :  { %v1499_v51 = vpop.f32.mrf.mxu3 }
 0x2f9   :  { %v1500_v6 = vadd.f32 %v1499_v51, %v1412_v25 }
 0x2fa   :  { %v1415_v13 = vpop.f32.mrf.mxu2 }
 0x2fb   :  { %v1526_v12 = vadd.f32 %v5311_v21, %v1500_v6 }
 0x2fd   :  { %v1538_v59 = vmax.f32 %v1526_v12, 0.0 }
 0x2ff   :  { %v1547_v57 = vpack.c.bf16 %v1538_v59, %v1537_v58 }
 0x300   :  { %v1502_v30 = vpop.f32.mrf.mxu3 }
 0x301   :  { %1633 = vmatmul.bf16.gmra.mxu0 %v1547_v57  ;;  %v1503_v2 = vadd.f32 %v1502_v30, %v1415_v13 }
 0x302   :  { %v1417_v50 = vpop.f32.mrf.mxu2 }
 0x303   :  { %v1527_v9 = vadd.f32 %v5311_v21, %v1503_v2 }
 0x305   :  { %v1539_v33 = vmax.f32 %v1527_v9, 0.0 }
 0x308   :  { %v1504_v20 = vpop.f32.mrf.mxu3 }
 0x309   :  { %v1505_v35 = vadd.f32 %v1504_v20, %v1417_v50 }
 0x30a   :  { %v1420_v0 = vpop.f32.mrf.mxu2 }
 0x30b   :  { %v1528_v39 = vadd.f32 %v5311_v21, %v1505_v35 }
 0x30d   :  { %v1540_v10 = vmax.f32 %v1528_v39, 0.0 }
 0x30f   :  { %v1548_v25 = vpack.c.bf16 %v1540_v10, %v1539_v33 }
 0x310   :  { %v1507_v51 = vpop.f32.mrf.mxu3 }
 0x311   :  { %1638 = vmatmul.bf16.gmra.mxu0 %v1548_v25  ;;  %v1508_v48 = vadd.f32 %v1507_v51, %v1420_v0 }
 0x312   :  { %v1422_v6 = vpop.f32.mrf.mxu2 }
 0x313   :  { %v1529_v58 = vadd.f32 %v5311_v21, %v1508_v48 }
 0x315   :  { %v1541_v57 = vmax.f32 %v1529_v58, 0.0 }
 0x318   :  { %v1509_v12 = vpop.f32.mrf.mxu3 }
 0x319   :  { %v1510_v59 = vadd.f32 %v1509_v12, %v1422_v6 }
 0x31a   :  { %v1425_v2 = vpop.f32.mrf.mxu2 }
 0x31b   :  { %v1530_v13 = vadd.f32 %v5311_v21, %v1510_v59 }
 0x31d   :  { %v1542_v30 = vmax.f32 %v1530_v13, 0.0 }
 0x31f   :  { %v1549_v50 = vpack.c.bf16 %v1542_v30, %v1541_v57 }
 0x320   :  { %v1512_v20 = vpop.f32.mrf.mxu3 }
 0x321   :  { %1643 = vmatmul.bf16.gmra.mxu0 %v1549_v50  ;;  %v1513_v35 = vadd.f32 %v1512_v20, %v1425_v2 }
 0x322   :  { %v1427_v9 = vpop.f32.mrf.mxu2 }
 0x323   :  { %v1531_v33 = vadd.f32 %v5311_v21, %v1513_v35 }
 0x325   :  { %v1543_v25 = vmax.f32 %v1531_v33, 0.0  ;;  %v3615_v33 = vld [vmem:[%s5930_s13 + $0x70] sm:$0xf] }
 0x328   :  { %v1514_v39 = vpop.f32.mrf.mxu3 }
 0x329   :  { %v1515_v10 = vadd.f32 %v1514_v39, %v1427_v9 }
 0x32b   :  { %v1532_v0 = vadd.f32 %v5311_v21, %v1515_v10  ;;  %v3852_v10 = vld [vmem:[%s5930_s13 + $0x74] sm:$0xf0] }
 0x32d   :  { %v1544_v51 = vmax.f32 %v1532_v0, 0.0  ;;  %v3851_v0 = vld [vmem:[%s5930_s13 + $0x74] sm:$0xf] }
 0x32f   :  { %v1550_v48 = vpack.c.bf16 %v1544_v51, %v1543_v25  ;;  %v5336_v25 = vor.u32 %v3852_v10, %v3615_v33  ;;  %v3850_v51 = vld [vmem:[%s5930_s13 + $0x64] sm:$0xf0] }
 0x331   :  { %1648 = vmatmul.bf16.gmra.mxu0 %v1550_v48  ;;  %1984 = vmatpush.bf16.msra.mxu2 %v5336_v25 }
 0x35e   :  { %v1624_v6 = vpop.f32.mrf.mxu0 }
 0x366   :  { %v1626_v12 = vpop.f32.mrf.mxu0 }
 0x36e   :  { %v1629_v58 = vpop.f32.mrf.mxu0 }
 0x376   :  { %v1631_v59 = vpop.f32.mrf.mxu0 }
 0x377   :  { %v1655_v33 = vpack.c.bf16 %v1631_v59, %v1629_v58  ;;  %v3845_v58 = vld [vmem:[%s5930_s13 + $0x44] sm:$0xf]  ;;  %v3593_v59 = vld [vmem:[%s5930_s13 + $0x48] sm:$0xf0] }
 0x37e   :  { %v1634_v13 = vpop.f32.mrf.mxu0 }
 0x386   :  { %v1636_v57 = vpop.f32.mrf.mxu0 }
 0x38e   :  { %v1639_v30 = vpop.f32.mrf.mxu0 }
 0x396   :  { %v1641_v50 = vpop.f32.mrf.mxu0 }
 0x397   :  { %v1657_v39 = vpack.c.bf16 %v1641_v50, %v1639_v30  ;;  %v3849_v30 = vld [vmem:[%s5930_s13 + $0x64] sm:$0xf]  ;;  %v3609_v50 = vld [vmem:[%s5930_s13 + $0x68] sm:$0xf0] }
 0x39e   :  { %v1644_v2 = vpop.f32.mrf.mxu0 }
 0x3a6   :  { %v1646_v20 = vpop.f32.mrf.mxu0 }
 0x3a7   :  { %v1658_v9 = vpack.c.bf16 %v1646_v20, %v1644_v2  ;;  %v1656_v2 = vpack.c.bf16 %v1636_v57, %v1634_v13  ;;  %v3847_v13 = vld [vmem:[%s5930_s13 + $0x54] sm:$0xf]  ;;  %v3601_v57 = vld [vmem:[%s5930_s13 + $0x58] sm:$0xf0] }
 0x3ae   :  { %v1649_v61 = vpop.f32.mrf.mxu0 }
 0x3b6   :  { %v1651_v34 = vpop.f32.mrf.mxu0 }
 0x3b7   :  { %v1659_v35 = vpack.c.bf16 %v1651_v34, %v1649_v61  ;;  %v3617_v34 = vld [vmem:[%s5930_s13 + $0x78] sm:$0xf0]  ;;  %v3607_v61 = vld [vmem:[%s5930_s13 + $0x60] sm:$0xf] }
 0x3b8   :  { %v5347_v48 = vor.u32 %v3851_v0, %v3617_v34  ;;  %v5356_v20 = vor.u32 %v3850_v51, %v3607_v61  ;;  %v5377_v0 = vor.u32 %v3847_v13, %v3601_v57  ;;  %v3591_v34 = vld [vmem:[%s5930_s13 + $0x40] sm:$0xf]  ;;  %v3846_v61 = vld [vmem:[%s5930_s13 + $0x44] sm:$0xf0]  ;;  %v1654_v51 = vpack.c.bf16 %v1626_v12, %v1624_v6  ;;  %v1797_v12 = vpop.f32.mrf.mxu1 }
 0x3b9   :  { %1857 = vmatpush.bf16.msrb.mxu1 %v1659_v35  ;;  %v5359_v35 = vor.u32 %v3849_v30, %v3609_v50  ;;  %v5392_v30 = vor.u32 %v3846_v61, %v3591_v34  ;;  %v5395_v50 = vor.u32 %v3845_v58, %v3593_v59  ;;  %v3844_v34 = vld [vmem:[%s5930_s13 + $0x34] sm:$0xf0]  ;;  %v3843_v61 = vld [vmem:[%s5930_s13 + $0x34] sm:$0xf]  ;;  %v3585_v59 = vld [vmem:[%s5930_s13 + $0x38] sm:$0xf0] }
 0x3ba   :  { %2003 = vmatpush.bf16.msra.mxu3 %v5347_v48  ;;  %1985 = vmatpush.bf16.msra.mxu2 %v5356_v20 }
 0x3bd   :  { %1858 = vmatpush.bf16.msrb.mxu1 %v1658_v9  ;;  %v3599_v9 = vld [vmem:[%s5930_s13 + $0x50] sm:$0xf] }
 0x3be   :  { %2004 = vmatpush.bf16.msra.mxu3 %v5359_v35 }
 0x3c1   :  { %1859 = vmatpush.bf16.msrb.mxu1 %v1657_v39  ;;  %v3848_v39 = vld [vmem:[%s5930_s13 + $0x54] sm:$0xf0] }
 0x3c2   :  { %v5374_v10 = vor.u32 %v3848_v39, %v3599_v9  ;;  %2005 = vmatpush.bf16.msra.mxu3 %v5377_v0  ;;  %v1799_v9 = vpop.f32.mrf.mxu1 }
 0x3c4   :  { %1986 = vmatpush.bf16.msra.mxu2 %v5374_v10 }
 0x3c5   :  { %1860 = vmatpush.bf16.msrb.mxu1 %v1656_v2  ;;  %v5397_v2 = vpop.trf.xlu0 }
 0x3c6   :  { %6038 = vst [vmem:[#allocation50_spill] sm:$0xff] %v5397_v2  ;;  %2006 = vmatpush.bf16.msra.mxu3 %v5395_v50 }
 0x3c8   :  { %1987 = vmatpush.bf16.msra.mxu2 %v5392_v30 }
 0x3c9   :  { %1861 = vmatpush.bf16.msrb.mxu1 %v1655_v33  ;;  %v3583_v33 = vld [vmem:[%s5930_s13 + $0x30] sm:$0xf] }
 0x3ca   :  { %v5415_v39 = vpop.f32.mrf.mxu1  ;;  %v5428_v58 = vor.u32 %v3844_v34, %v3583_v33  ;;  %v3842_v33 = vld [vmem:[%s5930_s13 + $0x24] sm:$0xf0]  ;;  %v3841_v34 = vld [vmem:[%s5930_s13 + $0x24] sm:$0xf] }
 0x3cc   :  { %1988 = vmatpush.bf16.msra.mxu2 %v5428_v58 }
 0x3cd   :  { %1862 = vmatpush.bf16.msrb.mxu1 %v1654_v51  ;;  %v5407_v6 = vpop.trf.xlu0  ;;  %v5433_v51 = vor.u32 %v3843_v61, %v3585_v59  ;;  %v3577_v61 = vld [vmem:[%s5930_s13 + $0x28] sm:$0xf0] }
 0x3ce   :  { %6039 = vst [vmem:[#allocation51_spill] sm:$0xff] %v5407_v6  ;;  %v5451_v59 = vor.u32 %v3841_v34, %v3577_v61  ;;  %v3569_v34 = vld [vmem:[%s5930_s13 + $0x18] sm:$0xf0] }
 0x3cf   :  { %2007 = vmatpush.bf16.msra.mxu3 %v5433_v51 }
 0x3d0   :  { %3555 = vmatmul.msk.bf16.vlgmr.msrb.gmra.mxu1 %vm1848_vm3, %v5397_v2  ;;  %v5506_v2 = vld [vmem:[%s5928_s11] sm:$0xff] }
 0x3d1   :  { %2067 = vmatpush.bf16.msra.mxu1 %v4824_v60 }
 0x3d2   :  { %v5417_v13 = vpop.f32.mrf.mxu1 }
 0x3d3   :  { %2008 = vmatpush.bf16.msra.mxu3 %v5451_v59 }
 0x3d5   :  { %2068 = vmatpush.bf16.msra.mxu1 %v4879_v15 }
 0x3d9   :  { %2069 = vmatpush.bf16.msra.mxu1 %v4908_v23  ;;  %v3838_v23 = vld [vmem:[%s5930_s13 + $0x4] sm:$0xf0] }
 0x3da   :  { %v1816_v57 = vpop.f32.mrf.mxu1 }
 0x3dd   :  { %2070 = vmatpush.bf16.msra.mxu1 %v4951_v42  ;;  %v3559_v42 = vld [vmem:[%s5930_s13] sm:$0xf] }
 0x3e0   :  { %3556 = vmatmul.msk.bf16.gmra.mxu1 %vm1848_vm3, %v5407_v6  ;;  %v3567_v6 = vld [vmem:[%s5930_s13 + $0x10] sm:$0xf] }
 0x3e1   :  { %2071 = vmatpush.bf16.msra.mxu1 %v4978_v52  ;;  %v3840_v52 = vld [vmem:[%s5930_s13 + $0x14] sm:$0xf0] }
 0x3e5   :  { %2072 = vmatpush.bf16.msra.mxu1 %v5010_v7 }
 0x3e9   :  { %2073 = vmatpush.bf16.msra.mxu1 %v5030_v18  ;;  %v3575_v18 = vld [vmem:[%s5930_s13 + $0x20] sm:$0xf] }
 0x3ea   :  { %v5446_v7 = vor.u32 %v3842_v33, %v3575_v18  ;;  %v3839_v18 = vld [vmem:[%s5930_s13 + $0x14] sm:$0xf]  ;;  %v5464_v33 = vor.u32 %v3840_v52, %v3567_v6  ;;  %v3837_v52 = vld [vmem:[%s5930_s13 + $0x4] sm:$0xf]  ;;  %v5482_v6 = vor.u32 %v3838_v23, %v3559_v42 }
 0x3eb   :  { %v5469_v61 = vor.u32 %v3839_v18, %v3569_v34  ;;  %v3561_v18 = vld [vmem:[%s5930_s13 + $0x8] sm:$0xf0] }
 0x3ec   :  { %1989 = vmatpush.bf16.msra.mxu2 %v5446_v7  ;;  %v5487_v15 = vor.u32 %v3837_v52, %v3561_v18  ;;  %v1817_v52 = vadd.f32 %v1816_v57, %v1797_v12 }
 0x3ed   :  { %2074 = vmatpush.bf16.msra.mxu1 %v5054_v31  ;;  %v1818_v31 = vpop.f32.mrf.mxu1  ;;  %2009 = vmatpush.bf16.msra.mxu3 %v5469_v61 }
 0x3ee   :  { %v1819_v60 = vadd.f32 %v1818_v31, %v1799_v9 }
 0x3f0   :  { %1990 = vmatpush.bf16.msra.mxu2 %v5464_v33 }
 0x3f1   :  { %2010 = vmatpush.bf16.msra.mxu3 %v5487_v15 }
 0x3f4   :  { %1991 = vmatpush.bf16.msra.mxu2 %v5482_v6 }
 0x3f5   :  { %v1821_v34 = vpop.f32.mrf.mxu1  ;;  %2105 = vmatpush.bf16.msrb.mxu3 %v4816_v56 }
 0x3f8   :  { %2086 = vmatpush.bf16.msrb.mxu2 %v4766_v36 }
 0x3f9   :  { %2106 = vmatpush.bf16.msrb.mxu3 %v4893_v62 }
 0x3fc   :  { %2087 = vmatpush.bf16.msrb.mxu2 %v4778_v41 }
 0x3fd   :  { %v1823_v23 = vpop.f32.mrf.mxu1  ;;  %2107 = vmatpush.bf16.msrb.mxu3 %v4925_v28 }
 0x400   :  { %2088 = vmatpush.bf16.msrb.mxu2 %v4808_v53 }
 0x401   :  { %2108 = vmatpush.bf16.msrb.mxu3 %v4965_v47 }
 0x404   :  { %2089 = vmatpush.bf16.msrb.mxu2 %v4832_v63  ;;  %v5511_v63 = vld [vmem:[%s5928_s11 + $0x8] sm:$0xff] }
 0x405   :  { %2109 = vmatpush.bf16.msrb.mxu3 %v4981_v54 }
 0x408   :  { %2090 = vmatpush.bf16.msrb.mxu2 %v4853_v5 }
 0x409   :  { %2110 = vmatpush.bf16.msrb.mxu3 %v5021_v8 }
 0x40c   :  { %2091 = vmatpush.bf16.msrb.mxu2 %v4881_v16 }
 0x40d   :  { %2111 = vmatpush.bf16.msrb.mxu3 %v5033_v19 }
 0x410   :  { %2092 = vmatpush.bf16.msrb.mxu2 %v4920_v26 }
 0x411   :  { %2112 = vmatpush.bf16.msrb.mxu3 %v5061_v38 }
 0x414   :  { %2093 = vmatpush.bf16.msrb.mxu2 %v4953_v43 }
 0x44d   :  { %v1864_v42 = vpop.f32.mrf.mxu1 }
 0x44e   :  { %v1865_v18 = vadd.f32 %v1864_v42, %v1817_v52 }
 0x450   :  { %v1878_v12 = vadd.f32 %v5506_v2, %v1865_v18  ;;  %v5525_v18 = vld [vmem:[%s5928_s11 + $0x10] sm:$0xff] }
 0x452   :  { %v1882_v52 = vmax.f32 %v1878_v12, 0.0 }
 0x455   :  { %v1866_v21 = vpop.f32.mrf.mxu1 }
 0x456   :  { %v1867_v57 = vadd.f32 %v1866_v21, %v1819_v60  ;;  %v1822_v60 = vadd.f32 %v1821_v34, %v5415_v39 }
 0x458   :  { %v1879_v42 = vadd.f32 %v5511_v63, %v1867_v57 }
 0x45a   :  { %v1883_v16 = vmax.f32 %v1879_v42, 0.0  ;;  %v6042_v42 = vld [vmem:[#allocation22_spill] sm:$0xff] }
 0x45c   :  { %v1886_v31 = vpack.c.bf16 %v1883_v16, %v1882_v52  ;;  %v1824_v16 = vadd.f32 %v1823_v23, %v5417_v13  ;;  %v6041_v23 = vld [vmem:[#allocation21_spill] sm:$0xff] }
 0x45d   :  { %v1869_v9 = vpop.f32.mrf.mxu1 }
 0x45e   :  { %1992 = vmatmul.bf16.vlgmr.msra.gmra.mxu2 %v1886_v31  ;;  %2011 = vmatmul.bf16.vlgmr.msra.gmra.mxu3 %v1886_v31  ;;  %v1870_v21 = vadd.f32 %v1869_v9, %v1822_v60  ;;  %v2030_v31 = vld [vmem:[%s5931_s14] sm:$0x3] }
 0x45f   :  { %2281 = vmatpush.bf16.msra.mxu3 %v5070_v44  ;;  %2236 = vmatpush.bf16.msra.mxu2 %v5260_v1  ;;  %v5533_v44 = vld [vmem:[%s5928_s11 + $0x18] sm:$0xff]  ;;  %v6045_v9 = vld [vmem:[#allocation13_spill] sm:$0xff]  ;;  %v5553_v60 = vperm.slane %v2030_v31, 0 }
 0x460   :  { %v1880_v1 = vadd.f32 %v5525_v18, %v1870_v21  ;;  %v6047_v21 = vld [vmem:[#allocation25_spill] sm:$0xff] }
 0x463   :  { %2282 = vmatpush.bf16.msra.mxu3 %v5076_v45  ;;  %2237 = vmatpush.bf16.msra.mxu2 %v5263_v3  ;;  %v1884_v45 = vmax.f32 %v1880_v1, 0.0  ;;  %v6040_v3 = vld [vmem:[#allocation20_spill] sm:$0xff]  ;;  %v6049_v1 = vld [vmem:[#allocation14_spill] sm:$0xff] }
 0x464   :  { %6046 = vst [vmem:[#allocation20_spill] sm:$0xff] %v5553_v60 }
 0x465   :  { %v1871_v12 = vpop.f32.mrf.mxu1 }
 0x466   :  { %v1872_v39 = vadd.f32 %v1871_v12, %v1824_v16  ;;  %v5556_v16 = vperm.slane %v2030_v31, 1  ;;  %v6055_v31 = vld [vmem:[#allocation17_spill] sm:$0xff] }
 0x467   :  { %2283 = vmatpush.bf16.msra.mxu3 %v5082_v46  ;;  %2238 = vmatpush.bf16.msra.mxu2 %v5284_v14  ;;  %v6043_v46 = vld [vmem:[#allocation23_spill] sm:$0xff]  ;;  %v6044_v14 = vld [vmem:[#allocation24_spill] sm:$0xff] }
 0x468   :  { %v1881_v34 = vadd.f32 %v5533_v44, %v1872_v39  ;;  %6048 = vst [vmem:[#allocation21_spill] sm:$0xff] %v5556_v16 }
 0x46a   :  { %v1885_v57 = vmax.f32 %v1881_v34, 0.0  ;;  %v6050_v34 = vld [vmem:[#allocation26_spill] sm:$0xff] }
 0x46b   :  { %2284 = vmatpush.bf16.msra.mxu3 %v6040_v3  ;;  %2239 = vmatpush.bf16.msra.mxu2 %v5287_v17 }
 0x46c   :  { %v1887_v13 = vpack.c.bf16 %v1885_v57, %v1884_v45 }
 0x46e   :  { %1997 = vmatmul.bf16.gmra.mxu2 %v1887_v13  ;;  %2016 = vmatmul.bf16.gmra.mxu3 %v1887_v13 }
 0x46f   :  { %2285 = vmatpush.bf16.msra.mxu3 %v6041_v23  ;;  %2240 = vmatpush.bf16.msra.mxu2 %v5290_v24 }
 0x473   :  { %2286 = vmatpush.bf16.msra.mxu3 %v6042_v42  ;;  %2241 = vmatpush.bf16.msra.mxu2 %v5293_v27 }
 0x477   :  { %2287 = vmatpush.bf16.msra.mxu3 %v6043_v46  ;;  %2242 = vmatpush.bf16.msra.mxu2 %v5296_v29 }
 0x47b   :  { %2288 = vmatpush.bf16.msra.mxu3 %v6044_v14  ;;  %2243 = vmatpush.bf16.msra.mxu2 %v5299_v55 }
 0x4e1   :  { %v1993_v17 = vpop.f32.mrf.mxu2  ;;  %v2012_v52 = vpop.f32.mrf.mxu3 }
 0x4e2   :  { %v2022_v24 = vadd.f32 %v1993_v17, %v6045_v9  ;;  %v2023_v27 = vadd.f32 %v2012_v52, %v6047_v21  ;;  %v6053_v17 = vld [vmem:[#allocation27_spill] sm:$0xff]  ;;  %v6054_v52 = vld [vmem:[#allocation28_spill] sm:$0xff] }
 0x4e4   :  { %v5561_v45 = vadd.f32 %v5553_v60, %v2022_v24  ;;  %v5564_v57 = vadd.f32 %v5556_v16, %v2023_v27  ;;  %v6056_v24 = vld [vmem:[#allocation31_spill] sm:$0xff] }
 0x4e9   :  { %v1995_v12 = vpop.f32.mrf.mxu2  ;;  %v2014_v29 = vpop.f32.mrf.mxu3 }
 0x4ea   :  { %v2024_v39 = vadd.f32 %v1995_v12, %v6049_v1  ;;  %v2025_v55 = vadd.f32 %v2014_v29, %v6050_v34  ;;  %v6057_v29 = vld [vmem:[#allocation19_spill] sm:$0xff] }
 0x4ec   :  { %v5567_v3 = vadd.f32 %v5553_v60, %v2024_v39  ;;  %v5570_v13 = vadd.f32 %v5556_v16, %v2025_v55  ;;  %v6058_v39 = vld [vmem:[#allocation32_spill] sm:$0xff]  ;;  %v6059_v55 = vld [vmem:[#allocation29_spill] sm:$0xff] }
 0x4ee   :  { %6051 = vst [vmem:[#allocation22_spill] sm:$0xff] %v5567_v3  ;;  %v2044_v23 = vpack.c.bf16 %v5567_v3, %v5561_v45  ;;  %v2045_v42 = vpack.c.bf16 %v5570_v13, %v5564_v57  ;;  %v6070_v3 = vld [vmem:[#allocation40_spill] sm:$0xff] }
 0x4ef   :  { %6052 = vst [vmem:[#allocation23_spill] sm:$0xff] %v5570_v13 }
 0x4f0   :  { %2056 = vmatmul.bf16.vlgmr.msra.gmra.mxu0 %v2044_v23  ;;  %2075 = vmatmul.bf16.vlgmr.msra.gmra.mxu1 %v2045_v42 }
 0x4f1   :  { %2094 = vmatmul.bf16.vlgmr.msrb.gmra.mxu2 %v2044_v23  ;;  %2113 = vmatmul.bf16.vlgmr.msrb.gmra.mxu3 %v2045_v42  ;;  %v1998_v46 = vpop.f32.mrf.mxu2  ;;  %v2017_v14 = vpop.f32.mrf.mxu3 }
 0x4f2   :  { %2300 = vmatpush.bf16.msrb.mxu3 %v6053_v17  ;;  %2406 = vmatpush.bf16.msrb.mxu2 %v4755_v32  ;;  %v2026_v9 = vadd.f32 %v1998_v46, %v6055_v31  ;;  %v2027_v21 = vadd.f32 %v2017_v14, %v6056_v24  ;;  %v6064_v31 = vld [vmem:[#allocation30_spill] sm:$0xff]  ;;  %v6067_v24 = vld [vmem:[#allocation35_spill] sm:$0xff] }
 0x4f4   :  { %v5587_v32 = vadd.f32 %v5553_v60, %v2026_v9  ;;  %v5590_v17 = vadd.f32 %v5556_v16, %v2027_v21  ;;  %v6066_v9 = vld [vmem:[#allocation34_spill] sm:$0xff]  ;;  %v6068_v21 = vld [vmem:[#allocation36_spill] sm:$0xff] }
 0x4f6   :  { %2301 = vmatpush.bf16.msrb.mxu3 %v6054_v52  ;;  %2407 = vmatpush.bf16.msrb.mxu2 %v4775_v40  ;;  %6060 = vst [vmem:[#allocation24_spill] sm:$0xff] %v5587_v32 }
 0x4f7   :  { %6061 = vst [vmem:[#allocation13_spill] sm:$0xff] %v5590_v17 }
 0x4f9   :  { %v2000_v27 = vpop.f32.mrf.mxu2  ;;  %v2019_v12 = vpop.f32.mrf.mxu3 }
 0x4fa   :  { %v2028_v1 = vadd.f32 %v2000_v27, %v6057_v29  ;;  %v2029_v34 = vadd.f32 %v2019_v12, %v6058_v39  ;;  %2302 = vmatpush.bf16.msrb.mxu3 %v6059_v55  ;;  %2408 = vmatpush.bf16.msrb.mxu2 %v4796_v49  ;;  %v6065_v49 = vld [vmem:[#allocation33_spill] sm:$0xff]  ;;  %v6069_v27 = vld [vmem:[#allocation10_spill] sm:$0xff] }
 0x4fc   :  { %v5593_v40 = vadd.f32 %v5553_v60, %v2028_v1  ;;  %v5596_v46 = vadd.f32 %v5556_v16, %v2029_v34 }
 0x4fe   :  { %6062 = vst [vmem:[#allocation25_spill] sm:$0xff] %v5593_v40  ;;  %v2046_v14 = vpack.c.bf16 %v5593_v40, %v5587_v32  ;;  %v2047_v52 = vpack.c.bf16 %v5596_v46, %v5590_v17  ;;  %2303 = vmatpush.bf16.msrb.mxu3 %v6064_v31  ;;  %2409 = vmatpush.bf16.msrb.mxu2 %v4828_v37 }
 0x4ff   :  { %6063 = vst [vmem:[#allocation14_spill] sm:$0xff] %v5596_v46 }
 0x500   :  { %2061 = vmatmul.bf16.gmra.mxu0 %v2046_v14  ;;  %2080 = vmatmul.bf16.gmra.mxu1 %v2047_v52 }
 0x501   :  { %2099 = vmatmul.bf16.gmra.mxu2 %v2046_v14  ;;  %2118 = vmatmul.bf16.gmra.mxu3 %v2047_v52 }
 0x502   :  { %2304 = vmatpush.bf16.msrb.mxu3 %v6065_v49  ;;  %2410 = vmatpush.bf16.msrb.mxu2 %v4848_v4 }
 0x506   :  { %2305 = vmatpush.bf16.msrb.mxu3 %v6066_v9  ;;  %2411 = vmatpush.bf16.msrb.mxu2 %v4868_v11 }
 0x50a   :  { %2306 = vmatpush.bf16.msrb.mxu3 %v6067_v24  ;;  %2412 = vmatpush.bf16.msrb.mxu2 %v4906_v22 }
 0x50e   :  { %2307 = vmatpush.bf16.msrb.mxu3 %v6068_v21  ;;  %2413 = vmatpush.bf16.msrb.mxu2 %v6069_v27 }
 0x511   :  { %2289 = vmatmul.bf16.vlgmr.msra.gmra.mxu3 %v2044_v23 }
 0x521   :  { %2294 = vmatmul.bf16.gmra.mxu3 %v2046_v14 }
 0x531   :  { %2308 = vmatmul.bf16.vlgmr.msrb.gmra.mxu3 %v2045_v42 }
 0x541   :  { %2313 = vmatmul.bf16.gmra.mxu3 %v2047_v52 }
 0x56d   :  { %v2057_v37 = vpop.f32.mrf.mxu0  ;;  %v2076_v12 = vpop.f32.mrf.mxu1 }
 0x56e   :  { %v2077_v42 = vadd.f32 %v2076_v12, %v2057_v37  ;;  %v6071_v37 = vld [vmem:[#allocation37_spill] sm:$0xff] }
 0x574   :  { %v2095_v29 = vpop.f32.mrf.mxu2  ;;  %v2114_v4 = vpop.f32.mrf.mxu3 }
 0x575   :  { %v2059_v1 = vpop.f32.mrf.mxu0  ;;  %v2078_v39 = vpop.f32.mrf.mxu1  ;;  %v2115_v13 = vadd.f32 %v2114_v4, %v2095_v29 }
 0x576   :  { %v2079_v23 = vadd.f32 %v2078_v39, %v2059_v1 }
 0x578   :  { %v2124_v52 = vpack.c.bf16 %v2079_v23, %v2077_v42 }
 0x57c   :  { %v2097_v34 = vpop.f32.mrf.mxu2  ;;  %v2116_v11 = vpop.f32.mrf.mxu3 }
 0x57d   :  { %v2062_v55 = vpop.f32.mrf.mxu0  ;;  %v2081_v31 = vpop.f32.mrf.mxu1  ;;  %v2117_v16 = vadd.f32 %v2116_v11, %v2097_v34 }
 0x57e   :  { %v2082_v21 = vadd.f32 %v2081_v31, %v2062_v55 }
 0x57f   :  { %v2126_v55 = vpack.c.bf16 %v2117_v16, %v2115_v13  ;;  %v6073_v16 = vld [vmem:[#allocation38_spill] sm:$0xff]  ;;  %v6075_v13 = vld [vmem:[#allocation39_spill] sm:$0xff] }
 0x584   :  { %v2100_v49 = vpop.f32.mrf.mxu2  ;;  %v2119_v22 = vpop.f32.mrf.mxu3 }
 0x585   :  { %v2064_v9 = vpop.f32.mrf.mxu0  ;;  %v2083_v24 = vpop.f32.mrf.mxu1  ;;  %v2120_v17 = vadd.f32 %v2119_v22, %v2100_v49 }
 0x586   :  { %v2084_v27 = vadd.f32 %v2083_v24, %v2064_v9 }
 0x588   :  { %v2125_v14 = vpack.c.bf16 %v2084_v27, %v2082_v21 }
 0x58a   :  { %2173 = vmatpush.bf16.msrb.mxu1 %v2125_v14 }
 0x58c   :  { %v2102_v46 = vpop.f32.mrf.mxu2  ;;  %v2121_v40 = vpop.f32.mrf.mxu3 }
 0x58d   :  { %v2122_v32 = vadd.f32 %v2121_v40, %v2102_v46 }
 0x58e   :  { %2174 = vmatpush.bf16.msrb.mxu1 %v2124_v52 }
 0x58f   :  { %v2127_v60 = vpack.c.bf16 %v2122_v32, %v2120_v17 }
 0x591   :  { %2134 = vmatpush.bf16.msrb.mxu0 %v2127_v60  ;;  %3627 = vmatmul.msk.bf16.vlgmr.msrb.gmra.mxu1 %vm1372_vm2, %v6070_v3  ;;  %v6072_v60 = vld [vmem:[#allocation42_spill] sm:$0xff]  ;;  %v6074_v3 = vld [vmem:[#allocation44_spill] sm:$0xff] }
 0x592   :  { %2367 = vmatpush.bf16.msra.mxu1 %v5347_v48 }
 0x595   :  { %2135 = vmatpush.bf16.msrb.mxu0 %v2126_v55 }
 0x596   :  { %2368 = vmatpush.bf16.msra.mxu1 %v5359_v35 }
 0x598   :  { %3621 = vmatmul.msk.bf16.vlgmr.msrb.gmra.mxu0 %vm1372_vm2, %v6071_v37 }
 0x599   :  { %2348 = vmatpush.bf16.msra.mxu0 %v5336_v25 }
 0x59a   :  { %2369 = vmatpush.bf16.msra.mxu1 %v5377_v0 }
 0x59d   :  { %2349 = vmatpush.bf16.msra.mxu0 %v5356_v20 }
 0x59e   :  { %2370 = vmatpush.bf16.msra.mxu1 %v5395_v50 }
 0x5a1   :  { %2350 = vmatpush.bf16.msra.mxu0 %v5374_v10  ;;  %3628 = vmatmul.msk.bf16.gmra.mxu1 %vm1372_vm2, %v6072_v60 }
 0x5a2   :  { %2371 = vmatpush.bf16.msra.mxu1 %v5433_v51 }
 0x5a5   :  { %2351 = vmatpush.bf16.msra.mxu0 %v5392_v30 }
 0x5a6   :  { %2372 = vmatpush.bf16.msra.mxu1 %v5451_v59 }
 0x5a8   :  { %3622 = vmatmul.msk.bf16.gmra.mxu0 %vm1372_vm2, %v6073_v16 }
 0x5a9   :  { %2352 = vmatpush.bf16.msra.mxu0 %v5428_v58 }
 0x5aa   :  { %2373 = vmatpush.bf16.msra.mxu1 %v5469_v61 }
 0x5ad   :  { %2353 = vmatpush.bf16.msra.mxu0 %v5446_v7 }
 0x5ae   :  { %2374 = vmatpush.bf16.msra.mxu1 %v5487_v15 }
 0x5b1   :  { %2354 = vmatpush.bf16.msra.mxu0 %v5464_v33  ;;  %3629 = vmatmul.msk.bf16.gmra.mxu1 %vm1372_vm2, %v6074_v3 }
 0x5b2   :  { %2463 = vmatpush.bf16.msrb.mxu1 %v4816_v56  ;;  %v6076_v56 = vld [vmem:[#allocation6_spill] sm:$0xff] }
 0x5b5   :  { %2355 = vmatpush.bf16.msra.mxu0 %v5482_v6 }
 0x5b6   :  { %2464 = vmatpush.bf16.msrb.mxu1 %v4893_v62  ;;  %v6077_v62 = vld [vmem:[#allocation46_spill] sm:$0xff] }
 0x5b8   :  { %3623 = vmatmul.msk.bf16.gmra.mxu0 %vm1372_vm2, %v6075_v13 }
 0x5b9   :  { %2444 = vmatpush.bf16.msrb.mxu0 %v4766_v36  ;;  %v6078_v36 = vld [vmem:[#allocation8_spill] sm:$0xff] }
 0x5ba   :  { %2465 = vmatpush.bf16.msrb.mxu1 %v4925_v28  ;;  %v6081_v28 = vld [vmem:[#allocation43_spill] sm:$0xff] }
 0x5bd   :  { %2445 = vmatpush.bf16.msrb.mxu0 %v4778_v41  ;;  %v6079_v41 = vld [vmem:[#allocation41_spill] sm:$0xff] }
 0x5be   :  { %2466 = vmatpush.bf16.msrb.mxu1 %v4965_v47  ;;  %v6083_v47 = vld [vmem:[#allocation45_spill] sm:$0xff] }
 0x5c1   :  { %2446 = vmatpush.bf16.msrb.mxu0 %v4808_v53  ;;  %3630 = vmatmul.msk.bf16.gmra.mxu1 %vm1372_vm2, %v6077_v62  ;;  %v6080_v53 = vld [vmem:[#allocation47_spill] sm:$0xff] }
 0x5c2   :  { %2467 = vmatpush.bf16.msrb.mxu1 %v4981_v54 }
 0x5c5   :  { %2447 = vmatpush.bf16.msrb.mxu0 %v6076_v56 }
 0x5c6   :  { %2468 = vmatpush.bf16.msrb.mxu1 %v5021_v8 }
 0x5c8   :  { %3624 = vmatmul.msk.bf16.gmra.mxu0 %vm1372_vm2, %v6079_v41 }
 0x5c9   :  { %2448 = vmatpush.bf16.msrb.mxu0 %v4853_v5  ;;  %v6082_v5 = vld [vmem:[#allocation48_spill] sm:$0xff] }
 0x5ca   :  { %2469 = vmatpush.bf16.msrb.mxu1 %v5033_v19 }
 0x5cd   :  { %2449 = vmatpush.bf16.msrb.mxu0 %v6078_v36 }
 0x5ce   :  { %2470 = vmatpush.bf16.msrb.mxu1 %v5061_v38 }
 0x5d1   :  { %2450 = vmatpush.bf16.msrb.mxu0 %v4920_v26  ;;  %3631 = vmatmul.msk.bf16.gmra.mxu1 %vm1372_vm2, %v6080_v53  ;;  %v6084_v26 = vld [vmem:[#allocation49_spill] sm:$0xff] }
 0x5d5   :  { %2451 = vmatpush.bf16.msrb.mxu0 %v4953_v43 }
 0x5d8   :  { %3625 = vmatmul.msk.bf16.gmra.mxu0 %vm1372_vm2, %v6081_v28 }
 0x5e1   :  { %3632 = vmatmul.msk.bf16.gmra.mxu1 %vm1372_vm2, %v6082_v5 }
 0x5e8   :  { %3626 = vmatmul.msk.bf16.gmra.mxu0 %vm1372_vm2, %v6083_v47 }
 0x60e   :  { %v2176_v54 = vpop.f32.mrf.mxu1 }
 0x615   :  { %v2137_v8 = vpop.f32.mrf.mxu0 }
 0x616   :  { %v2178_v19 = vpop.f32.mrf.mxu1  ;;  %v2177_v38 = vadd.f32 %v2176_v54, %v2137_v8 }
 0x618   :  { %v2206_v17 = vadd.f32 %v6084_v26, %v2177_v38 }
 0x61a   :  { %v2218_v12 = vmax.f32 %v2206_v17, 0.0 }
 0x61d   :  { %v2139_v32 = vpop.f32.mrf.mxu0 }
 0x61e   :  { %v2179_v43 = vadd.f32 %v2178_v19, %v2139_v32  ;;  %v2181_v40 = vpop.f32.mrf.mxu1 }
 0x620   :  { %v2207_v46 = vadd.f32 %v6084_v26, %v2179_v43 }
 0x622   :  { %v2219_v29 = vmax.f32 %v2207_v46, 0.0 }
 0x624   :  { %v2230_v4 = vpack.c.bf16 %v2219_v29, %v2218_v12 }
 0x625   :  { %v2142_v1 = vpop.f32.mrf.mxu0 }
 0x626   :  { %2244 = vmatmul.bf16.vlgmr.msra.gmra.mxu2 %v2230_v4  ;;  %v2183_v39 = vpop.f32.mrf.mxu1  ;;  %v2182_v34 = vadd.f32 %v2181_v40, %v2142_v1 }
 0x628   :  { %v2208_v31 = vadd.f32 %v6084_v26, %v2182_v34 }
 0x62a   :  { %v2220_v24 = vmax.f32 %v2208_v31, 0.0 }
 0x62d   :  { %v2144_v11 = vpop.f32.mrf.mxu0 }
 0x62e   :  { %v2184_v49 = vadd.f32 %v2183_v39, %v2144_v11  ;;  %v2186_v22 = vpop.f32.mrf.mxu1 }
 0x630   :  { %v2209_v9 = vadd.f32 %v6084_v26, %v2184_v49 }
 0x632   :  { %v2221_v21 = vmax.f32 %v2209_v9, 0.0 }
 0x634   :  { %v2231_v27 = vpack.c.bf16 %v2221_v21, %v2220_v24 }
 0x635   :  { %v2147_v23 = vpop.f32.mrf.mxu0 }
 0x636   :  { %2249 = vmatmul.bf16.gmra.mxu2 %v2231_v27  ;;  %v2188_v14 = vpop.f32.mrf.mxu1  ;;  %v2187_v42 = vadd.f32 %v2186_v22, %v2147_v23 }
 0x638   :  { %v2210_v55 = vadd.f32 %v6084_v26, %v2187_v42 }
 0x63a   :  { %v2222_v3 = vmax.f32 %v2210_v55, 0.0 }
 0x63d   :  { %v2149_v52 = vpop.f32.mrf.mxu0 }
 0x63e   :  { %v2189_v37 = vadd.f32 %v2188_v14, %v2149_v52  ;;  %v2191_v60 = vpop.f32.mrf.mxu1 }
 0x640   :  { %v2211_v16 = vadd.f32 %v6084_v26, %v2189_v37 }
 0x642   :  { %v2223_v13 = vmax.f32 %v2211_v16, 0.0 }
 0x644   :  { %v2232_v56 = vpack.c.bf16 %v2223_v13, %v2222_v3 }
 0x645   :  { %v2152_v62 = vpop.f32.mrf.mxu0 }
 0x646   :  { %2254 = vmatmul.bf16.gmra.mxu2 %v2232_v56  ;;  %v2193_v36 = vpop.f32.mrf.mxu1  ;;  %v2192_v41 = vadd.f32 %v2191_v60, %v2152_v62 }
 0x648   :  { %v2212_v28 = vadd.f32 %v6084_v26, %v2192_v41 }
 0x64a   :  { %v2224_v8 = vmax.f32 %v2212_v28, 0.0 }
 0x64d   :  { %v2154_v53 = vpop.f32.mrf.mxu0 }
 0x64e   :  { %v2194_v5 = vadd.f32 %v2193_v36, %v2154_v53  ;;  %v2196_v47 = vpop.f32.mrf.mxu1 }
 0x650   :  { %v2213_v54 = vadd.f32 %v6084_v26, %v2194_v5 }
 0x652   :  { %v2225_v19 = vmax.f32 %v2213_v54, 0.0 }
 0x654   :  { %v2233_v38 = vpack.c.bf16 %v2225_v19, %v2224_v8  ;;  %v6085_v8 = vld [vmem:[#allocation5_spill] sm:$0xff]  ;;  %v6086_v19 = vld [vmem:[#allocation50_spill] sm:$0xff] }
 0x655   :  { %v2157_v32 = vpop.f32.mrf.mxu0 }
 0x656   :  { %2259 = vmatmul.bf16.gmra.mxu2 %v2233_v38  ;;  %v2198_v17 = vpop.f32.mrf.mxu1  ;;  %v2197_v43 = vadd.f32 %v2196_v47, %v2157_v32  ;;  %v6087_v38 = vld [vmem:[#allocation7_spill] sm:$0xff]  ;;  %v6088_v32 = vld [vmem:[#allocation9_spill] sm:$0xff] }
 0x658   :  { %v2214_v46 = vadd.f32 %v6084_v26, %v2197_v43  ;;  %v6090_v43 = vld [vmem:[#allocation12_spill] sm:$0xff] }
 0x65a   :  { %v2226_v4 = vmax.f32 %v2214_v46, 0.0  ;;  %v6092_v46 = vld [vmem:[#allocation15_spill] sm:$0xff] }
 0x65d   :  { %v2159_v40 = vpop.f32.mrf.mxu0 }
 0x65e   :  { %v2199_v12 = vadd.f32 %v2198_v17, %v2159_v40  ;;  %v2201_v39 = vpop.f32.mrf.mxu1  ;;  %v6089_v17 = vld [vmem:[#allocation11_spill] sm:$0xff] }
 0x65f   :  { %v6091_v40 = vld [vmem:[#allocation51_spill] sm:$0xff] }
 0x660   :  { %v2215_v29 = vadd.f32 %v6084_v26, %v2199_v12  ;;  %v6093_v12 = vld [vmem:[#allocation16_spill] sm:$0xff] }
 0x662   :  { %v2227_v1 = vmax.f32 %v2215_v29, 0.0  ;;  %v6094_v29 = vld [vmem:[#allocation18_spill] sm:$0xff] }
 0x664   :  { %v2234_v34 = vpack.c.bf16 %v2227_v1, %v2226_v4  ;;  %v2290_v4 = vpop.f32.mrf.mxu3 }
 0x665   :  { %v2162_v11 = vpop.f32.mrf.mxu0 }
 0x666   :  { %2264 = vmatmul.bf16.gmra.mxu2 %v2234_v34  ;;  %v2202_v31 = vadd.f32 %v2201_v39, %v2162_v11  ;;  %v2203_v49 = vpop.f32.mrf.mxu1 }
 0x668   :  { %v2216_v9 = vadd.f32 %v6084_v26, %v2202_v31 }
 0x66a   :  { %v2228_v27 = vmax.f32 %v2216_v9, 0.0 }
 0x66c   :  { %v2292_v1 = vpop.f32.mrf.mxu3 }
 0x66d   :  { %v2164_v22 = vpop.f32.mrf.mxu0 }
 0x66e   :  { %v2204_v24 = vadd.f32 %v2203_v49, %v2164_v22 }
 0x670   :  { %v2217_v21 = vadd.f32 %v6084_v26, %v2204_v24 }
 0x672   :  { %v2229_v23 = vmax.f32 %v2217_v21, 0.0 }
 0x674   :  { %v2235_v14 = vpack.c.bf16 %v2229_v23, %v2228_v27  ;;  %v2295_v39 = vpop.f32.mrf.mxu3 }
 0x676   :  { %2269 = vmatmul.bf16.gmra.mxu2 %v2235_v14 }
 0x67c   :  { %v2297_v34 = vpop.f32.mrf.mxu3 }
 0x684   :  { %v2309_v11 = vpop.f32.mrf.mxu3 }
 0x685   :  { %v2310_v24 = vadd.f32 %v2309_v11, %v2290_v4  ;;  %v3877_v4 = vld [vmem:[%s5929_s12] sm:$0xff] }
 0x68c   :  { %v2311_v31 = vpop.f32.mrf.mxu3 }
 0x68d   :  { %v2312_v27 = vadd.f32 %v2311_v31, %v2292_v1  ;;  %v3878_v1 = vld [vmem:[#allocation2] sm:$0xff] }
 0x694   :  { %v2314_v49 = vpop.f32.mrf.mxu3 }
 0x69c   :  { %v2316_v22 = vpop.f32.mrf.mxu3 }
 0x6a9   :  { %v2245_v42 = vpop.f32.mrf.mxu2 }
 0x6b1   :  { %v2247_v52 = vpop.f32.mrf.mxu2 }
 0x6b2   :  { %v2275_v54 = vpack.c.bf16 %v2247_v52, %v2245_v42 }
 0x6b9   :  { %v2250_v55 = vpop.f32.mrf.mxu2 }
 0x6c1   :  { %v2252_v37 = vpop.f32.mrf.mxu2 }
 0x6c2   :  { %v2276_v47 = vpack.c.bf16 %v2252_v37, %v2250_v55 }
 0x6c9   :  { %v2255_v60 = vpop.f32.mrf.mxu2 }
 0x6d1   :  { %v2257_v16 = vpop.f32.mrf.mxu2 }
 0x6d2   :  { %v2277_v5 = vpack.c.bf16 %v2257_v16, %v2255_v60 }
 0x6d9   :  { %v2260_v3 = vpop.f32.mrf.mxu2 }
 0x6e1   :  { %v2262_v13 = vpop.f32.mrf.mxu2 }
 0x6e2   :  { %v2278_v26 = vpack.c.bf16 %v2262_v13, %v2260_v3  ;;  %v3863_v3 = vld [vmem:[%s5929_s12 + $0x38] sm:$0xff] }
 0x6e3   :  { %v3864_v13 = vld [vmem:[#allocation2 + $0x38] sm:$0xff] }
 0x6e9   :  { %v2265_v56 = vpop.f32.mrf.mxu2 }
 0x6f1   :  { %v2267_v62 = vpop.f32.mrf.mxu2 }
 0x6f2   :  { %v2279_v28 = vpack.c.bf16 %v2267_v62, %v2265_v56  ;;  %v2315_v56 = vadd.f32 %v2314_v49, %v2295_v39 }
 0x6f9   :  { %v2270_v36 = vpop.f32.mrf.mxu2 }
 0x701   :  { %v2272_v41 = vpop.f32.mrf.mxu2 }
 0x702   :  { %v2280_v53 = vpack.c.bf16 %v2272_v41, %v2270_v36  ;;  %v2317_v36 = vadd.f32 %v2316_v22, %v2297_v34 }
 0x704   :  { %2321 = vmatpush.bf16.msra.mxu3 %v2280_v53 }
 0x708   :  { %2322 = vmatpush.bf16.msra.mxu3 %v2279_v28 }
 0x70c   :  { %2323 = vmatpush.bf16.msra.mxu3 %v2278_v26  ;;  %v3867_v26 = vld [vmem:[%s5929_s12 + $0x28] sm:$0xff] }
 0x710   :  { %2324 = vmatpush.bf16.msra.mxu3 %v2277_v5  ;;  %v3868_v5 = vld [vmem:[#allocation2 + $0x28] sm:$0xff] }
 0x714   :  { %2325 = vmatpush.bf16.msra.mxu3 %v2276_v47 }
 0x718   :  { %2326 = vmatpush.bf16.msra.mxu3 %v2275_v54 }
 0x71b   :  { %3633 = vmatmul.msk.bf16.vlgmr.msra.gmra.mxu3 %vm1848_vm3, %v6086_v19 }
 0x71c   :  { %2425 = vmatpush.bf16.msrb.mxu3 %v6085_v8 }
 0x720   :  { %2426 = vmatpush.bf16.msrb.mxu3 %v6087_v38  ;;  %v3869_v38 = vld [vmem:[%s5929_s12 + $0x20] sm:$0xff] }
 0x724   :  { %2427 = vmatpush.bf16.msrb.mxu3 %v6088_v32  ;;  %v3870_v32 = vld [vmem:[#allocation2 + $0x20] sm:$0xff] }
 0x728   :  { %2428 = vmatpush.bf16.msrb.mxu3 %v6089_v17  ;;  %v3871_v17 = vld [vmem:[%s5929_s12 + $0x18] sm:$0xff] }
 0x72b   :  { %3634 = vmatmul.msk.bf16.gmra.mxu3 %vm1848_vm3, %v6091_v40 }
 0x72c   :  { %2429 = vmatpush.bf16.msrb.mxu3 %v6090_v43  ;;  %v3872_v43 = vld [vmem:[#allocation2 + $0x18] sm:$0xff] }
 0x730   :  { %2430 = vmatpush.bf16.msrb.mxu3 %v6092_v46  ;;  %v3874_v46 = vld [vmem:[#allocation2 + $0x10] sm:$0xff] }
 0x734   :  { %2431 = vmatpush.bf16.msrb.mxu3 %v6093_v12  ;;  %v3875_v12 = vld [vmem:[%s5929_s12 + $0x8] sm:$0xff] }
 0x738   :  { %2432 = vmatpush.bf16.msrb.mxu3 %v6094_v29  ;;  %v3876_v29 = vld [vmem:[#allocation2 + $0x8] sm:$0xff] }
 0x79e   :  { %v2328_v9 = vpop.f32.mrf.mxu3 }
 0x79f   :  { %v2329_v21 = vadd.f32 %v2328_v9, %v2310_v24  ;;  %v6095_v9 = vld [vmem:[#allocation22_spill] sm:$0xff] }
 0x7a1   :  { %v2338_v14 = vadd.f32 %v2329_v21, %v5506_v2  ;;  %v3865_v2 = vld [vmem:[%s5929_s12 + $0x30] sm:$0xff] }
 0x7a2   :  { %v6096_v21 = vld [vmem:[#allocation23_spill] sm:$0xff] }
 0x7a3   :  { %v2342_v55 = vmax.f32 %v2338_v14, 0.0 }
 0x7a6   :  { %v2330_v23 = vpop.f32.mrf.mxu3 }
 0x7a7   :  { %v2331_v42 = vadd.f32 %v2330_v23, %v2312_v27  ;;  %v6097_v23 = vld [vmem:[#allocation20_spill] sm:$0xff] }
 0x7a9   :  { %v2339_v52 = vadd.f32 %v2331_v42, %v5511_v63  ;;  %v3866_v63 = vld [vmem:[#allocation2 + $0x30] sm:$0xff]  ;;  %v6098_v42 = vld [vmem:[#allocation21_spill] sm:$0xff] }
 0x7ab   :  { %v2343_v37 = vmax.f32 %v2339_v52, 0.0 }
 0x7ad   :  { %v2346_v60 = vpack.c.bf16 %v2343_v37, %v2342_v55 }
 0x7ae   :  { %v2333_v16 = vpop.f32.mrf.mxu3 }
 0x7af   :  { %2356 = vmatmul.bf16.vlgmr.msra.gmra.mxu0 %v2346_v60  ;;  %2375 = vmatmul.bf16.vlgmr.msra.gmra.mxu1 %v2346_v60  ;;  %v2334_v62 = vadd.f32 %v2333_v16, %v2315_v56  ;;  %v6099_v56 = vld [vmem:[#allocation24_spill] sm:$0xff] }
 0x7b0   :  { %2639 = vmatpush.bf16.msra.mxu1 %v3863_v3  ;;  %2594 = vmatpush.bf16.msra.mxu0 %v3864_v13  ;;  %v3879_v3 = vld [vmem:[%s5929_s12 + $0x78] sm:$0xff]  ;;  %v3880_v13 = vld [vmem:[%s5929_s12 + $0x70] sm:$0xff] }
 0x7b1   :  { %v2340_v53 = vadd.f32 %v2334_v62, %v5525_v18 }
 0x7b3   :  { %v2344_v54 = vmax.f32 %v2340_v53, 0.0  ;;  %v6101_v53 = vld [vmem:[#allocation25_spill] sm:$0xff] }
 0x7b4   :  { %2640 = vmatpush.bf16.msra.mxu1 %v3865_v2  ;;  %2595 = vmatpush.bf16.msra.mxu0 %v3866_v63  ;;  %v6100_v2 = vld [vmem:[#allocation13_spill] sm:$0xff] }
 0x7b6   :  { %v2335_v41 = vpop.f32.mrf.mxu3 }
 0x7b7   :  { %v2336_v28 = vadd.f32 %v2335_v41, %v2317_v36 }
 0x7b8   :  { %2641 = vmatpush.bf16.msra.mxu1 %v3867_v26  ;;  %2596 = vmatpush.bf16.msra.mxu0 %v3868_v5  ;;  %v6102_v26 = vld [vmem:[#allocation14_spill] sm:$0xff] }
 0x7b9   :  { %v2341_v47 = vadd.f32 %v2336_v28, %v5533_v44  ;;  %v3873_v44 = vld [vmem:[%s5929_s12 + $0x10] sm:$0xff] }
 0x7bb   :  { %v2345_v8 = vmax.f32 %v2341_v47, 0.0  ;;  %v3881_v47 = vld [vmem:[%s5929_s12 + $0x68] sm:$0xff] }
 0x7bc   :  { %2642 = vmatpush.bf16.msra.mxu1 %v3869_v38  ;;  %2597 = vmatpush.bf16.msra.mxu0 %v3870_v32 }
 0x7bd   :  { %v2347_v18 = vpack.c.bf16 %v2345_v8, %v2344_v54 }
 0x7bf   :  { %2361 = vmatmul.bf16.gmra.mxu0 %v2347_v18  ;;  %2380 = vmatmul.bf16.gmra.mxu1 %v2347_v18 }
 0x7c0   :  { %2643 = vmatpush.bf16.msra.mxu1 %v3871_v17  ;;  %2598 = vmatpush.bf16.msra.mxu0 %v3872_v43  ;;  %v3882_v43 = vld [vmem:[%s5929_s12 + $0x60] sm:$0xff] }
 0x7c4   :  { %2644 = vmatpush.bf16.msra.mxu1 %v3873_v44  ;;  %2599 = vmatpush.bf16.msra.mxu0 %v3874_v46  ;;  %v3883_v44 = vld [vmem:[%s5929_s12 + $0x58] sm:$0xff]  ;;  %v3884_v46 = vld [vmem:[%s5929_s12 + $0x50] sm:$0xff] }
 0x7c8   :  { %2645 = vmatpush.bf16.msra.mxu1 %v3875_v12  ;;  %2600 = vmatpush.bf16.msra.mxu0 %v3876_v29  ;;  %v3885_v12 = vld [vmem:[%s5929_s12 + $0x48] sm:$0xff]  ;;  %v3886_v29 = vld [vmem:[%s5929_s12 + $0x40] sm:$0xff] }
 0x7cc   :  { %2646 = vmatpush.bf16.msra.mxu1 %v3877_v4  ;;  %2601 = vmatpush.bf16.msra.mxu0 %v3878_v1 }
 0x82c   :  { %v2357_v39 = vpop.f32.mrf.mxu0  ;;  %v2376_v34 = vpop.f32.mrf.mxu1 }
 0x82d   :  { %v2386_v11 = vadd.f32 %v2357_v39, %v5561_v45  ;;  %v2387_v31 = vadd.f32 %v2376_v34, %v5564_v57 }
 0x82f   :  { %v5725_v14 = vadd.f32 %v2386_v11, %v6097_v23  ;;  %v5728_v52 = vadd.f32 %v2387_v31, %v6098_v42 }
 0x834   :  { %v2359_v49 = vpop.f32.mrf.mxu0  ;;  %v2378_v22 = vpop.f32.mrf.mxu1 }
 0x835   :  { %v2388_v24 = vadd.f32 %v2359_v49, %v6095_v9  ;;  %v2389_v27 = vadd.f32 %v2378_v22, %v6096_v21 }
 0x837   :  { %v5731_v55 = vadd.f32 %v2388_v24, %v6097_v23  ;;  %v5734_v37 = vadd.f32 %v2389_v27, %v6098_v42 }
 0x839   :  { %v2402_v45 = vpack.c.bf16 %v5731_v55, %v5725_v14  ;;  %v2403_v57 = vpack.c.bf16 %v5734_v37, %v5728_v52 }
 0x83b   :  { %2414 = vmatmul.bf16.vlgmr.msrb.gmra.mxu2 %v2402_v45  ;;  %2433 = vmatmul.bf16.vlgmr.msrb.gmra.mxu3 %v2403_v57 }
 0x83c   :  { %2452 = vmatmul.bf16.vlgmr.msrb.gmra.mxu0 %v2402_v45  ;;  %2471 = vmatmul.bf16.vlgmr.msrb.gmra.mxu1 %v2403_v57  ;;  %v2362_v60 = vpop.f32.mrf.mxu0  ;;  %v2381_v16 = vpop.f32.mrf.mxu1 }
 0x83d   :  { %2658 = vmatpush.bf16.msrb.mxu1 %v3879_v3  ;;  %v2390_v62 = vadd.f32 %v2362_v60, %v6099_v56  ;;  %v2391_v63 = vadd.f32 %v2381_v16, %v6100_v2 }
 0x83f   :  { %v5754_v54 = vadd.f32 %v2390_v62, %v6097_v23  ;;  %v5757_v8 = vadd.f32 %v2391_v63, %v6098_v42 }
 0x841   :  { %2659 = vmatpush.bf16.msrb.mxu1 %v3880_v13 }
 0x844   :  { %v2364_v36 = vpop.f32.mrf.mxu0  ;;  %v2383_v41 = vpop.f32.mrf.mxu1 }
 0x845   :  { %v2392_v28 = vadd.f32 %v2364_v36, %v6101_v53  ;;  %v2393_v5 = vadd.f32 %v2383_v41, %v6102_v26  ;;  %2660 = vmatpush.bf16.msrb.mxu1 %v3881_v47  ;;  %v3887_v47 = vld [vmem:[%s5924_s7] sm:$0xff] }
 0x847   :  { %v5760_v38 = vadd.f32 %v2392_v28, %v6097_v23  ;;  %v5763_v32 = vadd.f32 %v2393_v5, %v6098_v42 }
 0x849   :  { %v2404_v18 = vpack.c.bf16 %v5760_v38, %v5754_v54  ;;  %v2405_v17 = vpack.c.bf16 %v5763_v32, %v5757_v8  ;;  %2661 = vmatpush.bf16.msrb.mxu1 %v3882_v43 }
 0x84b   :  { %2419 = vmatmul.bf16.gmra.mxu2 %v2404_v18  ;;  %2438 = vmatmul.bf16.gmra.mxu3 %v2405_v17 }
 0x84c   :  { %2457 = vmatmul.bf16.gmra.mxu0 %v2404_v18  ;;  %2476 = vmatmul.bf16.gmra.mxu1 %v2405_v17 }
 0x84d   :  { %2662 = vmatpush.bf16.msrb.mxu1 %v3883_v44 }
 0x851   :  { %2663 = vmatpush.bf16.msrb.mxu1 %v3884_v46 }
 0x855   :  { %2664 = vmatpush.bf16.msrb.mxu1 %v3885_v12 }
 0x859   :  { %2665 = vmatpush.bf16.msrb.mxu1 %v3886_v29 }
 0x85c   :  { %2647 = vmatmul.bf16.vlgmr.msra.gmra.mxu1 %v2402_v45 }
 0x86c   :  { %2652 = vmatmul.bf16.gmra.mxu1 %v2404_v18  ;;  %v3888_v18 = vld [vmem:[%s5923_s6] sm:$0xff] }
 0x87c   :  { %2666 = vmatmul.bf16.vlgmr.msrb.gmra.mxu1 %v2403_v57 }
 0x88c   :  { %2671 = vmatmul.bf16.gmra.mxu1 %v2405_v17 }
 0x8b9   :  { %v2453_v4 = vpop.f32.mrf.mxu0  ;;  %v2472_v1 = vpop.f32.mrf.mxu1 }
 0x8ba   :  { %v2473_v57 = vadd.f32 %v2472_v1, %v2453_v4 }
 0x8be   :  { %v2415_v39 = vpop.f32.mrf.mxu2  ;;  %v2434_v34 = vpop.f32.mrf.mxu3 }
 0x8bf   :  { %v2435_v26 = vadd.f32 %v2434_v34, %v2415_v39 }
 0x8c1   :  { %v2455_v11 = vpop.f32.mrf.mxu0  ;;  %v2474_v31 = vpop.f32.mrf.mxu1 }
 0x8c2   :  { %v2475_v45 = vadd.f32 %v2474_v31, %v2455_v11 }
 0x8c4   :  { %v2484_v41 = vpack.c.bf16 %v2475_v45, %v2473_v57 }
 0x8c6   :  { %v2417_v49 = vpop.f32.mrf.mxu2  ;;  %v2436_v22 = vpop.f32.mrf.mxu3 }
 0x8c7   :  { %v2437_v53 = vadd.f32 %v2436_v22, %v2417_v49 }
 0x8c9   :  { %v2458_v9 = vpop.f32.mrf.mxu0  ;;  %v2477_v24 = vpop.f32.mrf.mxu1  ;;  %v2482_v5 = vpack.c.bf16 %v2437_v53, %v2435_v26 }
 0x8ca   :  { %v2478_v3 = vadd.f32 %v2477_v24, %v2458_v9 }
 0x8ce   :  { %v2420_v21 = vpop.f32.mrf.mxu2  ;;  %v2439_v27 = vpop.f32.mrf.mxu3 }
 0x8cf   :  { %v2440_v63 = vadd.f32 %v2439_v27, %v2420_v21 }
 0x8d1   :  { %v2460_v60 = vpop.f32.mrf.mxu0  ;;  %v2479_v16 = vpop.f32.mrf.mxu1 }
 0x8d2   :  { %v2480_v13 = vadd.f32 %v2479_v16, %v2460_v60 }
 0x8d4   :  { %v2485_v56 = vpack.c.bf16 %v2480_v13, %v2478_v3 }
 0x8d6   :  { %2492 = vmatpush.bf16.msra.mxu2 %v2485_v56  ;;  %v2422_v62 = vpop.f32.mrf.mxu2  ;;  %v2441_v2 = vpop.f32.mrf.mxu3 }
 0x8d7   :  { %v2442_v36 = vadd.f32 %v2441_v2, %v2422_v62 }
 0x8d9   :  { %v2483_v28 = vpack.c.bf16 %v2442_v36, %v2440_v63 }
 0x8da   :  { %2493 = vmatpush.bf16.msra.mxu2 %v2484_v41 }
 0x8db   :  { %2531 = vmatpush.bf16.msra.mxu3 %v2483_v28 }
 0x8dd   :  { %3635 = vmatmul.msk.bf16.vlgmr.msra.gmra.mxu2 %vm1372_vm2, %v3887_v47 }
 0x8de   :  { %2706 = vmatpush.bf16.msrb.mxu2 %v5336_v25  ;;  %v3889_v25 = vld [vmem:[%s5924_s7 + $0x8] sm:$0xff] }
 0x8df   :  { %2532 = vmatpush.bf16.msra.mxu3 %v2482_v5 }
 0x8e2   :  { %2707 = vmatpush.bf16.msrb.mxu2 %v5356_v20  ;;  %3641 = vmatmul.msk.bf16.vlgmr.msra.gmra.mxu3 %vm1372_vm2, %v3888_v18  ;;  %v3892_v20 = vld [vmem:[%s5923_s6 + $0x10] sm:$0xff] }
 0x8e3   :  { %2725 = vmatpush.bf16.msrb.mxu3 %v5347_v48  ;;  %v3890_v48 = vld [vmem:[%s5923_s6 + $0x8] sm:$0xff] }
 0x8e6   :  { %2708 = vmatpush.bf16.msrb.mxu2 %v5374_v10  ;;  %v3895_v10 = vld [vmem:[%s5924_s7 + $0x20] sm:$0xff] }
 0x8e7   :  { %2726 = vmatpush.bf16.msrb.mxu3 %v5359_v35  ;;  %v3893_v35 = vld [vmem:[%s5924_s7 + $0x18] sm:$0xff] }
 0x8ea   :  { %2709 = vmatpush.bf16.msrb.mxu2 %v5392_v30  ;;  %v3897_v30 = vld [vmem:[%s5924_s7 + $0x28] sm:$0xff] }
 0x8eb   :  { %2727 = vmatpush.bf16.msrb.mxu3 %v5377_v0  ;;  %v3896_v0 = vld [vmem:[%s5923_s6 + $0x20] sm:$0xff] }
 0x8ed   :  { %3636 = vmatmul.msk.bf16.gmra.mxu2 %vm1372_vm2, %v3889_v25 }
 0x8ee   :  { %2710 = vmatpush.bf16.msrb.mxu2 %v5428_v58 }
 0x8ef   :  { %2728 = vmatpush.bf16.msrb.mxu3 %v5395_v50  ;;  %v3898_v50 = vld [vmem:[%s5923_s6 + $0x28] sm:$0xff] }
 0x8f2   :  { %2711 = vmatpush.bf16.msrb.mxu2 %v5446_v7  ;;  %3642 = vmatmul.msk.bf16.gmra.mxu3 %vm1372_vm2, %v3890_v48  ;;  %v3891_v7 = vld [vmem:[%s5924_s7 + $0x10] sm:$0xff] }
 0x8f3   :  { %2729 = vmatpush.bf16.msrb.mxu3 %v5433_v51 }
 0x8f6   :  { %2712 = vmatpush.bf16.msrb.mxu2 %v5464_v33 }
 0x8f7   :  { %2730 = vmatpush.bf16.msrb.mxu3 %v5451_v59 }
 0x8fa   :  { %2713 = vmatpush.bf16.msrb.mxu2 %v5482_v6  ;;  %v5851_v6 = vld [vmem:[%s5926_s9] ss:$0 sm:$0xff] }
 0x8fb   :  { %2731 = vmatpush.bf16.msrb.mxu3 %v5469_v61 }
 0x8fd   :  { %3637 = vmatmul.msk.bf16.gmra.mxu2 %vm1372_vm2, %v3891_v7 }
 0x8ff   :  { %2732 = vmatpush.bf16.msrb.mxu3 %v5487_v15  ;;  %v3894_v15 = vld [vmem:[%s5923_s6 + $0x18] sm:$0xff] }
 0x902   :  { %3643 = vmatmul.msk.bf16.gmra.mxu3 %vm1372_vm2, %v3892_v20 }
 0x90d   :  { %3638 = vmatmul.msk.bf16.gmra.mxu2 %vm1372_vm2, %v3893_v35 }
 0x912   :  { %3644 = vmatmul.msk.bf16.gmra.mxu3 %vm1372_vm2, %v3894_v15 }
 0x91d   :  { %3639 = vmatmul.msk.bf16.gmra.mxu2 %vm1372_vm2, %v3895_v10 }
 0x922   :  { %3645 = vmatmul.msk.bf16.gmra.mxu3 %vm1372_vm2, %v3896_v0 }
 0x92d   :  { %3640 = vmatmul.msk.bf16.gmra.mxu2 %vm1372_vm2, %v3897_v30 }
 0x932   :  { %3646 = vmatmul.msk.bf16.gmra.mxu3 %vm1372_vm2, %v3898_v50 }
 0x960   :  { %v2495_v58 = vpop.f32.mrf.mxu2 }
 0x965   :  { %v2534_v51 = vpop.f32.mrf.mxu3 }
 0x966   :  { %v2535_v33 = vadd.f32 %v2534_v51, %v2495_v58 }
 0x968   :  { %v2497_v59 = vpop.f32.mrf.mxu2  ;;  %v2564_v17 = vadd.f32 %v5851_v6, %v2535_v33 }
 0x96a   :  { %v2576_v12 = vmax.f32 %v2564_v17, 0.0 }
 0x96d   :  { %v2536_v61 = vpop.f32.mrf.mxu3 }
 0x96e   :  { %v2537_v43 = vadd.f32 %v2536_v61, %v2497_v59 }
 0x970   :  { %v2565_v44 = vadd.f32 %v5851_v6, %v2537_v43  ;;  %v2500_v46 = vpop.f32.mrf.mxu2 }
 0x972   :  { %v2577_v29 = vmax.f32 %v2565_v44, 0.0 }
 0x974   :  { %v2588_v4 = vpack.c.bf16 %v2577_v29, %v2576_v12 }
 0x975   :  { %v2539_v1 = vpop.f32.mrf.mxu3 }
 0x976   :  { %2602 = vmatmul.bf16.vlgmr.msra.gmra.mxu0 %v2588_v4  ;;  %v2540_v34 = vadd.f32 %v2539_v1, %v2500_v46 }
 0x978   :  { %v2502_v39 = vpop.f32.mrf.mxu2  ;;  %v2566_v31 = vadd.f32 %v5851_v6, %v2540_v34 }
 0x97a   :  { %v2578_v24 = vmax.f32 %v2566_v31, 0.0 }
 0x97d   :  { %v2541_v11 = vpop.f32.mrf.mxu3 }
 0x97e   :  { %v2542_v49 = vadd.f32 %v2541_v11, %v2502_v39 }
 0x980   :  { %v2567_v22 = vadd.f32 %v5851_v6, %v2542_v49  ;;  %v2505_v9 = vpop.f32.mrf.mxu2 }
 0x982   :  { %v2579_v21 = vmax.f32 %v2567_v22, 0.0 }
 0x984   :  { %v2589_v27 = vpack.c.bf16 %v2579_v21, %v2578_v24 }
 0x985   :  { %v2544_v60 = vpop.f32.mrf.mxu3 }
 0x986   :  { %2607 = vmatmul.bf16.gmra.mxu0 %v2589_v27  ;;  %v2545_v3 = vadd.f32 %v2544_v60, %v2505_v9 }
 0x988   :  { %v2507_v16 = vpop.f32.mrf.mxu2  ;;  %v2568_v45 = vadd.f32 %v5851_v6, %v2545_v3 }
 0x98a   :  { %v2580_v2 = vmax.f32 %v2568_v45, 0.0 }
 0x98d   :  { %v2546_v13 = vpop.f32.mrf.mxu3 }
 0x98e   :  { %v2547_v56 = vadd.f32 %v2546_v13, %v2507_v16 }
 0x990   :  { %v2569_v57 = vadd.f32 %v5851_v6, %v2547_v56  ;;  %v2510_v62 = vpop.f32.mrf.mxu2 }
 0x992   :  { %v2581_v63 = vmax.f32 %v2569_v57, 0.0 }
 0x994   :  { %v2590_v36 = vpack.c.bf16 %v2581_v63, %v2580_v2  ;;  %v2648_v63 = vpop.f32.mrf.mxu1 }
 0x995   :  { %v2549_v41 = vpop.f32.mrf.mxu3 }
 0x996   :  { %2612 = vmatmul.bf16.gmra.mxu0 %v2590_v36  ;;  %v2550_v28 = vadd.f32 %v2549_v41, %v2510_v62 }
 0x998   :  { %v2512_v53 = vpop.f32.mrf.mxu2  ;;  %v2570_v5 = vadd.f32 %v5851_v6, %v2550_v28 }
 0x99a   :  { %v2582_v48 = vmax.f32 %v2570_v5, 0.0 }
 0x99c   :  { %v2650_v36 = vpop.f32.mrf.mxu1 }
 0x99d   :  { %v2551_v26 = vpop.f32.mrf.mxu3 }
 0x99e   :  { %v2552_v47 = vadd.f32 %v2551_v26, %v2512_v53 }
 0x9a0   :  { %v2571_v18 = vadd.f32 %v5851_v6, %v2552_v47  ;;  %v2515_v25 = vpop.f32.mrf.mxu2 }
 0x9a2   :  { %v2583_v7 = vmax.f32 %v2571_v18, 0.0 }
 0x9a4   :  { %v2591_v20 = vpack.c.bf16 %v2583_v7, %v2582_v48  ;;  %v2653_v41 = vpop.f32.mrf.mxu1 }
 0x9a5   :  { %v2554_v35 = vpop.f32.mrf.mxu3 }
 0x9a6   :  { %2617 = vmatmul.bf16.gmra.mxu0 %v2591_v20  ;;  %v2555_v10 = vadd.f32 %v2554_v35, %v2515_v25 }
 0x9a8   :  { %v2517_v15 = vpop.f32.mrf.mxu2  ;;  %v2572_v30 = vadd.f32 %v5851_v6, %v2555_v10 }
 0x9aa   :  { %v2584_v51 = vmax.f32 %v2572_v30, 0.0 }
 0x9ac   :  { %v2655_v53 = vpop.f32.mrf.mxu1 }
 0x9ad   :  { %v2556_v0 = vpop.f32.mrf.mxu3 }
 0x9ae   :  { %v2557_v50 = vadd.f32 %v2556_v0, %v2517_v15 }
 0x9b0   :  { %v2573_v58 = vadd.f32 %v5851_v6, %v2557_v50  ;;  %v2520_v33 = vpop.f32.mrf.mxu2 }
 0x9b2   :  { %v2585_v59 = vmax.f32 %v2573_v58, 0.0 }
 0x9b4   :  { %v2592_v61 = vpack.c.bf16 %v2585_v59, %v2584_v51  ;;  %v2667_v28 = vpop.f32.mrf.mxu1 }
 0x9b5   :  { %v2559_v17 = vpop.f32.mrf.mxu3  ;;  %v2668_v25 = vadd.f32 %v2667_v28, %v2648_v63 }
 0x9b6   :  { %2622 = vmatmul.bf16.gmra.mxu0 %v2592_v61  ;;  %v2560_v43 = vadd.f32 %v2559_v17, %v2520_v33  ;;  %v3902_v17 = vld [vmem:[%s5928_s11 + $0x10] sm:$0xff] }
 0x9b8   :  { %v2522_v44 = vpop.f32.mrf.mxu2  ;;  %v2574_v12 = vadd.f32 %v5851_v6, %v2560_v43 }
 0x9ba   :  { %v2586_v1 = vmax.f32 %v2574_v12, 0.0 }
 0x9bc   :  { %v2669_v26 = vpop.f32.mrf.mxu1 }
 0x9bd   :  { %v2561_v46 = vpop.f32.mrf.mxu3  ;;  %v2670_v7 = vadd.f32 %v2669_v26, %v2650_v36 }
 0x9be   :  { %v2562_v29 = vadd.f32 %v2561_v46, %v2522_v44  ;;  %v3903_v46 = vld [vmem:[%s5928_s11 + $0x18] sm:$0xff] }
 0x9c0   :  { %v2575_v4 = vadd.f32 %v5851_v6, %v2562_v29 }
 0x9c2   :  { %v2587_v39 = vmax.f32 %v2575_v4, 0.0 }
 0x9c4   :  { %v2593_v34 = vpack.c.bf16 %v2587_v39, %v2586_v1  ;;  %v2672_v5 = vpop.f32.mrf.mxu1 }
 0x9c5   :  { %v2673_v51 = vadd.f32 %v2672_v5, %v2653_v41 }
 0x9c6   :  { %2627 = vmatmul.bf16.gmra.mxu0 %v2593_v34 }
 0x9cc   :  { %v2674_v47 = vpop.f32.mrf.mxu1 }
 0x9cd   :  { %v2675_v33 = vadd.f32 %v2674_v47, %v2655_v53 }
 0x9f3   :  { %v2603_v11 = vpop.f32.mrf.mxu0 }
 0x9fb   :  { %v2605_v31 = vpop.f32.mrf.mxu0 }
 0x9fc   :  { %v2633_v49 = vpack.c.bf16 %v2605_v31, %v2603_v11 }
 0xa03   :  { %v2608_v22 = vpop.f32.mrf.mxu0 }
 0xa0b   :  { %v2610_v9 = vpop.f32.mrf.mxu0 }
 0xa0c   :  { %v2634_v24 = vpack.c.bf16 %v2610_v9, %v2608_v22 }
 0xa13   :  { %v2613_v21 = vpop.f32.mrf.mxu0 }
 0xa1b   :  { %v2615_v27 = vpop.f32.mrf.mxu0 }
 0xa1c   :  { %v2635_v2 = vpack.c.bf16 %v2615_v27, %v2613_v21 }
 0xa23   :  { %v2618_v60 = vpop.f32.mrf.mxu0 }
 0xa2b   :  { %v2620_v16 = vpop.f32.mrf.mxu0 }
 0xa2c   :  { %v2636_v62 = vpack.c.bf16 %v2620_v16, %v2618_v60 }
 0xa33   :  { %v2623_v3 = vpop.f32.mrf.mxu0 }
 0xa3b   :  { %v2625_v13 = vpop.f32.mrf.mxu0 }
 0xa3c   :  { %v2637_v6 = vpack.c.bf16 %v2625_v13, %v2623_v3 }
 0xa43   :  { %v2628_v45 = vpop.f32.mrf.mxu0 }
 0xa4b   :  { %v2630_v56 = vpop.f32.mrf.mxu0 }
 0xa4c   :  { %v2638_v57 = vpack.c.bf16 %v2630_v56, %v2628_v45 }
 0xa4e   :  { %2679 = vmatpush.bf16.msra.mxu1 %v2638_v57 }
 0xa52   :  { %2680 = vmatpush.bf16.msra.mxu1 %v2637_v6 }
 0xa56   :  { %2681 = vmatpush.bf16.msra.mxu1 %v2636_v62 }
 0xa5a   :  { %2682 = vmatpush.bf16.msra.mxu1 %v2635_v2  ;;  %v3853_v2 = vld [vmem:[%s5919_s2] sm:$0x10] }
 0xa5e   :  { %2683 = vmatpush.bf16.msra.mxu1 %v2634_v24 }
 0xa62   :  { %2684 = vmatpush.bf16.msra.mxu1 %v2633_v49 }
 0xa65   :  { %3647 = vmatmul.msk.bf16.vlgmr.msra.gmra.mxu1 %vm1848_vm3, %v6086_v19  ;;  %v3900_v19 = vld [vmem:[%s5928_s11] sm:$0xff] }
 0xa75   :  { %3648 = vmatmul.msk.bf16.gmra.mxu1 %vm1848_vm3, %v6091_v40  ;;  %v3901_v40 = vld [vmem:[%s5928_s11 + $0x8] sm:$0xff] }
 0xae2   :  { %v2686_v18 = vpop.f32.mrf.mxu1 }
 0xae3   :  { %v2687_v48 = vadd.f32 %v2686_v18, %v2668_v25 }
 0xae5   :  { %v2696_v35 = vadd.f32 %v3900_v19, %v2687_v48 }
 0xae7   :  { %v2700_v0 = vmax.f32 %v2696_v35, 0.0 }
 0xaea   :  { %v2688_v20 = vpop.f32.mrf.mxu1 }
 0xaeb   :  { %v2689_v15 = vadd.f32 %v2688_v20, %v2670_v7 }
 0xaed   :  { %v2697_v10 = vadd.f32 %v3901_v40, %v2689_v15 }
 0xaef   :  { %v2701_v30 = vmax.f32 %v2697_v10, 0.0 }
 0xaf1   :  { %v2704_v50 = vpack.c.bf16 %v2701_v30, %v2700_v0 }
 0xaf2   :  { %v2691_v58 = vpop.f32.mrf.mxu1 }
 0xaf3   :  { %2714 = vmatmul.bf16.vlgmr.msrb.gmra.mxu2 %v2704_v50  ;;  %2733 = vmatmul.bf16.vlgmr.msrb.gmra.mxu3 %v2704_v50  ;;  %v2692_v59 = vadd.f32 %v2691_v58, %v2673_v51 }
 0xaf5   :  { %v2698_v43 = vadd.f32 %v3902_v17, %v2692_v59 }
 0xaf7   :  { %v2702_v29 = vmax.f32 %v2698_v43, 0.0 }
 0xafa   :  { %v2693_v61 = vpop.f32.mrf.mxu1 }
 0xafb   :  { %v2694_v44 = vadd.f32 %v2693_v61, %v2675_v33 }
 0xafd   :  { %v2699_v12 = vadd.f32 %v3903_v46, %v2694_v44 }
 0xaff   :  { %v2703_v4 = vmax.f32 %v2699_v12, 0.0 }
 0xb01   :  { %v2705_v1 = vpack.c.bf16 %v2703_v4, %v2702_v29 }
 0xb03   :  { %2719 = vmatmul.bf16.gmra.mxu2 %v2705_v1  ;;  %2738 = vmatmul.bf16.gmra.mxu3 %v2705_v1 }
 0xb76   :  { %v2715_v39 = vpop.f32.mrf.mxu2  ;;  %v2734_v34 = vpop.f32.mrf.mxu3 }
 0xb77   :  { %v2744_v45 = vadd.f32 %v2715_v39, %v5725_v14  ;;  %v2745_v56 = vadd.f32 %v2734_v34, %v5728_v52  ;;  %v3651_v52 = vld [vmem:[%s5919_s2] sm:$0xf] }
 0xb78   :  { %v3652_v41 = vor.u32 %v3853_v2, %v3651_v52 }
 0xb79   :  { %v2753_v14 = vadd.f32 %v2745_v56, %v6098_v42 }
 0xb7e   :  { %v2717_v11 = vpop.f32.mrf.mxu2  ;;  %v2736_v31 = vpop.f32.mrf.mxu3 }
 0xb7f   :  { %v2746_v60 = vadd.f32 %v2717_v11, %v5731_v55  ;;  %v2747_v16 = vadd.f32 %v2736_v31, %v5734_v37 }
 0xb81   :  { %v2754_v55 = vadd.f32 %v2746_v60, %v6097_v23  ;;  %v2755_v37 = vadd.f32 %v2747_v16, %v6098_v42 }
 0xb83   :  { %v2763_v36 = vpack.c.bf16 %v2755_v37, %v2753_v14 }
 0xb86   :  { %v2720_v49 = vpop.f32.mrf.mxu2  ;;  %v2739_v22 = vpop.f32.mrf.mxu3 }
 0xb87   :  { %v2748_v9 = vadd.f32 %v2720_v49, %v5754_v54  ;;  %v2749_v24 = vadd.f32 %v2739_v22, %v5757_v8 }
 0xb89   :  { %v2756_v57 = vadd.f32 %v2748_v9, %v6097_v23  ;;  %v2757_v54 = vadd.f32 %v2749_v24, %v6098_v42 }
 0xb8e   :  { %v2722_v21 = vpop.f32.mrf.mxu2  ;;  %v2741_v27 = vpop.f32.mrf.mxu3 }
 0xb8f   :  { %v2750_v3 = vadd.f32 %v2722_v21, %v5760_v38  ;;  %v2751_v13 = vadd.f32 %v2741_v27, %v5763_v32  ;;  %v2752_v32 = vadd.f32 %v2744_v45, %v6097_v23 }
 0xb91   :  { %v2758_v8 = vadd.f32 %v2750_v3, %v6097_v23  ;;  %v2759_v6 = vadd.f32 %v2751_v13, %v6098_v42  ;;  %v2762_v63 = vpack.c.bf16 %v2754_v55, %v2752_v32 }
 0xb93   :  { %v2764_v62 = vpack.c.bf16 %v2758_v8, %v2756_v57  ;;  %v2765_v38 = vpack.c.bf16 %v2759_v6, %v2757_v54 }
 0xb95   :  { %2780 = vmatpush.bf16.msrb.mxu0 %v2764_v62  ;;  %2794 = vmatpush.bf16.msrb.mxu1 %v2765_v38 }
 0xb99   :  { %2781 = vmatpush.bf16.msrb.mxu0 %v2762_v63  ;;  %2795 = vmatpush.bf16.msrb.mxu1 %v2763_v36 }
 0xb9c   :  { %3653 = vmatmul.msk.bf16.vlgmr.msrb.gmra.mxu0 %vm1372_vm2, %v3652_v41  ;;  %3654 = vmatmul.msk.bf16.vlgmr.msrb.gmra.mxu1 %vm1372_vm2, %v3652_v41 }
 0xc19   :  { %v2783_v23 = vpop.f32.mrf.mxu0  ;;  %v2797_v42 = vpop.f32.mrf.mxu1 }
 0xc1a   :  { %2802 = vst [vmem:[%s5932_s15] sm:$0xff] %v2783_v23 }
 0xc1b   :  { %2803 = vst [vmem:[%s5932_s15 + $0x8] sm:$0xff] %v2797_v42 }
 0xc21   :  { %v2785_v53 = vpop.f32.mrf.mxu0  ;;  %v2799_v28 = vpop.f32.mrf.mxu1 }
 0xc22   :  { %2804 = vst [vmem:[%s5932_s15 + $0x10] sm:$0x3] %v2785_v53 }
 0xc23   :  { %2805 = vst [vmem:[%s5932_s15 + $0x18] sm:$0x3] %v2799_v28 }
 0xc24   :  { %2810 = vsyncpa [#allocation3], 1 }

</bundles_post_ra>
